<compile_context>
chip_gen: v7x
topology: tpu7x:2x2x1
jax: 0.10.0
libtpu: 0.0.40
codegen_flags: <defaults>
</compile_context>

<pallas_src>
import jax
import jax.numpy as jnp
from jax.experimental import pallas as pl
from jax.experimental.pallas import tpu as pltpu

EPS = 1e-5


def ftucker_kernel(head_ref, rel_in_ref, tail_ref,
                   e_emb_blk_ref, r_emb_blk_ref, h_bias_ref,
                   wp2_ref, csel_ref, amask_ref,
                   bn1_scale_ref, bn1_shift_ref, out_ref):
    """Gb independent FTuckER problems per grid step (B == rank == entity_dim).

    Lane packing (last axis) is g-major:
      head   : (B, Gb*E)   [b,  g*E  + e]
      rel_in : (B, Gb*Rd)  [c,  g*Rd + d]
      tail   : (R, Gb*R)   [a,  g*R  + r]
      output : (1, Gb*B)   [    g*B  + b]
    """
    R = wp2_ref.shape[1]           # rank (== B == E)
    GbR = tail_ref.shape[2]        # Gb * R lanes

    head = head_ref[0]             # (B, Gb*E)
    relation = rel_in_ref[0]       # (B, Gb*Rd)
    tail = tail_ref[0]             # (R, Gb*R)

    # ---- embedding projections (MXU, block-diagonal weights give per-problem
    #      lane segments directly).  bn0 is already folded into e_emb / h_bias.
    h = jnp.dot(head, e_emb_blk_ref[...],
                preferred_element_type=jnp.float32) + h_bias_ref[...]      # (B, Gb*R)  [b, g*R+r]
    rel = jnp.dot(relation, r_emb_blk_ref[...],
                  preferred_element_type=jnp.float32)                      # (B, Gb*R)  [c, g*R+r]

    # ---- Tucker core contraction (tall-M, lane-dense) --------------------------
    # s[(b*R + c), (g*R + r)] = sum_a W[a,b,c] * tail[g,a,r]
    s = jnp.dot(wp2_ref[...], tail, preferred_element_type=jnp.float32)    # (R*R, Gb*R)
    s3 = s.reshape(R, R, GbR)                                              # (b, c, gr) — sublane split, no relayout
    q = jnp.sum(s3 * rel[None, :, :], axis=1)                              # (B, Gb*R): sum_c
    p = q * h                                                              # (B, Gb*R): h[g,b,r]*K[g,b,r]

    # ---- reduce over r AND re-orient (b, g) -> dense row [g*B + b] -------------
    #   z[b, g*B+b'] = sum_r p[b, g*R+r]          (csel[(g*R+r),(g'*B+b')] = [g==g'])
    #   row[g*B+b]   = sum_b z[b, g*B+b']*(b==b') (amask)
    z = jnp.dot(p.astype(csel_ref.dtype), csel_ref[...],
                preferred_element_type=jnp.float32)                        # (B, Gb*B)
    core = jnp.sum(z * amask_ref[...], axis=0, keepdims=True)              # (1, Gb*B)

    # ---- leaky_relu(0.2); dropouts are eval identities; bn1 folded to rows -----
    core = jnp.where(core >= 0.0, core, 0.2 * core)
    core = core * bn1_scale_ref[...] + bn1_shift_ref[...]

    out_ref[0] = jax.nn.sigmoid(core)                                      # (1, Gb*B) dense row store


def _default_gb():
    """Problems fused per grid step: 4 on v5* (128-wide MXU), 8 on v6e/v7x (256)."""
    try:
        kind = jax.devices()[0].device_kind.lower()
    except Exception:
        return 8
    return 4 if "v5" in kind else 8


def _pack_lane(x, gsteps, gb):
    """(gsteps*gb, rows, cols) -> (gsteps, rows, gb*cols), lane index g*cols+col."""
    _, rows, cols = x.shape
    return x.reshape(gsteps, gb, rows, cols).transpose(0, 2, 1, 3).reshape(
        gsteps, rows, gb * cols)


def ftucker_forward_batched(head, relation, tail, core_tensor, e_emb, r_emb,
                            bn0_params, bn1_params, *, gb=None,
                            mxu_dtype=jnp.bfloat16):
    """head/relation/tail: (G, B, E)/(G, B, Rd)/(G, B, R) — G independent problems."""
    G, B, E = head.shape
    Rd = relation.shape[2]
    R = core_tensor.shape[0]
    assert B == R and B == E, "reference einsum/bn1 require batch == rank == entity_dim"

    if gb is None:
        gb = _default_gb()
    gb = max(1, min(gb, G))
    # Keep >= 2 grid steps when possible so v7x's second TensorCore gets work.
    while gb > 1 and -(-G // gb) < 2:
        gb //= 2
    gsteps = -(-G // gb)
    Gp = gsteps * gb
    if Gp != G:
        pad = Gp - G
        zpad = lambda a: jnp.concatenate(
            [a, jnp.zeros((pad,) + a.shape[1:], a.dtype)], axis=0)
        head, relation, tail = zpad(head), zpad(relation), zpad(tail)

    g0, b0, m0, v0 = bn0_params
    g1, b1, m1, v1 = bn1_params

    # ---- parameter-setup glue (plain JAX, once per call) ----------------------
    # Fold bn0 (eval-mode affine) into the entity embedding (HIGHEST precision).
    s0 = g0 * jax.lax.rsqrt(v0 + EPS)                                  # (E,)
    e_emb_eff = s0[:, None] * e_emb                                    # (E, R)
    h_bias = jnp.matmul((b0 - m0 * s0)[None, :], e_emb,
                        precision=jax.lax.Precision.HIGHEST)[0]        # (R,)
    # Fold bn1 (eval-mode affine) into per-channel scale/shift rows (channel == b).
    s1 = g1 * jax.lax.rsqrt(v1 + EPS)                                  # (B,)
    bn1_scale_row = jnp.tile(s1, gb)[None, :].astype(jnp.float32)      # (1, gb*B)
    bn1_shift_row = jnp.tile(b1 - m1 * s1, gb)[None, :].astype(jnp.float32)

    # ---- resident kernel operands (layout plumbing once per call) -------------
    wp2 = jnp.transpose(core_tensor, (1, 2, 0)).reshape(R * R, R).astype(mxu_dtype)
    eye_g = jnp.eye(gb, dtype=jnp.float32)
    e_emb_blk = jnp.kron(eye_g, e_emb_eff).astype(mxu_dtype)           # (gb*E, gb*R) block-diag
    r_emb_blk = jnp.kron(eye_g, r_emb).astype(mxu_dtype)               # (gb*Rd, gb*R) block-diag
    h_bias_row = jnp.tile(h_bias, gb)[None, :].astype(jnp.float32)     # (1, gb*R)
    csel = jnp.kron(eye_g, jnp.ones((R, B), jnp.float32)).astype(mxu_dtype)  # (gb*R, gb*B)
    amask = jnp.tile(jnp.eye(B, dtype=jnp.float32), (1, gb))           # (B, gb*B)

    # ---- lane-pack the streamed inputs (gb problems per grid step) ------------
    head_pk = _pack_lane(head, gsteps, gb).astype(mxu_dtype)           # (gsteps, B, gb*E)
    relation_pk = _pack_lane(relation, gsteps, gb).astype(mxu_dtype)   # (gsteps, B, gb*Rd)
    tail_pk = _pack_lane(tail, gsteps, gb).astype(mxu_dtype)           # (gsteps, R, gb*R)

    out = pl.pallas_call(
        ftucker_kernel,
        out_shape=jax.ShapeDtypeStruct((gsteps, 1, gb * B), jnp.float32),
        grid=(gsteps,),
        in_specs=[
            pl.BlockSpec((1, B, gb * E), lambda g: (g, 0, 0)),    # head      (streamed)
            pl.BlockSpec((1, B, gb * Rd), lambda g: (g, 0, 0)),   # relation  (streamed)
            pl.BlockSpec((1, R, gb * R), lambda g: (g, 0, 0)),    # tail      (streamed)
            pl.BlockSpec((gb * E, gb * R), lambda g: (0, 0)),     # e_emb block-diag (resident)
            pl.BlockSpec((gb * Rd, gb * R), lambda g: (0, 0)),    # r_emb block-diag (resident)
            pl.BlockSpec((1, gb * R), lambda g: (0, 0)),          # bn0-folded bias row
            pl.BlockSpec((R * R, R), lambda g: (0, 0)),           # Wp2 (resident)
            pl.BlockSpec((gb * R, gb * B), lambda g: (0, 0)),     # r-reduce selector
            pl.BlockSpec((B, gb * B), lambda g: (0, 0)),          # diag mask
            pl.BlockSpec((1, gb * B), lambda g: (0, 0)),          # bn1 scale row
            pl.BlockSpec((1, gb * B), lambda g: (0, 0)),          # bn1 shift row
        ],
        out_specs=pl.BlockSpec((1, 1, gb * B), lambda g: (g, 0, 0)),
        compiler_params=pltpu.CompilerParams(
            dimension_semantics=("parallel",)),
    )(head_pk, relation_pk, tail_pk, e_emb_blk, r_emb_blk, h_bias_row, wp2,
      csel, amask, bn1_scale_row, bn1_shift_row)

    return out.reshape(Gp, B)[:G]                                     # (G, B)


def ftucker_forward(head, relation, tail, core_tensor, e_emb, r_emb,
                    bn0_params, bn1_params, *, mxu_dtype=jnp.bfloat16):
    """Single-problem forward matching the PyTorch module signature; returns (B,)."""
    out = ftucker_forward_batched(head[None], relation[None], tail[None],
                                  core_tensor, e_emb, r_emb,
                                  bn0_params, bn1_params, mxu_dtype=mxu_dtype)
    return out[0]


def ftucker_reference(head, relation, tail, core_tensor, e_emb, r_emb,
                      bn0_params, bn1_params):
    g0, b0, m0, v0 = bn0_params
    g1, b1, m1, v1 = bn1_params
    hd = (head - m0) / jnp.sqrt(v0 + EPS) * g0 + b0
    h = jnp.matmul(hd, e_emb, precision=jax.lax.Precision.HIGHEST)
    rel = jnp.matmul(relation, r_emb, precision=jax.lax.Precision.HIGHEST)
    out = jnp.einsum('abc,br,cr,ar->b', core_tensor, h, rel, tail,
                     precision=jax.lax.Precision.HIGHEST)
    out = jnp.where(out >= 0, out, 0.2 * out)
    out = (out - m1) / jnp.sqrt(v1 + EPS) * g1 + b1
    return jax.nn.sigmoid(out)


if __name__ == "__main__":
    # Shapes consistent with the module (batch == rank == entity_dim), with G
    # independent problems; gb of them are fused per grid step.
    B = 32           # batch
    E = 32           # entity_dim
    Rd = 16          # relation_dim
    R = 32           # rank
    G = 32           # independent FTuckER evaluations per call

    key = jax.random.PRNGKey(0)
    ks = jax.random.split(key, 12)

    # Parameters (deterministic, synthetic; BN params non-trivial to exercise folding).
    core_tensor = jax.random.uniform(ks[0], (R, R, R), jnp.float32, -1.0, 1.0)
    e_emb = ((2.0 / (E + R)) ** 0.5) * jax.random.normal(ks[1], (E, R), jnp.float32)
    r_emb = ((2.0 / (Rd + R)) ** 0.5) * jax.random.normal(ks[2], (Rd, R), jnp.float32)
    bn0_params = (1.0 + 0.1 * jax.random.normal(ks[3], (E,), jnp.float32),   # gamma
                  0.1 * jax.random.normal(ks[4], (E,), jnp.float32),          # beta
                  0.1 * jax.random.normal(ks[5], (E,), jnp.float32),          # running_mean
                  jax.random.uniform(ks[6], (E,), jnp.float32, 0.5, 1.5))     # running_var
    bn1_params = (1.0 + 0.1 * jax.random.normal(ks[7], (E,), jnp.float32),
                  0.1 * jax.random.normal(ks[8], (E,), jnp.float32),
                  0.1 * jax.random.normal(ks[9], (E,), jnp.float32),
                  jax.random.uniform(ks[10], (E,), jnp.float32, 0.5, 1.5))

    # Inputs; scaled so the pre-sigmoid core output is O(1) and the sigmoid stays
    # in its sensitive range (meaningful comparison instead of saturated 0/1).
    kh, kr, kt = jax.random.split(ks[11], 3)
    scale = 0.25
    head = scale * jax.random.normal(kh, (G, B, E), jnp.float32)
    relation = scale * jax.random.normal(kr, (G, B, Rd), jnp.float32)
    tail = scale * jax.random.normal(kt, (G, B, R), jnp.float32)

    ref = jax.vmap(lambda h_, r_, t_: ftucker_reference(
        h_, r_, t_, core_tensor, e_emb, r_emb, bn0_params, bn1_params))(
            head, relation, tail)

    # --- f32 MXU path: tight check --------------------------------------------
    pred_f32 = ftucker_forward_batched(head, relation, tail, core_tensor, e_emb,
                                       r_emb, bn0_params, bn1_params,
                                       mxu_dtype=jnp.float32)
    pred_f32 = jax.block_until_ready(pred_f32)
    assert pred_f32.shape == (G, B)
    assert jnp.allclose(pred_f32, ref, rtol=1e-3, atol=2e-3), \
        f"f32 path max abs diff {jnp.max(jnp.abs(pred_f32 - ref))}"

    # --- bf16-operand / f32-accumulation path (hardware-native, default) -------
    pred_bf16 = ftucker_forward_batched(head, relation, tail, core_tensor, e_emb,
                                        r_emb, bn0_params, bn1_params)
    pred_bf16 = jax.block_until_ready(pred_bf16)
    assert pred_bf16.shape == (G, B)
    assert jnp.allclose(pred_bf16, ref, rtol=2e-2, atol=2e-2), \
        f"bf16 path max abs diff {jnp.max(jnp.abs(pred_bf16 - ref))}"

    # --- single-problem wrapper (module-equivalent forward) --------------------
    pred1 = ftucker_forward(head[0], relation[0], tail[0], core_tensor, e_emb,
                            r_emb, bn0_params, bn1_params)
    pred1 = jax.block_until_ready(pred1)
    assert pred1.shape == (B,)
    assert jnp.allclose(pred1, ref[0], rtol=2e-2, atol=2e-2), \
        f"single-problem max abs diff {jnp.max(jnp.abs(pred1 - ref[0]))}"

    print("KERNEL_OK")
</pallas_src>

<mosaic_0001>
module attributes {stable_mosaic.version = 11 : i64} {
  func.func @ftucker_kernel(%arg0: i32, %arg1: memref<1x32x256xf32, #tpu.memory_space<vmem>>, %arg2: memref<1x32x128xf32, #tpu.memory_space<vmem>>, %arg3: memref<1x32x256xf32, #tpu.memory_space<vmem>>, %arg4: memref<256x256xf32, #tpu.memory_space<vmem>>, %arg5: memref<128x256xf32, #tpu.memory_space<vmem>>, %arg6: memref<1x256xf32, #tpu.memory_space<vmem>>, %arg7: memref<1024x32xf32, #tpu.memory_space<vmem>>, %arg8: memref<256x256xf32, #tpu.memory_space<vmem>>, %arg9: memref<32x256xf32, #tpu.memory_space<vmem>>, %arg10: memref<1x256xf32, #tpu.memory_space<vmem>>, %arg11: memref<1x256xf32, #tpu.memory_space<vmem>>, %arg12: memref<1x1x256xf32, #tpu.memory_space<vmem>>) attributes {dimension_semantics = [#tpu.dimension_semantics<parallel>], iteration_bounds = array<i64: 4>, scalar_prefetch = 0 : i64, scratch_operands = 0 : i64, tpu.core_type = #tpu.core_type<tc>, window_params = [{transform_indices = @transform_0, window_bounds = array<i64: 1, 32, 256>}, {transform_indices = @transform_1, window_bounds = array<i64: 1, 32, 128>}, {transform_indices = @transform_2, window_bounds = array<i64: 1, 32, 256>}, {pipeline_mode = #tpu.pipeline_mode<synchronous>, transform_indices = @transform_3, window_bounds = array<i64: 256, 256>}, {pipeline_mode = #tpu.pipeline_mode<synchronous>, transform_indices = @transform_4, window_bounds = array<i64: 128, 256>}, {pipeline_mode = #tpu.pipeline_mode<synchronous>, transform_indices = @transform_5, window_bounds = array<i64: 1, 256>}, {pipeline_mode = #tpu.pipeline_mode<synchronous>, transform_indices = @transform_6, window_bounds = array<i64: 1024, 32>}, {pipeline_mode = #tpu.pipeline_mode<synchronous>, transform_indices = @transform_7, window_bounds = array<i64: 256, 256>}, {pipeline_mode = #tpu.pipeline_mode<synchronous>, transform_indices = @transform_8, window_bounds = array<i64: 32, 256>}, {pipeline_mode = #tpu.pipeline_mode<synchronous>, transform_indices = @transform_9, window_bounds = array<i64: 1, 256>}, {pipeline_mode = #tpu.pipeline_mode<synchronous>, transform_indices = @transform_10, window_bounds = array<i64: 1, 256>}, {transform_indices = @transform_11, window_bounds = array<i64: 1, 1, 256>}]} {
    %c0 = arith.constant 0 : index
    %c0_0 = arith.constant 0 : index
    %c0_1 = arith.constant 0 : index
    %0 = vector.load %arg1[%c0, %c0_0, %c0_1] : memref<1x32x256xf32, #tpu.memory_space<vmem>>, vector<1x32x256xf32>
    %1 = vector.shape_cast %0 : vector<1x32x256xf32> to vector<32x256xf32>
    %c0_2 = arith.constant 0 : index
    %c0_3 = arith.constant 0 : index
    %c0_4 = arith.constant 0 : index
    %2 = vector.load %arg2[%c0_2, %c0_3, %c0_4] : memref<1x32x128xf32, #tpu.memory_space<vmem>>, vector<1x32x128xf32>
    %3 = vector.shape_cast %2 : vector<1x32x128xf32> to vector<32x128xf32>
    %c0_5 = arith.constant 0 : index
    %c0_6 = arith.constant 0 : index
    %c0_7 = arith.constant 0 : index
    %4 = vector.load %arg3[%c0_5, %c0_6, %c0_7] : memref<1x32x256xf32, #tpu.memory_space<vmem>>, vector<1x32x256xf32>
    %5 = vector.shape_cast %4 : vector<1x32x256xf32> to vector<32x256xf32>
    %c0_8 = arith.constant 0 : index
    %c0_9 = arith.constant 0 : index
    %6 = vector.load %arg4[%c0_8, %c0_9] : memref<256x256xf32, #tpu.memory_space<vmem>>, vector<256x256xf32>
    %cst = arith.constant dense<0.000000e+00> : vector<32x256xf32>
    %7 = tpu.matmul %1, %6, %cst {dimension_numbers = #tpu.dot_dimension_numbers<[1], [0], [0], [1], [0, 0, 1, 1], [], []>} : vector<32x256xf32>, vector<256x256xf32>, vector<32x256xf32> -> vector<32x256xf32>
    %c0_10 = arith.constant 0 : index
    %c0_11 = arith.constant 0 : index
    %8 = vector.load %arg6[%c0_10, %c0_11] : memref<1x256xf32, #tpu.memory_space<vmem>>, vector<1x256xf32>
    %9 = vector.broadcast %8 : vector<1x256xf32> to vector<32x256xf32>
    %10 = arith.addf %7, %9 : vector<32x256xf32>
    %c0_12 = arith.constant 0 : index
    %c0_13 = arith.constant 0 : index
    %11 = vector.load %arg5[%c0_12, %c0_13] : memref<128x256xf32, #tpu.memory_space<vmem>>, vector<128x256xf32>
    %cst_14 = arith.constant dense<0.000000e+00> : vector<32x256xf32>
    %12 = tpu.matmul %3, %11, %cst_14 {dimension_numbers = #tpu.dot_dimension_numbers<[1], [0], [0], [1], [0, 0, 1, 1], [], []>} : vector<32x128xf32>, vector<128x256xf32>, vector<32x256xf32> -> vector<32x256xf32>
    %c0_15 = arith.constant 0 : index
    %c0_16 = arith.constant 0 : index
    %13 = vector.load %arg7[%c0_15, %c0_16] : memref<1024x32xf32, #tpu.memory_space<vmem>>, vector<1024x32xf32>
    %cst_17 = arith.constant dense<0.000000e+00> : vector<1024x256xf32>
    %14 = tpu.matmul %13, %5, %cst_17 {dimension_numbers = #tpu.dot_dimension_numbers<[1], [0], [0], [1], [0, 0, 1, 1], [], []>} : vector<1024x32xf32>, vector<32x256xf32>, vector<1024x256xf32> -> vector<1024x256xf32>
    %15 = vector.shape_cast %14 : vector<1024x256xf32> to vector<32x32x256xf32>
    %16 = vector.shape_cast %12 : vector<32x256xf32> to vector<1x32x256xf32>
    %17 = vector.broadcast %16 : vector<1x32x256xf32> to vector<32x32x256xf32>
    %18 = arith.mulf %15, %17 : vector<32x32x256xf32>
    %cst_18 = arith.constant dense<0.000000e+00> : vector<32x256xf32>
    %19 = vector.multi_reduction <add>, %18, %cst_18 [1] : vector<32x32x256xf32> to vector<32x256xf32>
    %20 = arith.mulf %19, %10 : vector<32x256xf32>
    %c0_19 = arith.constant 0 : index
    %c0_20 = arith.constant 0 : index
    %21 = vector.load %arg8[%c0_19, %c0_20] : memref<256x256xf32, #tpu.memory_space<vmem>>, vector<256x256xf32>
    %cst_21 = arith.constant dense<0.000000e+00> : vector<32x256xf32>
    %22 = tpu.matmul %20, %21, %cst_21 {dimension_numbers = #tpu.dot_dimension_numbers<[1], [0], [0], [1], [0, 0, 1, 1], [], []>} : vector<32x256xf32>, vector<256x256xf32>, vector<32x256xf32> -> vector<32x256xf32>
    %c0_22 = arith.constant 0 : index
    %c0_23 = arith.constant 0 : index
    %23 = vector.load %arg9[%c0_22, %c0_23] : memref<32x256xf32, #tpu.memory_space<vmem>>, vector<32x256xf32>
    %24 = arith.mulf %22, %23 : vector<32x256xf32>
    %cst_24 = arith.constant dense<0.000000e+00> : vector<256xf32>
    %25 = vector.multi_reduction <add>, %24, %cst_24 [0] : vector<32x256xf32> to vector<256xf32>
    %26 = vector.shape_cast %25 : vector<256xf32> to vector<1x256xf32>
    %cst_25 = arith.constant 0.000000e+00 : f32
    %27 = vector.broadcast %cst_25 : f32 to vector<1x256xf32>
    %28 = arith.cmpf oge, %26, %27 : vector<1x256xf32>
    %cst_26 = arith.constant 2.000000e-01 : f32
    %29 = vector.broadcast %cst_26 : f32 to vector<1x256xf32>
    %30 = arith.mulf %29, %26 : vector<1x256xf32>
    %31 = arith.select %28, %26, %30 : vector<1x256xi1>, vector<1x256xf32>
    %c0_27 = arith.constant 0 : index
    %c0_28 = arith.constant 0 : index
    %32 = vector.load %arg10[%c0_27, %c0_28] : memref<1x256xf32, #tpu.memory_space<vmem>>, vector<1x256xf32>
    %33 = arith.mulf %31, %32 : vector<1x256xf32>
    %c0_29 = arith.constant 0 : index
    %c0_30 = arith.constant 0 : index
    %34 = vector.load %arg11[%c0_29, %c0_30] : memref<1x256xf32, #tpu.memory_space<vmem>>, vector<1x256xf32>
    %35 = arith.addf %33, %34 : vector<1x256xf32>
    %36 = arith.negf %35 : vector<1x256xf32>
    %37 = math.exp %36 : vector<1x256xf32>
    %cst_31 = arith.constant 1.000000e+00 : f32
    %38 = vector.broadcast %cst_31 : f32 to vector<1x256xf32>
    %39 = arith.addf %38, %37 : vector<1x256xf32>
    %40 = arith.divf %38, %39 : vector<1x256xf32>
    %c0_32 = arith.constant 0 : index
    %c0_33 = arith.constant 0 : index
    %c0_34 = arith.constant 0 : index
    %41 = vector.load %arg12[%c0_32, %c0_33, %c0_34] : memref<1x1x256xf32, #tpu.memory_space<vmem>>, vector<1x1x256xf32>
    %42 = vector.shape_cast %41 : vector<1x1x256xf32> to vector<1x256xf32>
    %43 = vector.shape_cast %40 : vector<1x256xf32> to vector<1x1x256xf32>
    tpu.vector_store %arg12[%c0_32, %c0_33, %c0_34], %43 {strides = array<i32>} : memref<1x1x256xf32, #tpu.memory_space<vmem>>, vector<1x1x256xf32>,
    return
  }
  func.func @transform_0(%arg0: i32) -> (i32, i32, i32) {
    %c0_i32 = arith.constant 0 : i32
    %c0_i32_0 = arith.constant 0 : i32
    %c0_i32_1 = arith.constant 0 : i32
    return %arg0, %c0_i32, %c0_i32_0 : i32, i32, i32
  }
  func.func @transform_1(%arg0: i32) -> (i32, i32, i32) {
    %c0_i32 = arith.constant 0 : i32
    %c0_i32_0 = arith.constant 0 : i32
    %c0_i32_1 = arith.constant 0 : i32
    return %arg0, %c0_i32, %c0_i32_0 : i32, i32, i32
  }
  func.func @transform_2(%arg0: i32) -> (i32, i32, i32) {
    %c0_i32 = arith.constant 0 : i32
    %c0_i32_0 = arith.constant 0 : i32
    %c0_i32_1 = arith.constant 0 : i32
    return %arg0, %c0_i32, %c0_i32_0 : i32, i32, i32
  }
  func.func @transform_3(%arg0: i32) -> (i32, i32) {
    %c0_i32 = arith.constant 0 : i32
    %c0_i32_0 = arith.constant 0 : i32
    %c0_i32_1 = arith.constant 0 : i32
    return %c0_i32, %c0_i32_0 : i32, i32
  }
  func.func @transform_4(%arg0: i32) -> (i32, i32) {
    %c0_i32 = arith.constant 0 : i32
    %c0_i32_0 = arith.constant 0 : i32
    %c0_i32_1 = arith.constant 0 : i32
    return %c0_i32, %c0_i32_0 : i32, i32
  }
  func.func @transform_5(%arg0: i32) -> (i32, i32) {
    %c0_i32 = arith.constant 0 : i32
    %c0_i32_0 = arith.constant 0 : i32
    %c0_i32_1 = arith.constant 0 : i32
    return %c0_i32, %c0_i32_0 : i32, i32
  }
  func.func @transform_6(%arg0: i32) -> (i32, i32) {
    %c0_i32 = arith.constant 0 : i32
    %c0_i32_0 = arith.constant 0 : i32
    %c0_i32_1 = arith.constant 0 : i32
    return %c0_i32, %c0_i32_0 : i32, i32
  }
  func.func @transform_7(%arg0: i32) -> (i32, i32) {
    %c0_i32 = arith.constant 0 : i32
    %c0_i32_0 = arith.constant 0 : i32
    %c0_i32_1 = arith.constant 0 : i32
    return %c0_i32, %c0_i32_0 : i32, i32
  }
  func.func @transform_8(%arg0: i32) -> (i32, i32) {
    %c0_i32 = arith.constant 0 : i32
    %c0_i32_0 = arith.constant 0 : i32
    %c0_i32_1 = arith.constant 0 : i32
    return %c0_i32, %c0_i32_0 : i32, i32
  }
  func.func @transform_9(%arg0: i32) -> (i32, i32) {
    %c0_i32 = arith.constant 0 : i32
    %c0_i32_0 = arith.constant 0 : i32
    %c0_i32_1 = arith.constant 0 : i32
    return %c0_i32, %c0_i32_0 : i32, i32
  }
  func.func @transform_10(%arg0: i32) -> (i32, i32) {
    %c0_i32 = arith.constant 0 : i32
    %c0_i32_0 = arith.constant 0 : i32
    %c0_i32_1 = arith.constant 0 : i32
    return %c0_i32, %c0_i32_0 : i32, i32
  }
  func.func @transform_11(%arg0: i32) -> (i32, i32, i32) {
    %c0_i32 = arith.constant 0 : i32
    %c0_i32_0 = arith.constant 0 : i32
    %c0_i32_1 = arith.constant 0 : i32
    return %arg0, %c0_i32, %c0_i32_0 : i32, i32, i32
  }
}

</mosaic_0001>

<bundles_post_ra>
// kernel: tpu_custom_call.1
= control target key start
LH: loop header
LB: loop body
LE: loop exit
PB: predicated region body
PF: predicated region fallthrough
CT: control target
= control target key end

     0   :  { %s6559_s0 = inlined_call_operand.vmem [shape: f32[4,32,256], index: 0, kind: input, shape index: {}]   ;;  %s6560_s1 = inlined_call_operand.hbm [shape: f32[4,32,128], index: 1, kind: input, shape index: {}]   ;;  %s6561_s2 = inlined_call_operand.hbm [shape: f32[4,32,256], index: 2, kind: input, shape index: {}]   ;;  %s6562_s3 = inlined_call_operand.vmem [shape: f32[256,256], index: 3, kind: input, shape index: {}]   ;;  %s6563_s4 = inlined_call_operand.hbm [shape: f32[128,256], index: 4, kind: input, shape index: {}]   ;;  %s6564_s5 = inlined_call_operand.vmem [shape: f32[1,256], index: 5, kind: input, shape index: {}]   ;;  %s6565_s6 = inlined_call_operand.vmem [shape: f32[1024,32], index: 6, kind: input, shape index: {}]   ;;  %s6566_s7 = inlined_call_operand.vmem [shape: f32[256,256], index: 7, kind: input, shape index: {}]   ;;  %s6567_s8 = inlined_call_operand.hbm [shape: f32[32,256], index: 8, kind: input, shape index: {}]   ;;  %s6568_s9 = inlined_call_operand.vmem [shape: f32[1,256], index: 9, kind: input, shape index: {}]   ;;  %s6569_s10 = inlined_call_operand.vmem [shape: f32[1,256], index: 10, kind: input, shape index: {}]   ;;  %s6570_s11 = inlined_call_operand.hbm [shape: f32[4,1,256], index: 11, kind: output, shape index: {}]  }
   0x1   :  { %6588 = sst [smem:[#allocation24_spill]] %s6560_s1 }
   0x2   :  { %6589 = sst [smem:[#allocation25_spill]] %s6563_s4 }
   0x3   :  { %6590 = sst [smem:[#allocation26_spill]] %s6567_s8 }
   0x4   :  { %6591 = sst [smem:[#allocation27_spill]] %s6570_s11 }
   0x5   :  { %16 = vsyncpa [#allocation3], 0 }
   0x6   :  { %18 = vsyncpa [#allocation3 + $0x1], 0 }
   0x7   :  { %19 = vsyncpa [#allocation6], 0 }
   0x8   :  { %21 = vsyncpa [#allocation6 + $0x1], 0 }
   0x9   :  { %22 = vsyncpa [#allocation9], 0 }
   0xa   :  { %23 = vsyncpa [#allocation4], 0 }
   0xb   :  { %25 = vsyncpa [#allocation4 + $0x1], 0  ;;  %s4439_s17 = smov 0   ;;  %s4441_s18 = smov 0  }
   0xc   :  { %s4443_s19 = smov 0   ;;  %s4445_s20 = smov 0  }
   0xd LB: > { %6592 = sst [smem:[#allocation16_spill]] %s4354_s17  ;;  %s4460_s21 = sadd.s32 4294967295, %s4366_s20   ;;  %s4366_s20 = sphi %s4445_s20, %s6677_s20   ;;  %s4362_s19 = sphi %s4443_s19, %s6679_s19   ;;  %s4358_s18 = sphi %s4441_s18, %s6681_s18   ;;  %s4354_s17 = sphi %s4439_s17, %s6680_s17  }
   0xe   : > { %6593 = sst [smem:[#allocation17_spill]] %s4362_s19  ;;  %s3756_s22 = sadd.s32 4294967294, %s4366_s20  }
   0xf   : > { %p77_p0 = scmp.ne.s32.totalorder %s4358_s18, %s4354_s17  ;;  %p6571_p1 = scmp.eq.s32.totalorder %s4460_s21, 0 }
  0x10   : > { %p301_p3 = scmp.eq.s32.totalorder %s3756_s22, 3  ;;  %p3757_p5 = scmp.ge.s32.totalorder %s4366_s20, 1 }
  0x11   : > { %p4469_p4 = por %p6571_p1, %p77_p0  ;;  %p308_p7 = scmp.lt.s32.totalorder %s4366_s20, 5 }
  0x12   : > { %p4474_p6 = por %p301_p3, %p77_p0  ;;  %s4368_s26 = smov [#allocation7]  }
  0x13   : > { %s6594_s23 = scalar_select %p4469_p4, 1, 0 }
  0x14   : > { %s6595_s24 = scalar_select %p4474_p6, 1, 0 }
  0x15   : > { %p4479_p8 = pnand %p3757_p5, %p308_p7  ;;  %s323_s27 = sshll.u32 %s4368_s26, 4  ;;  %s324_s27 = int_to_ptr.vmem [resolvable:$true] %s323_s27 }
  0x16   : > { %6596 = sst [smem:[#allocation18_spill]] %s6595_s24  ;;  %s4369_s29 = smov [#allocation8]  }
  0x17   : > { %s6597_s25 = scalar_select %p4479_p8, 1, 0 }
  0x18   : > { %p4100_p9 = pneg %p4479_p8  ;;  %s345_s30 = sshll.u32 %s4369_s29, 4  ;;  %s4491_s30 = int_to_ptr.vmem [resolvable:$true] %s345_s30 }
  0x19   : > { %s6599_s4 = sld [smem:[#allocation25_spill]] }
  0x1a   : > { %p4487_p10 = pnand %p4100_p9, %p6571_p1 }
  0x1c   : > { %p4174_p12 = pneg %p4487_p10 }
  0x1f   : > { %s4172_s14 = scalar_lea.hbm %s6599_s4, 4096 }
  0x20   : > { %p4173_p11 = scmp.ne.s32.totalorder %s6599_s4, %s4172_s14  ;;  %p4179_p3 = scmp.lt.u32.totalorder %s4172_s14, %s6599_s4 }
  0x22   : > { %p4175_p13 = pnand %p4174_p12, %p4173_p11 }
  0x24   : > { %p4176_p0 = pneg %p4175_p13 }
  0x26   : > { %p4181_p5 = pnand %p4179_p3, %p4176_p0 }
  0x28   : > { %4184 = shalt.err (!%p4181_p5)
}
  0x29   : > { %s4185_s29 = scalar_lea.vmem %s324_s27, 4096  ;;  %p4193_p2 = scmp.lt.s32.totalorder %s324_s27, %s324_s27 }
  0x2a   : > { %p4186_p7 = scmp.ne.s32.totalorder %s324_s27, %s4185_s29  ;;  %p4194_p6 = scmp.lt.s32.totalorder %s4185_s29, %s4185_s29 }
  0x2c   : > { %p4188_p9 = pnand %p4186_p7, %p4174_p12  ;;  %p4195_p4 = por %p4194_p6, %p4193_p2 }
  0x2e   : > { %p4189_p1 = pneg %p4188_p9 }
  0x30   : > { %p4196_p8 = pnand %p4195_p4, %p4189_p1 }
  0x32   : > { %4199 = shalt.err (!%p4196_p8)
}
  0x33   : > { %s6577_s12 = smov 256   ;;  %s6578_s13 = smov 16  }
  0x34   : > { %4103 = dma.hbm_to_vmem [thread:$0]  (!%p4487_p10), %s6599_s4, 4096, %s324_s27, [#allocation6], %s6577_s12, %s6577_s12, %s6578_s13  }
  0x35   : > { %s6600_s8 = sld [smem:[#allocation26_spill]] }
  0x3b   : > { %s4200_s26 = scalar_lea.hbm %s6600_s8, 1024 }
  0x3c   : > { %p4201_p1 = scmp.ne.s32.totalorder %s6600_s8, %s4200_s26  ;;  %p4207_p6 = scmp.lt.u32.totalorder %s4200_s26, %s6600_s8 }
  0x3e   : > { %p4203_p2 = pnand %p4201_p1, %p4174_p12 }
  0x40   : > { %p4204_p4 = pneg %p4203_p2 }
  0x42   : > { %p4209_p8 = pnand %p4207_p6, %p4204_p4 }
  0x44   : > { %4212 = shalt.err (!%p4209_p8)
}
  0x45   : > { %s4213_s27 = scalar_lea.vmem %s4491_s30, 1024  ;;  %p4221_p3 = scmp.lt.s32.totalorder %s4491_s30, %s4491_s30 }
  0x46   : > { %p4214_p11 = scmp.ne.s32.totalorder %s4491_s30, %s4213_s27  ;;  %p4222_p5 = scmp.lt.s32.totalorder %s4213_s27, %s4213_s27 }
  0x48   : > { %p4216_p13 = pnand %p4214_p11, %p4174_p12  ;;  %p4223_p7 = por %p4222_p5, %p4221_p3 }
  0x4a   : > { %p4217_p0 = pneg %p4216_p13 }
  0x4c   : > { %p4224_p9 = pnand %p4223_p7, %p4217_p0 }
  0x4e   : > { %4227 = shalt.err (!%p4224_p9)
}
  0x4f   : > { %4106 = dma.hbm_to_vmem [thread:$0]  (!%p4487_p10), %s6600_s8, 1024, %s4491_s30, [#allocation9], %s6577_s12, %s6577_s12, %s6578_s13  }
  0x50   : > { %s4547_s24 = sadd.s32 1, %s4366_s20   ;;  %s64_s28 = sadd.s32 1, %s4362_s19 }
  0x51   : > { %6601 = sst [smem:[#allocation19_spill]] %s4547_s24  ;;  %s61_s14 = ssub.s32 %s4366_s20, %s4547_s24 }
  0x52   : > { %p71_p12 = scmp.ne.s32.totalorder %s4362_s19, %s4358_s18  ;;  %p62_p1 = scmp.eq.s32.totalorder %s61_s14, 0 }
  0x53   : > { %p72_p2 = scmp.eq.s32.totalorder %s4366_s20, 0  ;;  %p6602_p4 = scmp.eq.s32.totalorder %s4460_s21, 3 }
  0x54   : > { %p4120_p8 = scmp.lt.s32.totalorder %s4366_s20, 4  ;;  %s4566_s22 = sand.u32 1, %s4362_s19  }
  0x55   : > { %p4557_p6 = por %p6602_p4, %p71_p12  ;;  %p73_p11 = por %p72_p2, %p71_p12 }
  0x56   : > { %s4563_s16 = scalar_select %p62_p1, %s4362_s19, %s64_s28  }
  0x57   : > { %s3761_s30 = sshll.u32 %s4566_s22, 5  ;;  %s3910_s26 = sshll.u32 %s4366_s20, 9 }
  0x58   : > { %6604 = sst [smem:[#allocation20_spill]] %s4563_s16  ;;  %s6605_s1 = sld [smem:[#allocation24_spill]] }
  0x59   : > { %s377_s17 = scalar_lea.vmem [#allocation2], %s3761_s30  ;;  %p4577_p10 = pnand %p4120_p8, %p73_p11 }
  0x5a   : > { %s384_s14 = sshll.u32 %s377_s17, 4  ;;  %s374_s13 = scalar_lea.sflag [#allocation3], %s4566_s22  ;;  %s4575_s14 = int_to_ptr.vmem [resolvable:$true] %s384_s14 }
  0x5b   : > { %p4230_p0 = pneg %p4577_p10 }
  0x5e   : > { %s4573_s11 = scalar_lea.hbm %s6605_s1, %s3910_s26  ;;  %s4233_s29 = scalar_lea.hbm %s6605_s1, 2048 }
  0x5f   : > { %s4228_s4 = scalar_lea.hbm %s4573_s11, 512  ;;  %p4234_p7 = scmp.lt.u32.totalorder %s4573_s11, %s6605_s1 }
  0x60   : > { %p4229_p13 = scmp.ne.s32.totalorder %s4573_s11, %s4228_s4  ;;  %p4235_p9 = scmp.lt.u32.totalorder %s4233_s29, %s4228_s4 }
  0x61   : > { %p4237_p1 = scmp.lt.u32.totalorder %s4228_s4, %s4573_s11 }
  0x62   : > { %p4231_p3 = pnand %p4230_p0, %p4229_p13  ;;  %p4236_p12 = por %p4235_p9, %p4234_p7 }
  0x64   : > { %p4232_p5 = pneg %p4231_p3  ;;  %p4238_p2 = por %p4237_p1, %p4236_p12 }
  0x66   : > { %p4239_p4 = pnand %p4238_p2, %p4232_p5 }
  0x68   : > { %4242 = shalt.err (!%p4239_p4)
}
  0x69   : > { %s4243_s12 = scalar_lea.vmem %s4575_s14, 512  ;;  %s4372_s30 = smov [#allocation2]  }
  0x6a   : > { %p4244_p8 = scmp.ne.s32.totalorder %s4575_s14, %s4243_s12  ;;  %s4248_s26 = sshll.u32 %s4372_s30, 4  ;;  %s4249_s26 = int_to_ptr.vmem [resolvable:$false] %s4248_s26 }
  0x6b   : > { %s4250_s27 = scalar_lea.vmem %s4249_s26, 1024  ;;  %p4251_p3 = scmp.lt.s32.totalorder %s4575_s14, %s4249_s26 }
  0x6c   : > { %p4246_p11 = pnand %p4244_p8, %p4230_p0  ;;  %p4252_p7 = scmp.lt.s32.totalorder %s4250_s27, %s4243_s12 }
  0x6e   : > { %p4247_p13 = pneg %p4246_p11  ;;  %p4253_p9 = por %p4252_p7, %p4251_p3 }
  0x70   : > { %p4254_p12 = pnand %p4253_p9, %p4247_p13 }
  0x72   : > { %4257 = shalt.err (!%p4254_p12)
}
  0x73   : > { %s4373_s4 = smov 128   ;;  %s4374_s29 = smov 8  }
  0x74   : > { %4110 = dma.hbm_to_vmem [thread:$0]  (!%p4577_p10), %s4573_s11, 512, %s4575_s14, %s374_s13, %s4373_s4, %s4373_s4, %s4374_s29  }
  0x75   : > { %s3764_s17 = sshll.u32 %s4566_s22, 6  ;;  %s3911_s30 = sshll.u32 %s4366_s20, 10 }
  0x76   : > { %s4615_s27 = scalar_lea.hbm %s6561_s2, %s3911_s30  ;;  %s398_s1 = scalar_lea.vmem [#allocation5], %s3764_s17 }
  0x77   : > { %s405_s8 = sshll.u32 %s398_s1, 4  ;;  %s6607_s16 = sand.u32 1, %s4366_s20   ;;  %s4617_s8 = int_to_ptr.vmem [resolvable:$true] %s405_s8 }
  0x78   : > { %s4621_s19 = scalar_lea.sflag [#allocation6], %s6607_s16  ;;  %s4258_s24 = scalar_lea.hbm %s4615_s27, 1024 }
  0x79   : > { %p4259_p5 = scmp.ne.s32.totalorder %s4615_s27, %s4258_s24  ;;  %s4263_s11 = scalar_lea.hbm %s6561_s2, 4096 }
  0x7a   : > { %p4264_p4 = scmp.lt.u32.totalorder %s4615_s27, %s6561_s2  ;;  %p4265_p8 = scmp.lt.u32.totalorder %s4263_s11, %s4258_s24 }
  0x7b   : > { %p4261_p1 = pnand %p4259_p5, %p4230_p0  ;;  %p4267_p13 = scmp.lt.u32.totalorder %s4258_s24, %s4615_s27 }
  0x7c   : > { %p4266_p11 = por %p4265_p8, %p4264_p4 }
  0x7d   : > { %p4262_p2 = pneg %p4261_p1 }
  0x7e   : > { %p4268_p3 = por %p4267_p13, %p4266_p11 }
  0x80   : > { %p4269_p7 = pnand %p4268_p3, %p4262_p2 }
  0x82   : > { %4272 = shalt.err (!%p4269_p7)
}
  0x83   : > { %s4273_s1 = scalar_lea.vmem %s4617_s8, 1024  ;;  %s4375_s16 = smov [#allocation5]  }
  0x84   : > { %p4274_p9 = scmp.ne.s32.totalorder %s4617_s8, %s4273_s1  ;;  %s4278_s29 = sshll.u32 %s4375_s16, 4  ;;  %s4279_s29 = int_to_ptr.vmem [resolvable:$false] %s4278_s29 }
  0x85   : > { %s4280_s17 = scalar_lea.vmem %s4279_s29, 2048  ;;  %p4281_p1 = scmp.lt.s32.totalorder %s4617_s8, %s4279_s29 }
  0x86   : > { %p4276_p12 = pnand %p4274_p9, %p4230_p0  ;;  %p4282_p4 = scmp.lt.s32.totalorder %s4280_s17, %s4273_s1 }
  0x88   : > { %p4277_p5 = pneg %p4276_p12  ;;  %p4283_p8 = por %p4282_p4, %p4281_p1 }
  0x8a   : > { %p4284_p11 = pnand %p4283_p8, %p4277_p5 }
  0x8c   : > { %4287 = shalt.err (!%p4284_p11)
}
  0x8d   : > { %s6608_s24 = smov 16   ;;  %s6609_s30 = smov 256  }
  0x8e   : > { %4113 = dma.hbm_to_vmem [thread:$0]  (!%p4577_p10), %s4615_s27, 1024, %s4617_s8, %s4621_s19, %s6609_s30, %s6609_s30, %s6608_s24  }
  0x8f   : > { %p6610_p0 = scmp.ne.s32.totalorder %s6597_s25, 0 }
  0x91   : > { %417 = sbr.rel (%p6610_p0) target bundleno = 1020 (0x3fc), region = 64 }
  0x98   : > { %s4653_s26 = sand.u32 1, %s4358_s18   ;;  %p6611_p2 = scmp.ne.s32.totalorder %s6594_s23, 0 }
  0x99   : > { %s3768_s12 = sshll.u32 %s4653_s26, 5  ;;  %s420_s13 = scalar_lea.sflag [#allocation3], %s4653_s26 }
  0x9a   : > { %s4657_s22 = scalar_lea.vmem [#allocation2], %s3768_s12 }
  0x9b   : > { %4333 = dma.done.wait (%p6611_p2), %s420_s13, 512  }
  0x9c   : > { %4335 = vsyncadd (%p6611_p2), %s420_s13, 4294966784  ;;  %s428_s8 = sand.u32 1, %s4460_s21   ;;  %s3769_s19 = sshll.u32 %s4653_s26, 6 }
  0x9d   : > { %s429_s25 = scalar_lea.sflag [#allocation6], %s428_s8  ;;  %s4665_s28 = scalar_lea.vmem [#allocation5], %s3769_s19 }
  0x9e   : > { %4337 = dma.done.wait (%p6611_p2), %s429_s25, 1024  }
  0x9f   : > { %4339 = vsyncadd (%p6611_p2), %s429_s25, 4294966272  ;;  %p6612_p10 = scmp.eq.s32.totalorder %s4460_s21, 0 }
  0xa1   : > { %4341 = dma.done.wait (%p6612_p10), [#allocation6], 4096   ;;  %p6613_p13 = pmov %p6612_p10 }
  0xa2   : > { %p6614_p3 = pmov %p6612_p10 }
  0xa3   : > { %4343 = vsyncadd (%p6613_p13), [#allocation6], 4294963200 }
  0xa4   : > { %4345 = dma.done.wait (%p6614_p3), [#allocation9], 1024   ;;  %p6615_p7 = pmov %p6614_p3 }
  0xa5   : > { %v4376_v0 = vmov 0.0   ;;  %v515_v1 = vld [vmem:[%s6562_s3 + $0x8] sm:$0xff]  ;;  %v517_v2 = vld [vmem:[%s6562_s3 + $0x18] sm:$0xff]  ;;  %v514_v6 = vld [vmem:[%s6562_s3] sm:$0xff]  ;;  %p489_p9 = scmp.lt.s32.totalorder %s4460_s21, 3  ;;  %vm928_vm0 = vcmask 261120  }
  0xa6   : > { %4347 = vsyncadd (%p6615_p7), [#allocation9], 4294966272  ;;  %775 = vmatprep.mubr.f32.mxu1 %v4376_v0  ;;  %v680_v3 = vld [vmem:[#allocation7 + $0x8] sm:$0xff]  ;;  %v3914_v4 = vpack.c.bf16 %v517_v2, %v515_v1  ;;  %v682_v5 = vld [vmem:[#allocation7 + $0x18] sm:$0xff]  ;;  %vm3299_vm1 = vcmask 1041409   ;;  %vm3302_vm2 = vcmask 1042434  }
  0xa7   : > { %v516_v7 = vld [vmem:[%s6562_s3 + $0x10] sm:$0xff]  ;;  %v3978_v8 = vpack.c.bf16 %v682_v5, %v680_v3  ;;  %v679_v10 = vld [vmem:[#allocation7] sm:$0xff]  ;;  %v519_v12 = vld [vmem:[%s6562_s3 + $0x28] sm:$0xff]  ;;  %s4788_s4 = scalar_select %p489_p9, %s4460_s21, 3  ;;  %vm3305_vm3 = vcmask 1043459   ;;  %vm3308_vm4 = vcmask 1044484  }
  0xa8   : > { %v3916_v9 = vpack.c.bf16 %v516_v7, %v514_v6  ;;  %v681_v11 = vld [vmem:[#allocation7 + $0x10] sm:$0xff]  ;;  %3915 = vmatprep.subr.bf16.mxu0 %v3914_v4  ;;  %v521_v14 = vld [vmem:[%s6562_s3 + $0x38] sm:$0xff]  ;;  %v684_v15 = vld [vmem:[#allocation7 + $0x28] sm:$0xff]  ;;  %vm3311_vm5 = vcmask 1045509   ;;  %vm3314_vm6 = vcmask 1046534   ;;  %vm3317_vm7 = vcmask 1047559  }
  0xa9   : > { %v3980_v13 = vpack.c.bf16 %v681_v11, %v679_v10  ;;  %v686_v16 = vld [vmem:[#allocation7 + $0x38] sm:$0xff]  ;;  %3979 = vmatprep.subr.bf16.mxu1 %v3978_v8  ;;  %v3918_v17 = vpack.c.bf16 %v521_v14, %v519_v12  ;;  %v518_v19 = vld [vmem:[%s6562_s3 + $0x20] sm:$0xff]  ;;  %v520_v20 = vld [vmem:[%s6562_s3 + $0x30] sm:$0xff]  ;;  %s3912_s8 = sshll.u32 %s4788_s4, 6  ;;  %s3772_s19 = sshll.u32 %s4653_s26, 1 }
  0xaa   : > { %3917 = vmatpush1.bf16.msra.mxu0 %v3916_v9  ;;  %v3982_v18 = vpack.c.bf16 %v686_v16, %v684_v15  ;;  %v683_v21 = vld [vmem:[#allocation7 + $0x20] sm:$0xff]  ;;  %v3920_v22 = vpack.c.bf16 %v520_v20, %v518_v19  ;;  %v685_v23 = vld [vmem:[#allocation7 + $0x30] sm:$0xff]  ;;  %v523_v24 = vld [vmem:[%s6562_s3 + $0x48] sm:$0xff]  ;;  %s4830_s17 = scalar_lea.vmem %s6559_s0, %s3912_s8  ;;  %s3913_s25 = sshll.u32 %s4460_s21, 5 }
  0xab   : > { %3981 = vmatpush1.bf16.msra.mxu1 %v3980_v13  ;;  %v525_v25 = vld [vmem:[%s6562_s3 + $0x58] sm:$0xff]  ;;  %3919 = vmatprep.subr.bf16.mxu0 %v3918_v17  ;;  %v3984_v26 = vpack.c.bf16 %v685_v23, %v683_v21  ;;  %v688_v28 = vld [vmem:[#allocation7 + $0x48] sm:$0xff]  ;;  %v522_v30 = vld [vmem:[%s6562_s3 + $0x40] sm:$0xff]  ;;  %s6673_s14 = sld [smem:[#allocation27_spill]]  ;;  %s4378_s21 = smov [#allocation10]  }
  0xac   : > { %3983 = vmatprep.subr.bf16.mxu1 %v3982_v18  ;;  %v3922_v27 = vpack.c.bf16 %v525_v25, %v523_v24  ;;  %v690_v29 = vld [vmem:[#allocation7 + $0x58] sm:$0xff]  ;;  %v524_v32 = vld [vmem:[%s6562_s3 + $0x50] sm:$0xff]  ;;  %v687_v33 = vld [vmem:[#allocation7 + $0x40] sm:$0xff]  ;;  %s4292_s16 = sshll.u32 %s4378_s21, 4  ;;  %s4293_s16 = int_to_ptr.vmem [resolvable:$false] %s4292_s16 }
  0xad   : > { %v3986_v31 = vpack.c.bf16 %v690_v29, %v688_v28  ;;  %v689_v34 = vld [vmem:[#allocation7 + $0x50] sm:$0xff]  ;;  %v3924_v35 = vpack.c.bf16 %v524_v32, %v522_v30  ;;  %v527_v36 = vld [vmem:[%s6562_s3 + $0x68] sm:$0xff]  ;;  %v529_v37 = vld [vmem:[%s6562_s3 + $0x78] sm:$0xff]  ;;  %s4294_s29 = scalar_lea.vmem %s4293_s16, 64 }
  0xae   : > { %3921 = vmatpush1.bf16.msra.mxu0 %v3920_v22  ;;  %v692_v38 = vld [vmem:[#allocation7 + $0x68] sm:$0xff]  ;;  %v3988_v39 = vpack.c.bf16 %v689_v34, %v687_v33  ;;  %v3926_v40 = vpack.c.bf16 %v529_v37, %v527_v36  ;;  %v694_v41 = vld [vmem:[#allocation7 + $0x78] sm:$0xff]  ;;  %v526_v42 = vld [vmem:[%s6562_s3 + $0x60] sm:$0xff] }
  0xaf   : > { %3985 = vmatpush1.bf16.msra.mxu1 %v3984_v26  ;;  %3923 = vmatprep.subr.bf16.mxu0 %v3922_v27  ;;  %v528_v43 = vld [vmem:[%s6562_s3 + $0x70] sm:$0xff]  ;;  %v3990_v44 = vpack.c.bf16 %v694_v41, %v692_v38  ;;  %v691_v45 = vld [vmem:[#allocation7 + $0x60] sm:$0xff]  ;;  %v531_v47 = vld [vmem:[%s6562_s3 + $0x88] sm:$0xff] }
  0xb0   : > { %3987 = vmatprep.subr.bf16.mxu1 %v3986_v31  ;;  %v693_v46 = vld [vmem:[#allocation7 + $0x70] sm:$0xff]  ;;  %v533_v48 = vld [vmem:[%s6562_s3 + $0x98] sm:$0xff]  ;;  %v696_v49 = vld [vmem:[#allocation7 + $0x88] sm:$0xff]  ;;  %v3928_v51 = vpack.c.bf16 %v528_v43, %v526_v42 }
  0xb1   : > { %v698_v50 = vld [vmem:[#allocation7 + $0x98] sm:$0xff]  ;;  %v3992_v52 = vpack.c.bf16 %v693_v46, %v691_v45  ;;  %v3930_v53 = vpack.c.bf16 %v533_v48, %v531_v47  ;;  %v530_v54 = vld [vmem:[%s6562_s3 + $0x80] sm:$0xff]  ;;  %v532_v55 = vld [vmem:[%s6562_s3 + $0x90] sm:$0xff]  ;;  %s6516_s4 = scalar_lea.hbm %s6673_s14, %s3913_s25 }
  0xb2   : > { %3925 = vmatpush1.bf16.msra.mxu0 %v3924_v35  ;;  %v695_v56 = vld [vmem:[#allocation7 + $0x80] sm:$0xff]  ;;  %v3994_v57 = vpack.c.bf16 %v698_v50, %v696_v49  ;;  %v697_v58 = vld [vmem:[#allocation7 + $0x90] sm:$0xff]  ;;  %v535_v59 = vld [vmem:[%s6562_s3 + $0xa8] sm:$0xff]  ;;  %v3932_v63 = vpack.c.bf16 %v532_v55, %v530_v54 }
  0xb3   : > { %3989 = vmatpush1.bf16.msra.mxu1 %v3988_v39  ;;  %3927 = vmatprep.subr.bf16.mxu0 %v3926_v40  ;;  %v537_v60 = vld [vmem:[%s6562_s3 + $0xb8] sm:$0xff]  ;;  %v700_v61 = vld [vmem:[#allocation7 + $0xa8] sm:$0xff]  ;;  %v3996_v1 = vpack.c.bf16 %v697_v58, %v695_v56  ;;  %v534_v3 = vld [vmem:[%s6562_s3 + $0xa0] sm:$0xff] }
  0xb4   : > { %3991 = vmatprep.subr.bf16.mxu1 %v3990_v44  ;;  %v702_v62 = vld [vmem:[#allocation7 + $0xb8] sm:$0xff]  ;;  %v3934_v2 = vpack.c.bf16 %v537_v60, %v535_v59  ;;  %v536_v4 = vld [vmem:[%s6562_s3 + $0xb0] sm:$0xff]  ;;  %v699_v5 = vld [vmem:[#allocation7 + $0xa0] sm:$0xff] }
  0xb5   : > { %v3998_v6 = vpack.c.bf16 %v702_v62, %v700_v61  ;;  %v701_v7 = vld [vmem:[#allocation7 + $0xb0] sm:$0xff]  ;;  %v539_v8 = vld [vmem:[%s6562_s3 + $0xc8] sm:$0xff]  ;;  %v541_v9 = vld [vmem:[%s6562_s3 + $0xd8] sm:$0xff]  ;;  %v3936_v12 = vpack.c.bf16 %v536_v4, %v534_v3 }
  0xb6   : > { %3929 = vmatpush1.bf16.msra.mxu0 %v3928_v51  ;;  %v704_v10 = vld [vmem:[#allocation7 + $0xc8] sm:$0xff]  ;;  %v706_v11 = vld [vmem:[#allocation7 + $0xd8] sm:$0xff]  ;;  %v4000_v13 = vpack.c.bf16 %v701_v7, %v699_v5  ;;  %v3938_v14 = vpack.c.bf16 %v541_v9, %v539_v8  ;;  %v538_v15 = vld [vmem:[%s6562_s3 + $0xc0] sm:$0xff] }
  0xb7   : > { %3993 = vmatpush1.bf16.msra.mxu1 %v3992_v52  ;;  %3931 = vmatprep.subr.bf16.mxu0 %v3930_v53  ;;  %v540_v16 = vld [vmem:[%s6562_s3 + $0xd0] sm:$0xff]  ;;  %v703_v17 = vld [vmem:[#allocation7 + $0xc0] sm:$0xff]  ;;  %v4002_v18 = vpack.c.bf16 %v706_v11, %v704_v10  ;;  %v543_v20 = vld [vmem:[%s6562_s3 + $0xe8] sm:$0xff] }
  0xb8   : > { %3995 = vmatprep.subr.bf16.mxu1 %v3994_v57  ;;  %v705_v19 = vld [vmem:[#allocation7 + $0xd0] sm:$0xff]  ;;  %v545_v21 = vld [vmem:[%s6562_s3 + $0xf8] sm:$0xff]  ;;  %v708_v22 = vld [vmem:[#allocation7 + $0xe8] sm:$0xff]  ;;  %v3940_v24 = vpack.c.bf16 %v540_v16, %v538_v15 }
  0xb9   : > { %v710_v23 = vld [vmem:[#allocation7 + $0xf8] sm:$0xff]  ;;  %v4004_v25 = vpack.c.bf16 %v705_v19, %v703_v17  ;;  %v3942_v26 = vpack.c.bf16 %v545_v21, %v543_v20  ;;  %v542_v27 = vld [vmem:[%s6562_s3 + $0xe0] sm:$0xff]  ;;  %v544_v28 = vld [vmem:[%s6562_s3 + $0xf0] sm:$0xff] }
  0xba   : > { %3933 = vmatpush1.bf16.msra.mxu0 %v3932_v63  ;;  %v707_v29 = vld [vmem:[#allocation7 + $0xe0] sm:$0xff]  ;;  %v4006_v30 = vpack.c.bf16 %v710_v23, %v708_v22  ;;  %v709_v31 = vld [vmem:[#allocation7 + $0xf0] sm:$0xff]  ;;  %v547_v32 = vld [vmem:[%s6562_s3 + $0x108] sm:$0xff]  ;;  %v3944_v36 = vpack.c.bf16 %v544_v28, %v542_v27 }
  0xbb   : > { %3997 = vmatpush1.bf16.msra.mxu1 %v3996_v1  ;;  %3935 = vmatprep.subr.bf16.mxu0 %v3934_v2  ;;  %v549_v33 = vld [vmem:[%s6562_s3 + $0x118] sm:$0xff]  ;;  %v507_v34 = vld [vmem:[%s4665_s28 + $0x8] sm:$0xff]  ;;  %v4008_v37 = vpack.c.bf16 %v709_v31, %v707_v29  ;;  %v546_v39 = vld [vmem:[%s6562_s3 + $0x100] sm:$0xff] }
  0xbc   : > { %3999 = vmatprep.subr.bf16.mxu1 %v3998_v6  ;;  %v509_v35 = vld [vmem:[%s4665_s28 + $0x18] sm:$0xff]  ;;  %v3946_v38 = vpack.c.bf16 %v549_v33, %v547_v32  ;;  %v548_v40 = vld [vmem:[%s6562_s3 + $0x110] sm:$0xff]  ;;  %v506_v42 = vld [vmem:[%s4665_s28] sm:$0xff] }
  0xbd   : > { %v4796_v41 = vpack.c.bf16 %v509_v35, %v507_v34  ;;  %v508_v43 = vld [vmem:[%s4665_s28 + $0x10] sm:$0xff]  ;;  %v551_v44 = vld [vmem:[%s6562_s3 + $0x128] sm:$0xff]  ;;  %v553_v45 = vld [vmem:[%s6562_s3 + $0x138] sm:$0xff]  ;;  %v3948_v48 = vpack.c.bf16 %v548_v40, %v546_v39 }
  0xbe   : > { %3937 = vmatpush1.bf16.msra.mxu0 %v3936_v12  ;;  %v511_v46 = vld [vmem:[%s4665_s28 + $0x28] sm:$0xff]  ;;  %v513_v47 = vld [vmem:[%s4665_s28 + $0x38] sm:$0xff]  ;;  %v502_v49 = vld [vmem:[%s4657_s22] sm:$0xff]  ;;  %v4810_v50 = vpack.c.bf16 %v508_v43, %v506_v42  ;;  %v3950_v53 = vpack.c.bf16 %v553_v45, %v551_v44 }
  0xbf   : > { %4001 = vmatpush1.bf16.msra.mxu1 %v4000_v13  ;;  %3939 = vmatprep.subr.bf16.mxu0 %v3938_v14  ;;  %v550_v51 = vld [vmem:[%s6562_s3 + $0x120] sm:$0xff]  ;;  %v552_v52 = vld [vmem:[%s6562_s3 + $0x130] sm:$0xff]  ;;  %v555_v54 = vld [vmem:[%s6562_s3 + $0x148] sm:$0xff]  ;;  %v4825_v56 = vpack.c.bf16 %v513_v47, %v511_v46 }
  0xc0   : > { %4003 = vmatprep.subr.bf16.mxu1 %v4002_v18  ;;  %v557_v55 = vld [vmem:[%s6562_s3 + $0x158] sm:$0xff]  ;;  %v510_v57 = vld [vmem:[%s4665_s28 + $0x20] sm:$0xff]  ;;  %v512_v58 = vld [vmem:[%s4665_s28 + $0x30] sm:$0xff]  ;;  %v3952_v60 = vpack.c.bf16 %v552_v52, %v550_v51 }
  0xc1   : > { %v503_v59 = vld [vmem:[%s4657_s22 + $0x8] sm:$0xff]  ;;  %v3954_v61 = vpack.c.bf16 %v557_v55, %v555_v54  ;;  %v554_v62 = vld [vmem:[%s6562_s3 + $0x140] sm:$0xff]  ;;  %v556_v63 = vld [vmem:[%s6562_s3 + $0x150] sm:$0xff]  ;;  %v4845_v2 = vpack.c.bf16 %v512_v58, %v510_v57 }
  0xc2   : > { %3941 = vmatpush1.bf16.msra.mxu0 %v3940_v24  ;;  %v495_v1 = vld [vmem:[%s4830_s17 + $0x8] sm:$0xff]  ;;  %v561_v4 = vld [vmem:[%s6562_s3 + $0x178] sm:$0xff]  ;;  %v3956_v5 = vpack.c.bf16 %v556_v63, %v554_v62  ;;  %v504_v6 = vld [vmem:[%s4657_s22 + $0x10] sm:$0xff] }
  0xc3   : > { %4005 = vmatpush1.bf16.msra.mxu1 %v4004_v25  ;;  %3943 = vmatprep.subr.bf16.mxu0 %v3942_v26  ;;  %v559_v3 = vld [vmem:[%s6562_s3 + $0x168] sm:$0xff]  ;;  %v558_v8 = vld [vmem:[%s6562_s3 + $0x160] sm:$0xff]  ;;  %v560_v9 = vld [vmem:[%s6562_s3 + $0x170] sm:$0xff] }
  0xc4   : > { %4007 = vmatprep.subr.bf16.mxu1 %v4006_v30  ;;  %654 = vmatprep.mubr.f32.mxu0 %v495_v1  ;;  %v3958_v7 = vpack.c.bf16 %v561_v4, %v559_v3  ;;  %v563_v10 = vld [vmem:[%s6562_s3 + $0x188] sm:$0xff]  ;;  %v565_v11 = vld [vmem:[%s6562_s3 + $0x198] sm:$0xff]  ;;  %v3960_v12 = vpack.c.bf16 %v560_v9, %v558_v8  ;;  %v562_v15 = vld [vmem:[%s6562_s3 + $0x180] sm:$0xff] }
  0xc5   : > { %v505_v13 = vld [vmem:[%s4657_s22 + $0x18] sm:$0xff]  ;;  %v3962_v14 = vpack.c.bf16 %v565_v11, %v563_v10  ;;  %v564_v16 = vld [vmem:[%s6562_s3 + $0x190] sm:$0xff]  ;;  %v567_v17 = vld [vmem:[%s6562_s3 + $0x1a8] sm:$0xff]  ;;  %s488_s22 = scalar_lea.vmem [#allocation10], %s3772_s19 }
  0xc6   : > { %3945 = vmatpush1.bf16.msra.mxu0 %v3944_v36  ;;  %v569_v18 = vld [vmem:[%s6562_s3 + $0x1b8] sm:$0xff]  ;;  %v3964_v19 = vpack.c.bf16 %v564_v16, %v562_v15  ;;  %v858_v20 = vld [vmem:[%s6565_s6 + $0x1d0] sm:$0xff]  ;;  %v566_v22 = vld [vmem:[%s6562_s3 + $0x1a0] sm:$0xff]  ;;  %s3632_s27 = sshll.u32 %s488_s22, 4  ;;  %s6518_s27 = int_to_ptr.vmem [resolvable:$true] %s3632_s27 }
  0xc7   : > { %4009 = vmatpush1.bf16.msra.mxu1 %v4008_v37  ;;  %3947 = vmatprep.subr.bf16.mxu0 %v3946_v38  ;;  %v3966_v21 = vpack.c.bf16 %v569_v18, %v567_v17  ;;  %v568_v23 = vld [vmem:[%s6562_s3 + $0x1b0] sm:$0xff]  ;;  %v571_v24 = vld [vmem:[%s6562_s3 + $0x1c8] sm:$0xff]  ;;  %v573_v25 = vld [vmem:[%s6562_s3 + $0x1d8] sm:$0xff]  ;;  %s4288_s1 = scalar_lea.vmem %s6518_s27, 32  ;;  %p4295_p4 = scmp.lt.s32.totalorder %s6518_s27, %s4293_s16 }
  0xc8   : > { %4082 = vmatprep.subr.bf16.mxu1 %v4796_v41  ;;  %v3968_v26 = vpack.c.bf16 %v568_v23, %v566_v22  ;;  %v859_v27 = vld [vmem:[%s6565_s6 + $0x1d8] sm:$0xff]  ;;  %v3970_v28 = vpack.c.bf16 %v573_v25, %v571_v24  ;;  %v570_v29 = vld [vmem:[%s6562_s3 + $0x1c0] sm:$0xff]  ;;  %v572_v30 = vld [vmem:[%s6562_s3 + $0x1d0] sm:$0xff]  ;;  %p4289_p12 = scmp.ne.s32.totalorder %s6518_s27, %s4288_s1  ;;  %p4296_p8 = scmp.lt.s32.totalorder %s4294_s29, %s4288_s1 }
  0xc9   : > { %v575_v31 = vld [vmem:[%s6562_s3 + $0x1e8] sm:$0xff]  ;;  %v577_v32 = vld [vmem:[%s6562_s3 + $0x1f8] sm:$0xff]  ;;  %v3972_v33 = vpack.c.bf16 %v572_v30, %v570_v29  ;;  %v860_v34 = vld [vmem:[%s6565_s6 + $0x1e0] sm:$0xff] }
  0xca   : > { %776 = vmatmul.mubr.f32.vlgmr.msra.gmra.mrb[0].mxu1 %v502_v49  ;;  %3949 = vmatpush1.bf16.msra.mxu0 %v3948_v48  ;;  %v3974_v35 = vpack.c.bf16 %v577_v32, %v575_v31  ;;  %v574_v36 = vld [vmem:[%s6562_s3 + $0x1e0] sm:$0xff]  ;;  %v576_v37 = vld [vmem:[%s6562_s3 + $0x1f0] sm:$0xff]  ;;  %v861_v39 = vld [vmem:[%s6565_s6 + $0x1e8] sm:$0xff]  ;;  %p4290_p5 = pnand %p4289_p12, %p4557_p6  ;;  %p4297_p11 = por %p4296_p8, %p4295_p4 }
  0xcb   : > { %4084 = vmatpush1.bf16.msra.mxu1 %v4810_v50  ;;  %781 = vmatprep.mubr.f32.mxu1 %v4376_v0  ;;  %v3976_v38 = vpack.c.bf16 %v576_v37, %v574_v36  ;;  %v494_v40 = vld [vmem:[%s4830_s17] sm:$0xff]  ;;  %v862_v42 = vld [vmem:[%s6565_s6 + $0x1f0] sm:$0xff]  ;;  %v497_v43 = vld [vmem:[%s4830_s17 + $0x18] sm:$0xff] }
  0xcc   : > { %3951 = vmatprep.subr.bf16.mxu0 %v3950_v53  ;;  %4083 = vmatprep.subr.bf16.mxu1 %v4825_v56  ;;  %v496_v44 = vld [vmem:[%s4830_s17 + $0x10] sm:$0xff]  ;;  %v863_v45 = vld [vmem:[%s6565_s6 + $0x1f8] sm:$0xff]  ;;  %v499_v46 = vld [vmem:[%s4830_s17 + $0x28] sm:$0xff]  ;;  %p4291_p1 = pneg %p4290_p5 }
  0xcd   : > { %v864_v47 = vld [vmem:[%s6565_s6 + $0x200] sm:$0xff]  ;;  %v501_v48 = vld [vmem:[%s4830_s17 + $0x38] sm:$0xff]  ;;  %v500_v49 = vld [vmem:[%s4830_s17 + $0x30] sm:$0xff] }
  0xce   : > { %782 = vmatmul.mubr.f32.gmra.mrb[2].mxu1 %v503_v59  ;;  %3953 = vmatpush1.bf16.msra.mxu0 %v3952_v60  ;;  %v800_v51 = vld [vmem:[%s6565_s6] sm:$0xff]  ;;  %v866_v52 = vld [vmem:[%s6565_s6 + $0x210] sm:$0xff]  ;;  %v801_v53 = vld [vmem:[%s6565_s6 + $0x8] sm:$0xff]  ;;  %p4298_p0 = pnand %p4297_p11, %p4291_p1 }
  0xcf   : > { %787 = vmatprep.mubr.f32.mxu1 %v4376_v0  ;;  %3955 = vmatprep.subr.bf16.mxu0 %v3954_v61  ;;  %v867_v54 = vld [vmem:[%s6565_s6 + $0x218] sm:$0xff]  ;;  %v802_v55 = vld [vmem:[%s6565_s6 + $0x10] sm:$0xff]  ;;  %v869_v58 = vld [vmem:[%s6565_s6 + $0x228] sm:$0xff] }
  0xd0   : > { %4085 = vmatpush1.bf16.msra.mxu1 %v4845_v2  ;;  %v803_v57 = vld [vmem:[%s6565_s6 + $0x18] sm:$0xff]  ;;  %v804_v59 = vld [vmem:[%s6565_s6 + $0x20] sm:$0xff]  ;;  %v870_v60 = vld [vmem:[%s6565_s6 + $0x230] sm:$0xff] }
  0xd1   : > { %v805_v61 = vld [vmem:[%s6565_s6 + $0x28] sm:$0xff]  ;;  %v871_v62 = vld [vmem:[%s6565_s6 + $0x238] sm:$0xff]  ;;  %v806_v63 = vld [vmem:[%s6565_s6 + $0x30] sm:$0xff] }
  0xd2   : > { %788 = vmatmul.mubr.f32.gmra.mrb[4].mxu1 %v504_v6  ;;  %3957 = vmatpush1.bf16.msra.mxu0 %v3956_v5  ;;  %v872_v1 = vld [vmem:[%s6565_s6 + $0x240] sm:$0xff]  ;;  %v873_v3 = vld [vmem:[%s6565_s6 + $0x248] sm:$0xff]  ;;  %v874_v5 = vld [vmem:[%s6565_s6 + $0x250] sm:$0xff] }
  0xd3   : > { %793 = vmatprep.mubr.f32.mxu1 %v4376_v0  ;;  %3959 = vmatprep.subr.bf16.mxu0 %v3958_v7  ;;  %v808_v4 = vld [vmem:[%s6565_s6 + $0x40] sm:$0xff]  ;;  %v809_v6 = vld [vmem:[%s6565_s6 + $0x48] sm:$0xff]  ;;  %v875_v7 = vld [vmem:[%s6565_s6 + $0x258] sm:$0xff] }
  0xd4   : > { %v810_v8 = vld [vmem:[%s6565_s6 + $0x50] sm:$0xff]  ;;  %v876_v9 = vld [vmem:[%s6565_s6 + $0x260] sm:$0xff]  ;;  %v811_v10 = vld [vmem:[%s6565_s6 + $0x58] sm:$0xff] }
  0xd5   : > { %v877_v11 = vld [vmem:[%s6565_s6 + $0x268] sm:$0xff]  ;;  %v879_v15 = vld [vmem:[%s6565_s6 + $0x278] sm:$0xff]  ;;  %v814_v16 = vld [vmem:[%s6565_s6 + $0x70] sm:$0xff] }
  0xd6   : > { %794 = vmatmul.mubr.f32.gmra.mrb[6].mxu1 %v505_v13  ;;  %3961 = vmatpush1.bf16.msra.mxu0 %v3960_v12  ;;  %v812_v12 = vld [vmem:[%s6565_s6 + $0x60] sm:$0xff]  ;;  %v878_v13 = vld [vmem:[%s6565_s6 + $0x270] sm:$0xff]  ;;  %v815_v18 = vld [vmem:[%s6565_s6 + $0x78] sm:$0xff] }
  0xd7   : > { %1725 = vmatprep.mubr.f32.mxu1 %v4376_v0  ;;  %3963 = vmatprep.subr.bf16.mxu0 %v3962_v14  ;;  %v813_v14 = vld [vmem:[%s6565_s6 + $0x68] sm:$0xff]  ;;  %v880_v17 = vld [vmem:[%s6565_s6 + $0x280] sm:$0xff]  ;;  %v883_v23 = vld [vmem:[%s6565_s6 + $0x298] sm:$0xff] }
  0xd8   : > { %v817_v22 = vld [vmem:[%s6565_s6 + $0x88] sm:$0xff]  ;;  %v818_v24 = vld [vmem:[%s6565_s6 + $0x90] sm:$0xff]  ;;  %v884_v25 = vld [vmem:[%s6565_s6 + $0x2a0] sm:$0xff] }
  0xd9   : > { %v886_v29 = vld [vmem:[%s6565_s6 + $0x2b0] sm:$0xff]  ;;  %v821_v30 = vld [vmem:[%s6565_s6 + $0xa8] sm:$0xff]  ;;  %v887_v31 = vld [vmem:[%s6565_s6 + $0x2b8] sm:$0xff] }
  0xda   : > { %3833 = vmatmul.mubr.msk.f32.vlgmr.msra.gmra.mrb[8].mxu1 %vm928_vm0, %v858_v20  ;;  %3965 = vmatpush1.bf16.msra.mxu0 %v3964_v19  ;;  %v881_v19 = vld [vmem:[%s6565_s6 + $0x288] sm:$0xff]  ;;  %v816_v20 = vld [vmem:[%s6565_s6 + $0x80] sm:$0xff]  ;;  %v822_v32 = vld [vmem:[%s6565_s6 + $0xb0] sm:$0xff] }
  0xdb   : > { %1731 = vmatprep.mubr.f32.mxu1 %v4376_v0  ;;  %3967 = vmatprep.subr.bf16.mxu0 %v3966_v21  ;;  %v882_v21 = vld [vmem:[%s6565_s6 + $0x290] sm:$0xff]  ;;  %v824_v36 = vld [vmem:[%s6565_s6 + $0xc0] sm:$0xff] }
  0xdc   : > { %v890_v37 = vld [vmem:[%s6565_s6 + $0x2d0] sm:$0xff] }
  0xde   : > { %3834 = vmatmul.mubr.msk.f32.gmra.mrb[10].mxu1 %vm928_vm0, %v859_v27  ;;  %3969 = vmatpush1.bf16.msra.mxu0 %v3968_v26  ;;  %v819_v26 = vld [vmem:[%s6565_s6 + $0x98] sm:$0xff]  ;;  %v885_v27 = vld [vmem:[%s6565_s6 + $0x2a8] sm:$0xff] }
  0xdf   : > { %1737 = vmatprep.mubr.f32.mxu1 %v4376_v0  ;;  %3971 = vmatprep.subr.bf16.mxu0 %v3970_v28  ;;  %v820_v28 = vld [vmem:[%s6565_s6 + $0xa0] sm:$0xff] }
  0xe2   : > { %3835 = vmatmul.mubr.msk.f32.gmra.mrb[12].mxu1 %vm928_vm0, %v860_v34  ;;  %3973 = vmatpush1.bf16.msra.mxu0 %v3972_v33  ;;  %v888_v33 = vld [vmem:[%s6565_s6 + $0x2c0] sm:$0xff]  ;;  %v823_v34 = vld [vmem:[%s6565_s6 + $0xb8] sm:$0xff] }
  0xe3   : > { %1743 = vmatprep.mubr.f32.mxu1 %v4376_v0  ;;  %3975 = vmatprep.subr.bf16.mxu0 %v3974_v35  ;;  %v889_v35 = vld [vmem:[%s6565_s6 + $0x2c8] sm:$0xff] }
  0xe6   : > { %3836 = vmatmul.mubr.msk.f32.gmra.mrb[14].mxu1 %vm928_vm0, %v861_v39  ;;  %3977 = vmatpush1.bf16.msra.mxu0 %v3976_v38  ;;  %v825_v38 = vld [vmem:[%s6565_s6 + $0xc8] sm:$0xff]  ;;  %v891_v39 = vld [vmem:[%s6565_s6 + $0x2d8] sm:$0xff] }
  0xe7   : > { %1749 = vmatprep.mubr.f32.mxu1 %v4376_v0  ;;  %4011 = vmatprep.subr.bf16.mxu0 %v4796_v41  ;;  %v498_v41 = vld [vmem:[%s4830_s17 + $0x20] sm:$0xff]  ;;  %s3618_s17 = scalar_lea.sflag [#allocation4], %s4653_s26 }
  0xe9   : > { %655 = vmatmul.mubr.f32.vlgmr.msra.gmra.mrb[0].mxu0 %v494_v40  ;;  %v826_v40 = vld [vmem:[%s6565_s6 + $0xd0] sm:$0xff] }
  0xea   : > { %3837 = vmatmul.mubr.msk.f32.gmra.mrb[16].mxu1 %vm928_vm0, %v862_v42  ;;  %660 = vmatprep.mubr.f32.mxu0 %v497_v43  ;;  %v892_v42 = vld [vmem:[%s6565_s6 + $0x2e0] sm:$0xff]  ;;  %v827_v43 = vld [vmem:[%s6565_s6 + $0xd8] sm:$0xff] }
  0xeb   : > { %1755 = vmatprep.mubr.f32.mxu1 %v4376_v0  ;;  %4013 = vmatpush1.bf16.msra.mxu0 %v4810_v50  ;;  %v865_v50 = vld [vmem:[%s6565_s6 + $0x208] sm:$0xff] }
  0xec   : > { %4015 = vmatprep.subr.bf16.mxu0 %v4825_v56  ;;  %v868_v56 = vld [vmem:[%s6565_s6 + $0x220] sm:$0xff] }
  0xed   : > { %661 = vmatmul.mubr.f32.gmra.mrb[2].mxu0 %v496_v44  ;;  %v893_v44 = vld [vmem:[%s6565_s6 + $0x2e8] sm:$0xff] }
  0xee   : > { %3838 = vmatmul.mubr.msk.f32.gmra.mrb[18].mxu1 %vm928_vm0, %v863_v45  ;;  %666 = vmatprep.mubr.f32.mxu0 %v499_v46  ;;  %v828_v45 = vld [vmem:[%s6565_s6 + $0xe0] sm:$0xff]  ;;  %v894_v46 = vld [vmem:[%s6565_s6 + $0x2f0] sm:$0xff] }
  0xef   : > { %1761 = vmatprep.mubr.f32.mxu1 %v4376_v0  ;;  %4017 = vmatpush1.bf16.msra.mxu0 %v4845_v2  ;;  %v807_v2 = vld [vmem:[%s6565_s6 + $0x38] sm:$0xff] }
  0xf1   : > { %667 = vmatmul.mubr.f32.gmra.mrb[4].mxu0 %v498_v41  ;;  %v829_v41 = vld [vmem:[%s6565_s6 + $0xe8] sm:$0xff] }
  0xf2   : > { %3839 = vmatmul.mubr.msk.f32.gmra.mrb[20].mxu1 %vm928_vm0, %v864_v47  ;;  %672 = vmatprep.mubr.f32.mxu0 %v501_v48  ;;  %v895_v47 = vld [vmem:[%s6565_s6 + $0x2f8] sm:$0xff]  ;;  %v830_v48 = vld [vmem:[%s6565_s6 + $0xf0] sm:$0xff] }
  0xf3   : > { %1767 = vmatprep.mubr.f32.mxu1 %v4376_v0 }
  0xf5   : > { %673 = vmatmul.mubr.f32.gmra.mrb[6].mxu0 %v500_v49  ;;  %v896_v49 = vld [vmem:[%s6565_s6 + $0x300] sm:$0xff] }
  0xf6   : > { %3840 = vmatmul.mubr.msk.f32.gmra.mrb[22].mxu1 %vm928_vm0, %v865_v50  ;;  %1377 = vmatprep.mubr.f32.mxu0 %v4376_v0  ;;  %v831_v50 = vld [vmem:[%s6565_s6 + $0xf8] sm:$0xff] }
  0xf7   : > { %1773 = vmatprep.mubr.f32.mxu1 %v4376_v0 }
  0xf9   : > { %3775 = vmatmul.mubr.msk.f32.vlgmr.msra.gmra.mrb[8].mxu0 %vm928_vm0, %v800_v51  ;;  %v897_v51 = vld [vmem:[%s6565_s6 + $0x308] sm:$0xff] }
  0xfa   : > { %3841 = vmatmul.mubr.msk.f32.gmra.mrb[24].mxu1 %vm928_vm0, %v866_v52  ;;  %1383 = vmatprep.mubr.f32.mxu0 %v4376_v0  ;;  %v3171_v52 = vld [vmem:[%s6566_s7 + $0x8] sm:$0xff] }
  0xfb   : > { %1779 = vmatprep.mubr.f32.mxu1 %v4376_v0 }
  0xfd   : > { %3776 = vmatmul.mubr.msk.f32.gmra.mrb[10].mxu0 %vm928_vm0, %v801_v53  ;;  %v3173_v53 = vld [vmem:[%s6566_s7 + $0x18] sm:$0xff] }
  0xfe   : > { %3842 = vmatmul.mubr.msk.f32.gmra.mrb[26].mxu1 %vm928_vm0, %v867_v54  ;;  %1389 = vmatprep.mubr.f32.mxu0 %v4376_v0  ;;  %v3170_v54 = vld [vmem:[%s6566_s7] sm:$0xff] }
  0xff   : > { %1785 = vmatprep.mubr.f32.mxu1 %v4376_v0 }
 0x101   : > { %3777 = vmatmul.mubr.msk.f32.gmra.mrb[12].mxu0 %vm928_vm0, %v802_v55  ;;  %v832_v55 = vld [vmem:[%s6565_s6 + $0x100] sm:$0xff] }
 0x102   : > { %3843 = vmatmul.mubr.msk.f32.gmra.mrb[28].mxu1 %vm928_vm0, %v868_v56  ;;  %1395 = vmatprep.mubr.f32.mxu0 %v4376_v0  ;;  %v4018_v56 = vpack.c.bf16 %v3173_v53, %v3171_v52  ;;  %v6582_v53 = vlaneseq }
 0x103   : > { %1791 = vmatprep.mubr.f32.mxu1 %v4376_v0 }
 0x104   : > { %4019 = vmatprep.subr.bf16.mxu0 %v4018_v56 }
 0x105   : > { %3778 = vmatmul.mubr.msk.f32.gmra.mrb[14].mxu0 %vm928_vm0, %v803_v57  ;;  %v3172_v57 = vld [vmem:[%s6566_s7 + $0x10] sm:$0xff] }
 0x106   : > { %3844 = vmatmul.mubr.msk.f32.gmra.mrb[30].mxu1 %vm928_vm0, %v869_v58  ;;  %1401 = vmatprep.mubr.f32.mxu0 %v4376_v0  ;;  %v898_v58 = vld [vmem:[%s6565_s6 + $0x310] sm:$0xff] }
 0x107   : > { %1797 = vmatprep.mubr.f32.mxu1 %v4376_v0 }
 0x109   : > { %3779 = vmatmul.mubr.msk.f32.gmra.mrb[16].mxu0 %vm928_vm0, %v804_v59  ;;  %v4020_v59 = vpack.c.bf16 %v3172_v57, %v3170_v54 }
 0x10a   : > { %3845 = vmatmul.mubr.msk.f32.gmra.mrb[32].mxu1 %vm928_vm0, %v870_v60  ;;  %1407 = vmatprep.mubr.f32.mxu0 %v4376_v0  ;;  %v833_v60 = vld [vmem:[%s6565_s6 + $0x108] sm:$0xff] }
 0x10b   : > { %1803 = vmatprep.mubr.f32.mxu1 %v4376_v0  ;;  %4021 = vmatpush1.bf16.msra.mxu0 %v4020_v59 }
 0x10d   : > { %3780 = vmatmul.mubr.msk.f32.gmra.mrb[18].mxu0 %vm928_vm0, %v805_v61  ;;  %v899_v61 = vld [vmem:[%s6565_s6 + $0x318] sm:$0xff] }
 0x10e   : > { %3846 = vmatmul.mubr.msk.f32.gmra.mrb[34].mxu1 %vm928_vm0, %v871_v62  ;;  %1413 = vmatprep.mubr.f32.mxu0 %v4376_v0  ;;  %v834_v62 = vld [vmem:[%s6565_s6 + $0x110] sm:$0xff] }
 0x10f   : > { %1809 = vmatprep.mubr.f32.mxu1 %v4376_v0 }
 0x111   : > { %3781 = vmatmul.mubr.msk.f32.gmra.mrb[20].mxu0 %vm928_vm0, %v806_v63  ;;  %v900_v63 = vld [vmem:[%s6565_s6 + $0x320] sm:$0xff] }
 0x112   : > { %3847 = vmatmul.mubr.msk.f32.gmra.mrb[36].mxu1 %vm928_vm0, %v872_v1  ;;  %1419 = vmatprep.mubr.f32.mxu0 %v4376_v0  ;;  %v835_v1 = vld [vmem:[%s6565_s6 + $0x118] sm:$0xff] }
 0x113   : > { %1815 = vmatprep.mubr.f32.mxu1 %v4376_v0 }
 0x115   : > { %3782 = vmatmul.mubr.msk.f32.gmra.mrb[22].mxu0 %vm928_vm0, %v807_v2  ;;  %v901_v2 = vld [vmem:[%s6565_s6 + $0x328] sm:$0xff] }
 0x116   : > { %3848 = vmatmul.mubr.msk.f32.gmra.mrb[38].mxu1 %vm928_vm0, %v873_v3  ;;  %1425 = vmatprep.mubr.f32.mxu0 %v4376_v0  ;;  %v3175_v3 = vld [vmem:[%s6566_s7 + $0x28] sm:$0xff] }
 0x117   : > { %1821 = vmatprep.mubr.f32.mxu1 %v4376_v0 }
 0x119   : > { %3783 = vmatmul.mubr.msk.f32.gmra.mrb[24].mxu0 %vm928_vm0, %v808_v4  ;;  %v3177_v4 = vld [vmem:[%s6566_s7 + $0x38] sm:$0xff] }
 0x11a   : > { %3849 = vmatmul.mubr.msk.f32.gmra.mrb[40].mxu1 %vm928_vm0, %v874_v5  ;;  %1431 = vmatprep.mubr.f32.mxu0 %v4376_v0  ;;  %v3174_v5 = vld [vmem:[%s6566_s7 + $0x20] sm:$0xff] }
 0x11b   : > { %1827 = vmatprep.mubr.f32.mxu1 %v4376_v0 }
 0x11d   : > { %3784 = vmatmul.mubr.msk.f32.gmra.mrb[26].mxu0 %vm928_vm0, %v809_v6  ;;  %v836_v6 = vld [vmem:[%s6565_s6 + $0x120] sm:$0xff] }
 0x11e   : > { %3850 = vmatmul.mubr.msk.f32.gmra.mrb[42].mxu1 %vm928_vm0, %v875_v7  ;;  %1437 = vmatprep.mubr.f32.mxu0 %v4376_v0  ;;  %v4022_v7 = vpack.c.bf16 %v3177_v4, %v3175_v3  ;;  %v847_v3 = vld [vmem:[%s6565_s6 + $0x178] sm:$0xff]  ;;  %v3191_v4 = vld [vmem:[%s6566_s7 + $0xa8] sm:$0xff] }
 0x11f   : > { %1833 = vmatprep.mubr.f32.mxu1 %v4376_v0 }
 0x120   : > { %4023 = vmatprep.subr.bf16.mxu0 %v4022_v7  ;;  %v913_v7 = vld [vmem:[%s6565_s6 + $0x388] sm:$0xff] }
 0x121   : > { %3785 = vmatmul.mubr.msk.f32.gmra.mrb[28].mxu0 %vm928_vm0, %v810_v8  ;;  %v3176_v8 = vld [vmem:[%s6566_s7 + $0x30] sm:$0xff] }
 0x122   : > { %3851 = vmatmul.mubr.msk.f32.gmra.mrb[44].mxu1 %vm928_vm0, %v876_v9  ;;  %1443 = vmatprep.mubr.f32.mxu0 %v4376_v0  ;;  %v902_v9 = vld [vmem:[%s6565_s6 + $0x330] sm:$0xff] }
 0x123   : > { %1839 = vmatprep.mubr.f32.mxu1 %v4376_v0 }
 0x125   : > { %3786 = vmatmul.mubr.msk.f32.gmra.mrb[30].mxu0 %vm928_vm0, %v811_v10  ;;  %v4024_v10 = vpack.c.bf16 %v3176_v8, %v3174_v5  ;;  %v3193_v5 = vld [vmem:[%s6566_s7 + $0xb8] sm:$0xff] }
 0x126   : > { %3852 = vmatmul.mubr.msk.f32.gmra.mrb[46].mxu1 %vm928_vm0, %v877_v11  ;;  %1449 = vmatprep.mubr.f32.mxu0 %v4376_v0  ;;  %v837_v11 = vld [vmem:[%s6565_s6 + $0x128] sm:$0xff]  ;;  %v4038_v8 = vpack.c.bf16 %v3193_v5, %v3191_v4 }
 0x127   : > { %1845 = vmatprep.mubr.f32.mxu1 %v4376_v0  ;;  %4025 = vmatpush1.bf16.msra.mxu0 %v4024_v10  ;;  %v3192_v10 = vld [vmem:[%s6566_s7 + $0xb0] sm:$0xff] }
 0x129   : > { %3787 = vmatmul.mubr.msk.f32.gmra.mrb[32].mxu0 %vm928_vm0, %v812_v12  ;;  %v903_v12 = vld [vmem:[%s6565_s6 + $0x338] sm:$0xff] }
 0x12a   : > { %3853 = vmatmul.mubr.msk.f32.gmra.mrb[48].mxu1 %vm928_vm0, %v878_v13  ;;  %1455 = vmatprep.mubr.f32.mxu0 %v4376_v0  ;;  %v838_v13 = vld [vmem:[%s6565_s6 + $0x130] sm:$0xff] }
 0x12b   : > { %1851 = vmatprep.mubr.f32.mxu1 %v4376_v0 }
 0x12d   : > { %3788 = vmatmul.mubr.msk.f32.gmra.mrb[34].mxu0 %vm928_vm0, %v813_v14  ;;  %v904_v14 = vld [vmem:[%s6565_s6 + $0x340] sm:$0xff] }
 0x12e   : > { %3854 = vmatmul.mubr.msk.f32.gmra.mrb[50].mxu1 %vm928_vm0, %v879_v15  ;;  %1461 = vmatprep.mubr.f32.mxu0 %v4376_v0  ;;  %v839_v15 = vld [vmem:[%s6565_s6 + $0x138] sm:$0xff] }
 0x12f   : > { %1857 = vmatprep.mubr.f32.mxu1 %v4376_v0 }
 0x131   : > { %3789 = vmatmul.mubr.msk.f32.gmra.mrb[36].mxu0 %vm928_vm0, %v814_v16  ;;  %v905_v16 = vld [vmem:[%s6565_s6 + $0x348] sm:$0xff] }
 0x132   : > { %3855 = vmatmul.mubr.msk.f32.gmra.mrb[52].mxu1 %vm928_vm0, %v880_v17  ;;  %1467 = vmatprep.mubr.f32.mxu0 %v4376_v0  ;;  %v3179_v17 = vld [vmem:[%s6566_s7 + $0x48] sm:$0xff] }
 0x133   : > { %1863 = vmatprep.mubr.f32.mxu1 %v4376_v0 }
 0x135   : > { %3790 = vmatmul.mubr.msk.f32.gmra.mrb[38].mxu0 %vm928_vm0, %v815_v18  ;;  %v3181_v18 = vld [vmem:[%s6566_s7 + $0x58] sm:$0xff] }
 0x136   : > { %3856 = vmatmul.mubr.msk.f32.gmra.mrb[54].mxu1 %vm928_vm0, %v881_v19  ;;  %1473 = vmatprep.mubr.f32.mxu0 %v4376_v0  ;;  %v3178_v19 = vld [vmem:[%s6566_s7 + $0x40] sm:$0xff] }
 0x137   : > { %1869 = vmatprep.mubr.f32.mxu1 %v4376_v0 }
 0x139   : > { %3791 = vmatmul.mubr.msk.f32.gmra.mrb[40].mxu0 %vm928_vm0, %v816_v20  ;;  %v840_v20 = vld [vmem:[%s6565_s6 + $0x140] sm:$0xff] }
 0x13a   : > { %3857 = vmatmul.mubr.msk.f32.gmra.mrb[56].mxu1 %vm928_vm0, %v882_v21  ;;  %1479 = vmatprep.mubr.f32.mxu0 %v4376_v0  ;;  %v4026_v21 = vpack.c.bf16 %v3181_v18, %v3179_v17  ;;  %v578_v17 = vld [vmem:[%s6564_s5] sm:$0x3] }
 0x13b   : > { %1875 = vmatprep.mubr.f32.mxu1 %v4376_v0 }
 0x13c   : > { %4027 = vmatprep.subr.bf16.mxu0 %v4026_v21 }
 0x13d   : > { %3792 = vmatmul.mubr.msk.f32.gmra.mrb[42].mxu0 %vm928_vm0, %v817_v22  ;;  %v3180_v22 = vld [vmem:[%s6566_s7 + $0x50] sm:$0xff] }
 0x13e   : > { %3858 = vmatmul.mubr.msk.f32.gmra.mrb[58].mxu1 %vm928_vm0, %v883_v23  ;;  %1485 = vmatprep.mubr.f32.mxu0 %v4376_v0  ;;  %v906_v23 = vld [vmem:[%s6565_s6 + $0x350] sm:$0xff] }
 0x13f   : > { %1881 = vmatprep.mubr.f32.mxu1 %v4376_v0 }
 0x141   : > { %3793 = vmatmul.mubr.msk.f32.gmra.mrb[44].mxu0 %vm928_vm0, %v818_v24  ;;  %v4028_v24 = vpack.c.bf16 %v3180_v22, %v3178_v19  ;;  %v3195_v19 = vld [vmem:[%s6566_s7 + $0xc8] sm:$0xff]  ;;  %v914_v22 = vld [vmem:[%s6565_s6 + $0x390] sm:$0xff] }
 0x142   : > { %3859 = vmatmul.mubr.msk.f32.gmra.mrb[60].mxu1 %vm928_vm0, %v884_v25  ;;  %1491 = vmatprep.mubr.f32.mxu0 %v4376_v0  ;;  %v841_v25 = vld [vmem:[%s6565_s6 + $0x148] sm:$0xff] }
 0x143   : > { %1887 = vmatprep.mubr.f32.mxu1 %v4376_v0  ;;  %4029 = vmatpush1.bf16.msra.mxu0 %v4028_v24  ;;  %v3194_v24 = vld [vmem:[%s6566_s7 + $0xc0] sm:$0xff] }
 0x145   : > { %3794 = vmatmul.mubr.msk.f32.gmra.mrb[46].mxu0 %vm928_vm0, %v819_v26  ;;  %v907_v26 = vld [vmem:[%s6565_s6 + $0x358] sm:$0xff] }
 0x146   : > { %3860 = vmatmul.mubr.msk.f32.gmra.mrb[62].mxu1 %vm928_vm0, %v885_v27  ;;  %1497 = vmatprep.mubr.f32.mxu0 %v4376_v0 }
 0x147   : > { %1893 = vmatprep.mubr.f32.mxu1 %v4376_v0 }
 0x149   : > { %3795 = vmatmul.mubr.msk.f32.gmra.mrb[48].mxu0 %vm928_vm0, %v820_v28 }
 0x14a   : > { %3861 = vmatmul.mubr.msk.f32.gmra.mrb[64].mxu1 %vm928_vm0, %v886_v29  ;;  %1503 = vmatprep.mubr.f32.mxu0 %v4376_v0  ;;  %v842_v29 = vld [vmem:[%s6565_s6 + $0x150] sm:$0xff] }
 0x14b   : > { %1899 = vmatprep.mubr.f32.mxu1 %v4376_v0 }
 0x14d   : > { %3796 = vmatmul.mubr.msk.f32.gmra.mrb[50].mxu0 %vm928_vm0, %v821_v30  ;;  %v908_v30 = vld [vmem:[%s6565_s6 + $0x360] sm:$0xff] }
 0x14e   : > { %3862 = vmatmul.mubr.msk.f32.gmra.mrb[66].mxu1 %vm928_vm0, %v887_v31  ;;  %1509 = vmatprep.mubr.f32.mxu0 %v4376_v0 }
 0x14f   : > { %1905 = vmatprep.mubr.f32.mxu1 %v4376_v0 }
 0x151   : > { %3797 = vmatmul.mubr.msk.f32.gmra.mrb[52].mxu0 %vm928_vm0, %v822_v32 }
 0x152   : > { %3863 = vmatmul.mubr.msk.f32.gmra.mrb[68].mxu1 %vm928_vm0, %v888_v33  ;;  %1515 = vmatprep.mubr.f32.mxu0 %v4376_v0  ;;  %v843_v33 = vld [vmem:[%s6565_s6 + $0x158] sm:$0xff] }
 0x153   : > { %1911 = vmatprep.mubr.f32.mxu1 %v4376_v0 }
 0x155   : > { %3798 = vmatmul.mubr.msk.f32.gmra.mrb[54].mxu0 %vm928_vm0, %v823_v34  ;;  %v909_v34 = vld [vmem:[%s6565_s6 + $0x368] sm:$0xff] }
 0x156   : > { %3864 = vmatmul.mubr.msk.f32.gmra.mrb[70].mxu1 %vm928_vm0, %v889_v35  ;;  %1521 = vmatprep.mubr.f32.mxu0 %v4376_v0  ;;  %v3183_v35 = vld [vmem:[%s6566_s7 + $0x68] sm:$0xff] }
 0x157   : > { %1917 = vmatprep.mubr.f32.mxu1 %v4376_v0 }
 0x159   : > { %3799 = vmatmul.mubr.msk.f32.gmra.mrb[56].mxu0 %vm928_vm0, %v824_v36  ;;  %v3185_v36 = vld [vmem:[%s6566_s7 + $0x78] sm:$0xff] }
 0x15a   : > { %3865 = vmatmul.mubr.msk.f32.gmra.mrb[72].mxu1 %vm928_vm0, %v890_v37  ;;  %1527 = vmatprep.mubr.f32.mxu0 %v4376_v0 }
 0x15b   : > { %1923 = vmatprep.mubr.f32.mxu1 %v4376_v0 }
 0x15d   : > { %3800 = vmatmul.mubr.msk.f32.gmra.mrb[58].mxu0 %vm928_vm0, %v825_v38  ;;  %v4030_v38 = vpack.c.bf16 %v3185_v36, %v3183_v35  ;;  %v849_v35 = vld [vmem:[%s6565_s6 + $0x188] sm:$0xff] }
 0x15e   : > { %3866 = vmatmul.mubr.msk.f32.gmra.mrb[74].mxu1 %vm928_vm0, %v891_v39  ;;  %1533 = vmatprep.mubr.f32.mxu0 %v4376_v0  ;;  %v3182_v39 = vld [vmem:[%s6566_s7 + $0x60] sm:$0xff] }
 0x15f   : > { %1929 = vmatprep.mubr.f32.mxu1 %v4376_v0  ;;  %4031 = vmatprep.subr.bf16.mxu0 %v4030_v38  ;;  %v3199_v38 = vld [vmem:[%s6566_s7 + $0xe8] sm:$0xff] }
 0x161   : > { %3801 = vmatmul.mubr.msk.f32.gmra.mrb[60].mxu0 %vm928_vm0, %v826_v40  ;;  %v3184_v40 = vld [vmem:[%s6566_s7 + $0x70] sm:$0xff] }
 0x162   : > { %3867 = vmatmul.mubr.msk.f32.gmra.mrb[76].mxu1 %vm928_vm0, %v892_v42  ;;  %1539 = vmatprep.mubr.f32.mxu0 %v4376_v0 }
 0x163   : > { %1935 = vmatprep.mubr.f32.mxu1 %v4376_v0 }
 0x165   : > { %3802 = vmatmul.mubr.msk.f32.gmra.mrb[62].mxu0 %vm928_vm0, %v827_v43  ;;  %v844_v43 = vld [vmem:[%s6565_s6 + $0x160] sm:$0xff] }
 0x166   : > { %3868 = vmatmul.mubr.msk.f32.gmra.mrb[78].mxu1 %vm928_vm0, %v893_v44  ;;  %1545 = vmatprep.mubr.f32.mxu0 %v4376_v0  ;;  %v4032_v44 = vpack.c.bf16 %v3184_v40, %v3182_v39  ;;  %v3201_v39 = vld [vmem:[%s6566_s7 + $0xf8] sm:$0xff] }
 0x167   : > { %1941 = vmatprep.mubr.f32.mxu1 %v4376_v0 }
 0x168   : > { %4033 = vmatpush1.bf16.msra.mxu0 %v4032_v44  ;;  %v4046_v44 = vpack.c.bf16 %v3201_v39, %v3199_v38 }
 0x169   : > { %3803 = vmatmul.mubr.msk.f32.gmra.mrb[64].mxu0 %vm928_vm0, %v828_v45  ;;  %v910_v45 = vld [vmem:[%s6565_s6 + $0x370] sm:$0xff] }
 0x16a   : > { %3869 = vmatmul.mubr.msk.f32.gmra.mrb[80].mxu1 %vm928_vm0, %v894_v46  ;;  %1551 = vmatprep.mubr.f32.mxu0 %v4376_v0 }
 0x16b   : > { %1947 = vmatprep.mubr.f32.mxu1 %v4376_v0 }
 0x16d   : > { %3804 = vmatmul.mubr.msk.f32.gmra.mrb[66].mxu0 %vm928_vm0, %v829_v41 }
 0x16e   : > { %3870 = vmatmul.mubr.msk.f32.gmra.mrb[82].mxu1 %vm928_vm0, %v895_v47  ;;  %1557 = vmatprep.mubr.f32.mxu0 %v4376_v0  ;;  %v845_v47 = vld [vmem:[%s6565_s6 + $0x168] sm:$0xff] }
 0x16f   : > { %1953 = vmatprep.mubr.f32.mxu1 %v4376_v0 }
 0x171   : > { %3805 = vmatmul.mubr.msk.f32.gmra.mrb[68].mxu0 %vm928_vm0, %v830_v48  ;;  %v911_v48 = vld [vmem:[%s6565_s6 + $0x378] sm:$0xff] }
 0x172   : > { %3871 = vmatmul.mubr.msk.f32.gmra.mrb[84].mxu1 %vm928_vm0, %v896_v49  ;;  %1563 = vmatprep.mubr.f32.mxu0 %v4376_v0  ;;  %v3187_v49 = vld [vmem:[%s6566_s7 + $0x88] sm:$0xff] }
 0x173   : > { %1959 = vmatprep.mubr.f32.mxu1 %v4376_v0 }
 0x175   : > { %3806 = vmatmul.mubr.msk.f32.gmra.mrb[70].mxu0 %vm928_vm0, %v831_v50  ;;  %v3189_v50 = vld [vmem:[%s6566_s7 + $0x98] sm:$0xff] }
 0x176   : > { %3872 = vmatmul.mubr.msk.f32.gmra.mrb[86].mxu1 %vm928_vm0, %v897_v51  ;;  %1569 = vmatprep.mubr.f32.mxu0 %v4376_v0  ;;  %v3186_v51 = vld [vmem:[%s6566_s7 + $0x80] sm:$0xff]  ;;  %v4034_v54 = vpack.c.bf16 %v3189_v50, %v3187_v49 }
 0x177   : > { %1965 = vmatprep.mubr.f32.mxu1 %v4376_v0 }
 0x178   : > { %4035 = vmatprep.subr.bf16.mxu0 %v4034_v54 }
 0x179   : > { %3807 = vmatmul.mubr.msk.f32.gmra.mrb[72].mxu0 %vm928_vm0, %v832_v55  ;;  %v3188_v55 = vld [vmem:[%s6566_s7 + $0x90] sm:$0xff] }
 0x17a   : > { %3873 = vmatmul.mubr.msk.f32.gmra.mrb[88].mxu1 %vm928_vm0, %v898_v58  ;;  %1575 = vmatprep.mubr.f32.mxu0 %v4376_v0  ;;  %v846_v58 = vld [vmem:[%s6565_s6 + $0x170] sm:$0xff]  ;;  %v4036_v59 = vpack.c.bf16 %v3188_v55, %v3186_v51 }
 0x17b   : > { %1971 = vmatprep.mubr.f32.mxu1 %v4376_v0 }
 0x17c   : > { %4037 = vmatpush1.bf16.msra.mxu0 %v4036_v59 }
 0x17d   : > { %3808 = vmatmul.mubr.msk.f32.gmra.mrb[74].mxu0 %vm928_vm0, %v833_v60  ;;  %4039 = vmatprep.subr.bf16.mxu0 %v4038_v8  ;;  %v3202_v8 = vld [vmem:[%s6566_s7 + $0x100] sm:$0xff] }
 0x17e   : > { %3874 = vmatmul.mubr.msk.f32.gmra.mrb[90].mxu1 %vm928_vm0, %v899_v61  ;;  %1581 = vmatprep.mubr.f32.mxu0 %v4376_v0  ;;  %v912_v61 = vld [vmem:[%s6565_s6 + $0x380] sm:$0xff] }
 0x17f   : > { %1977 = vmatprep.mubr.f32.mxu1 %v4376_v0 }
 0x181   : > { %3809 = vmatmul.mubr.msk.f32.gmra.mrb[76].mxu0 %vm928_vm0, %v834_v62 }
 0x182   : > { %3875 = vmatmul.mubr.msk.f32.gmra.mrb[92].mxu1 %vm928_vm0, %v900_v63  ;;  %1587 = vmatprep.mubr.f32.mxu0 %v4376_v0  ;;  %v5515_v63 = vshrl.u32 %v6582_v53, 7 }
 0x183   : > { %1983 = vmatprep.mubr.f32.mxu1 %v4376_v0 }
 0x184   : > { %6616 = vst [vmem:[#allocation21_spill] sm:$0xff] %v5515_v63  ;;  %v5558_v18 = vsub.s32 1, %v5515_v63 }
 0x185   : > { %3810 = vmatmul.mubr.msk.f32.gmra.mrb[78].mxu0 %vm928_vm0, %v835_v1 }
 0x186   : > { %3876 = vmatmul.mubr.msk.f32.gmra.mrb[94].mxu1 %vm928_vm0, %v901_v2  ;;  %1593 = vmatprep.mubr.f32.mxu0 %v4376_v0  ;;  %6618 = vst [vmem:[#allocation23_spill] sm:$0xff] %v5558_v18  ;;  %v5588_v36 = vrot.slane %v578_v17, %v5558_v18 }
 0x187   : > { %1989 = vmatprep.mubr.f32.mxu1 %v4376_v0 }
 0x189   : > { %3811 = vmatmul.mubr.msk.f32.gmra.mrb[80].mxu0 %vm928_vm0, %v836_v6 }
 0x18a   : > { %3877 = vmatmul.mubr.msk.f32.gmra.mrb[96].mxu1 %vm928_vm0, %v902_v9  ;;  %1599 = vmatprep.mubr.f32.mxu0 %v4376_v0  ;;  %v3190_v9 = vld [vmem:[%s6566_s7 + $0xa0] sm:$0xff] }
 0x18b   : > { %1995 = vmatprep.mubr.f32.mxu1 %v4376_v0 }
 0x18d   : > { %3812 = vmatmul.mubr.msk.f32.gmra.mrb[82].mxu0 %vm928_vm0, %v837_v11  ;;  %v4040_v11 = vpack.c.bf16 %v3192_v10, %v3190_v9  ;;  %v3204_v9 = vld [vmem:[%s6566_s7 + $0x110] sm:$0xff] }
 0x18e   : > { %3878 = vmatmul.mubr.msk.f32.gmra.mrb[98].mxu1 %vm928_vm0, %v903_v12  ;;  %1605 = vmatprep.mubr.f32.mxu0 %v4376_v0 }
 0x18f   : > { %2001 = vmatprep.mubr.f32.mxu1 %v4376_v0  ;;  %4041 = vmatpush1.bf16.msra.mxu0 %v4040_v11 }
 0x191   : > { %3813 = vmatmul.mubr.msk.f32.gmra.mrb[84].mxu0 %vm928_vm0, %v838_v13  ;;  %v848_v13 = vld [vmem:[%s6565_s6 + $0x180] sm:$0xff] }
 0x192   : > { %3879 = vmatmul.mubr.msk.f32.gmra.mrb[100].mxu1 %vm928_vm0, %v904_v14  ;;  %1611 = vmatprep.mubr.f32.mxu0 %v4376_v0  ;;  %v5549_v14 = vsub.s32 0, %v5515_v63 }
 0x193   : > { %2007 = vmatprep.mubr.f32.mxu1 %v4376_v0 }
 0x194   : > { %6617 = vst [vmem:[#allocation22_spill] sm:$0xff] %v5549_v14 }
 0x195   : > { %3814 = vmatmul.mubr.msk.f32.gmra.mrb[86].mxu0 %vm928_vm0, %v839_v15 }
 0x196   : > { %3880 = vmatmul.mubr.msk.f32.gmra.mrb[102].mxu1 %vm928_vm0, %v905_v16  ;;  %1617 = vmatprep.mubr.f32.mxu0 %v4376_v0 }
 0x197   : > { %2013 = vmatprep.mubr.f32.mxu1 %v4376_v0 }
 0x199   : > { %3815 = vmatmul.mubr.msk.f32.gmra.mrb[88].mxu0 %vm928_vm0, %v840_v20  ;;  %v3197_v20 = vld [vmem:[%s6566_s7 + $0xd8] sm:$0xff] }
 0x19a   : > { %3881 = vmatmul.mubr.msk.f32.gmra.mrb[104].mxu1 %vm928_vm0, %v906_v23  ;;  %1623 = vmatprep.mubr.f32.mxu0 %v4376_v0  ;;  %v4042_v23 = vpack.c.bf16 %v3197_v20, %v3195_v19 }
 0x19b   : > { %2019 = vmatprep.mubr.f32.mxu1 %v4376_v0 }
 0x19c   : > { %4043 = vmatprep.subr.bf16.mxu0 %v4042_v23 }
 0x19d   : > { %v5417_v27 = vpop.f32.mrb[0].mxu1  ;;  %3816 = vmatmul.mubr.msk.f32.gmra.mrb[90].mxu0 %vm928_vm0, %v841_v25  ;;  %v3196_v25 = vld [vmem:[%s6566_s7 + $0xd0] sm:$0xff] }
 0x19e   : > { %v5420_v28 = vpop.f32.mrb[1].mxu1  ;;  %3882 = vmatmul.mubr.msk.f32.gmra.mrb[106].mxu1 %vm928_vm0, %v907_v26  ;;  %1629 = vmatprep.mubr.f32.mxu0 %v4376_v0  ;;  %v4044_v26 = vpack.c.bf16 %v3196_v25, %v3194_v24  ;;  %v3207_v24 = vld [vmem:[%s6566_s7 + $0x128] sm:$0xff]  ;;  %v3209_v25 = vld [vmem:[%s6566_s7 + $0x138] sm:$0xff] }
 0x19f   : > { %2025 = vmatprep.mubr.f32.mxu1 %v4376_v0 }
 0x1a0   : > { %4045 = vmatpush1.bf16.msra.mxu0 %v4044_v26 }
 0x1a1   : > { %v5431_v31 = vpop.f32.mrb[2].mxu1  ;;  %3817 = vmatmul.mubr.msk.f32.gmra.mrb[92].mxu0 %vm928_vm0, %v842_v29  ;;  %4047 = vmatprep.subr.bf16.mxu0 %v4046_v44  ;;  %v4054_v44 = vpack.c.bf16 %v3209_v25, %v3207_v24 }
 0x1a2   : > { %v5434_v32 = vpop.f32.mrb[3].mxu1  ;;  %3883 = vmatmul.mubr.msk.f32.gmra.mrb[108].mxu1 %vm928_vm0, %v908_v30  ;;  %1635 = vmatprep.mubr.f32.mxu0 %v4376_v0  ;;  %v5579_v30 = vrot.slane %v578_v17, %v5549_v14 }
 0x1a3   : > { %2031 = vmatprep.mubr.f32.mxu1 %v4376_v0 }
 0x1a5   : > { %v5451_v37 = vpop.f32.mrb[4].mxu1  ;;  %3818 = vmatmul.mubr.msk.f32.gmra.mrb[94].mxu0 %vm928_vm0, %v843_v33 }
 0x1a6   : > { %v5460_v42 = vpop.f32.mrb[5].mxu1  ;;  %3884 = vmatmul.mubr.msk.f32.gmra.mrb[110].mxu1 %vm928_vm0, %v909_v34  ;;  %1641 = vmatprep.mubr.f32.mxu0 %v4376_v0 }
 0x1a7   : > { %2037 = vmatprep.mubr.f32.mxu1 %v4376_v0 }
 0x1a9   : > { %v5471_v46 = vpop.f32.mrb[6].mxu1  ;;  %3819 = vmatmul.mubr.msk.f32.gmra.mrb[96].mxu0 %vm928_vm0, %v844_v43  ;;  %v915_v43 = vld [vmem:[%s6565_s6 + $0x398] sm:$0xff] }
 0x1aa   : > { %v5474_v41 = vpop.f32.mrb[7].mxu1  ;;  %3885 = vmatmul.mubr.msk.f32.gmra.mrb[112].mxu1 %vm928_vm0, %v910_v45  ;;  %1647 = vmatprep.mubr.f32.mxu0 %v4376_v0  ;;  %v3198_v45 = vld [vmem:[%s6566_s7 + $0xe0] sm:$0xff] }
 0x1ab   : > { %2043 = vmatprep.mubr.f32.mxu1 %v4376_v0 }
 0x1ad   : > { %v1727_v52 = vpop.f32.mrb[8].mxu1  ;;  %3820 = vmatmul.mubr.msk.f32.gmra.mrb[98].mxu0 %vm928_vm0, %v845_v47  ;;  %v3200_v47 = vld [vmem:[%s6566_s7 + $0xf0] sm:$0xff] }
 0x1ae   : > { %v5499_v56 = vmul.f32 %v1727_v52, %v5451_v37  ;;  %v1729_v57 = vpop.f32.mrb[9].mxu1  ;;  %3886 = vmatmul.mubr.msk.f32.gmra.mrb[114].mxu1 %vm928_vm0, %v911_v48  ;;  %1653 = vmatprep.mubr.f32.mxu0 %v4376_v0  ;;  %v4048_v50 = vpack.c.bf16 %v3200_v47, %v3198_v45  ;;  %v3206_v45 = vld [vmem:[%s6566_s7 + $0x120] sm:$0xff]  ;;  %v3208_v47 = vld [vmem:[%s6566_s7 + $0x130] sm:$0xff] }
 0x1af   : > { %v5507_v60 = vmul.f32 %v1729_v57, %v5460_v42  ;;  %2049 = vmatprep.mubr.f32.mxu1 %v4376_v0 }
 0x1b0   : > { %4049 = vmatpush1.bf16.msra.mxu0 %v4048_v50 }
 0x1b1   : > { %v1733_v62 = vpop.f32.mrb[10].mxu1  ;;  %3821 = vmatmul.mubr.msk.f32.gmra.mrb[100].mxu0 %vm928_vm0, %v846_v58 }
 0x1b2   : > { %v5518_v1 = vmul.f32 %v1733_v62, %v5471_v46  ;;  %v1735_v2 = vpop.f32.mrb[11].mxu1  ;;  %3887 = vmatmul.mubr.msk.f32.gmra.mrb[116].mxu1 %vm928_vm0, %v912_v61  ;;  %1659 = vmatprep.mubr.f32.mxu0 %v4376_v0  ;;  %v850_v61 = vld [vmem:[%s6565_s6 + $0x190] sm:$0xff] }
 0x1b3   : > { %v5532_v6 = vmul.f32 %v1735_v2, %v5474_v41  ;;  %2055 = vmatprep.mubr.f32.mxu1 %v4376_v0  ;;  %v916_v2 = vld [vmem:[%s6565_s6 + $0x3a0] sm:$0xff] }
 0x1b5   : > { %v1739_v12 = vpop.f32.mrb[12].mxu1  ;;  %3822 = vmatmul.mubr.msk.f32.gmra.mrb[102].mxu0 %vm928_vm0, %v847_v3  ;;  %v3203_v3 = vld [vmem:[%s6566_s7 + $0x108] sm:$0xff] }
 0x1b6   : > { %v2266_v15 = vmul.f32 %v1739_v12, %v5417_v27  ;;  %v1741_v16 = vpop.f32.mrb[13].mxu1  ;;  %3888 = vmatmul.mubr.msk.f32.gmra.mrb[118].mxu1 %vm928_vm0, %v913_v7  ;;  %1665 = vmatprep.mubr.f32.mxu0 %v4376_v0  ;;  %v3205_v7 = vld [vmem:[%s6566_s7 + $0x118] sm:$0xff] }
 0x1b7   : > { %v2267_v21 = vmul.f32 %v1741_v16, %v5420_v28  ;;  %2061 = vmatprep.mubr.f32.mxu1 %v4376_v0 }
 0x1b9   : > { %v1745_v29 = vpop.f32.mrb[14].mxu1  ;;  %3823 = vmatmul.mubr.msk.f32.gmra.mrb[104].mxu0 %vm928_vm0, %v848_v13 }
 0x1ba   : > { %v2268_v33 = vmul.f32 %v1745_v29, %v5431_v31  ;;  %v1747_v34 = vpop.f32.mrb[15].mxu1  ;;  %3889 = vmatmul.mubr.msk.f32.gmra.mrb[120].mxu1 %vm928_vm0, %v914_v22  ;;  %1671 = vmatprep.mubr.f32.mxu0 %v4376_v0  ;;  %v917_v29 = vld [vmem:[%s6565_s6 + $0x3a8] sm:$0xff] }
 0x1bb   : > { %v2269_v40 = vmul.f32 %v1747_v34, %v5434_v32  ;;  %2067 = vmatprep.mubr.f32.mxu1 %v4376_v0  ;;  %v4050_v34 = vpack.c.bf16 %v3205_v7, %v3203_v3  ;;  %v918_v7 = vld [vmem:[%s6565_s6 + $0x3b0] sm:$0xff]  ;;  %v3214_v3 = vld [vmem:[%s6566_s7 + $0x160] sm:$0xff] }
 0x1bc   : > { %v2672_v48 = vadd.f32 %v2268_v33, %v2266_v15  ;;  %v656_v49 = vpop.f32.mrb[0].mxu0 }
 0x1bd   : > { %v2681_v51 = vadd.f32 %v2269_v40, %v2267_v21  ;;  %v1751_v52 = vpop.f32.mrb[16].mxu1  ;;  %3824 = vmatmul.mubr.msk.f32.gmra.mrb[106].mxu0 %vm928_vm0, %v849_v35  ;;  %v5609_v54 = vadd.f32 %v656_v49, %v5579_v30  ;;  %v658_v55 = vpop.f32.mrb[1].mxu0  ;;  %v851_v21 = vld [vmem:[%s6565_s6 + $0x198] sm:$0xff]  ;;  %v4052_v35 = vpack.c.bf16 %v3204_v9, %v3202_v8  ;;  %4051 = vmatprep.subr.bf16.mxu0 %v4050_v34 }
 0x1be   : > { %v2270_v57 = vmul.f32 %v1751_v52, %v5451_v37  ;;  %v1753_v58 = vpop.f32.mrb[17].mxu1  ;;  %3890 = vmatmul.mubr.msk.f32.gmra.mrb[122].mxu1 %vm928_vm0, %v915_v43  ;;  %v5614_v59 = vadd.f32 %v658_v55, %v5588_v36  ;;  %1677 = vmatprep.mubr.f32.mxu0 %v4376_v0  ;;  %v4056_v9 = vpack.c.bf16 %v3208_v47, %v3206_v45  ;;  %v3213_v34 = vld [vmem:[%s6566_s7 + $0x158] sm:$0xff] }
 0x1bf   : > { %v2271_v62 = vmul.f32 %v1753_v58, %v5460_v42  ;;  %2073 = vmatprep.mubr.f32.mxu1 %v4376_v0  ;;  %v2986_v15 = vrot.slane %v5609_v54, 1  ;;  %4053 = vmatpush1.bf16.msra.mxu0 %v4052_v35  ;;  %v3210_v35 = vld [vmem:[%s6566_s7 + $0x140] sm:$0xff] }
 0x1c0   : > { %v2673_v4 = vadd.f32 %v2672_v48, %v2270_v57  ;;  %v662_v5 = vpop.f32.mrb[2].mxu0  ;;  %v2987_v22 = vrot.slane %v5614_v59, 1  ;;  %4055 = vmatprep.subr.bf16.mxu0 %v4054_v44 }
 0x1c1   : > { %v2682_v10 = vadd.f32 %v2681_v51, %v2271_v62  ;;  %v1757_v11 = vpop.f32.mrb[18].mxu1  ;;  %3825 = vmatmul.mubr.msk.f32.gmra.mrb[108].mxu0 %vm928_vm0, %v850_v61  ;;  %v5639_v12 = vadd.f32 %v662_v5, %v5579_v30  ;;  %v664_v13 = vpop.f32.mrb[3].mxu0 }
 0x1c2   : > { %v2272_v17 = vmul.f32 %v1757_v11, %v5471_v46  ;;  %v1759_v19 = vpop.f32.mrb[19].mxu1  ;;  %3891 = vmatmul.mubr.msk.f32.gmra.mrb[124].mxu1 %vm928_vm0, %v916_v2  ;;  %v5646_v20 = vadd.f32 %v664_v13, %v5588_v36  ;;  %1683 = vmatprep.mubr.f32.mxu0 %v4376_v0  ;;  %v852_v2 = vld [vmem:[%s6565_s6 + $0x1a0] sm:$0xff] }
 0x1c3   : > { %v2273_v26 = vmul.f32 %v1759_v19, %v5474_v41  ;;  %2079 = vmatprep.mubr.f32.mxu1 %v4376_v0  ;;  %4057 = vmatpush1.bf16.msra.mxu0 %v4056_v9 }
 0x1c4   : > { %v2674_v38 = vadd.f32 %v2673_v4, %v2272_v17  ;;  %v668_v39 = vpop.f32.mrb[4].mxu0  ;;  %v3211_v17 = vld [vmem:[%s6566_s7 + $0x148] sm:$0xff] }
 0x1c5   : > { %v2683_v48 = vadd.f32 %v2682_v10, %v2273_v26  ;;  %v1763_v49 = vpop.f32.mrb[20].mxu1  ;;  %3826 = vmatmul.mubr.msk.f32.gmra.mrb[110].mxu0 %vm928_vm0, %v851_v21  ;;  %v5676_v50 = vadd.f32 %v668_v39, %v5579_v30  ;;  %v670_v51 = vpop.f32.mrb[5].mxu0 }
 0x1c6   : > { %v2675_v57 = vrot.slane %v2674_v38, 4  ;;  %v2274_v58 = vmul.f32 %v1763_v49, %v5417_v27  ;;  %v1765_v61 = vpop.f32.mrb[21].mxu1  ;;  %3892 = vmatmul.mubr.msk.f32.gmra.mrb[126].mxu1 %vm928_vm0, %v917_v29  ;;  %v5683_v62 = vadd.f32 %v670_v51, %v5588_v36  ;;  %1689 = vmatprep.mubr.f32.mxu0 %v4376_v0 }
 0x1c7   : > { %v2684_v4 = vrot.slane %v2683_v48, 4  ;;  %v2275_v5 = vmul.f32 %v1765_v61, %v5420_v28  ;;  %2085 = vmatprep.mubr.f32.mxu1 %v4376_v0  ;;  %v3014_v49 = vrot.slane %v5676_v50, 1  ;;  %v919_v61 = vld [vmem:[%s6565_s6 + $0x3b8] sm:$0xff] }
 0x1c8   : > { %v2676_v10 = vadd.f32 %v2675_v57, %v2674_v38  ;;  %v674_v11 = vpop.f32.mrb[6].mxu0  ;;  %v3212_v38 = vld [vmem:[%s6566_s7 + $0x150] sm:$0xff] }
 0x1c9   : > { %v2685_v24 = vadd.f32 %v2684_v4, %v2683_v48  ;;  %v1769_v25 = vpop.f32.mrb[22].mxu1  ;;  %3827 = vmatmul.mubr.msk.f32.gmra.mrb[112].mxu0 %vm928_vm0, %v852_v2  ;;  %v5704_v26 = vadd.f32 %v674_v11, %v5579_v30  ;;  %v676_v29 = vpop.f32.mrb[7].mxu0  ;;  %v853_v48 = vld [vmem:[%s6565_s6 + $0x1a8] sm:$0xff]  ;;  %v3016_v2 = vrot.slane %v5676_v50, 2  ;;  %v4060_v53 = vpack.c.bf16 %v3212_v38, %v3210_v35  ;;  %v3230_v35 = vld [vmem:[%s6566_s7 + $0x1e0] sm:$0xff] }
 0x1ca   : > { %v2677_v44 = vrot.slane %v2676_v10, 2  ;;  %v2276_v45 = vmul.f32 %v1769_v25, %v5431_v31  ;;  %v1771_v30 = vpop.f32.mrb[23].mxu1  ;;  %3893 = vmatmul.mubr.msk.f32.gmra.mrb[128].mxu1 %vm928_vm0, %v918_v7  ;;  %v5719_v47 = vadd.f32 %v676_v29, %v5588_v36  ;;  %1695 = vmatprep.mubr.f32.mxu0 %v4376_v0  ;;  %v3015_v36 = vrot.slane %v5683_v62, 1  ;;  %v3215_v4 = vld [vmem:[%s6566_s7 + $0x168] sm:$0xff]  ;;  %v3217_v7 = vld [vmem:[%s6566_s7 + $0x178] sm:$0xff] }
 0x1cb   : > { %v2686_v51 = vrot.slane %v2685_v24, 2  ;;  %v2277_v57 = vmul.f32 %v1771_v30, %v5434_v32  ;;  %2091 = vmatprep.mubr.f32.mxu1 %v4376_v0  ;;  %v4058_v30 = vpack.c.bf16 %v3213_v34, %v3211_v17  ;;  %v4062_v9 = vpack.c.bf16 %v3217_v7, %v3215_v4 }
 0x1cc   : > { %v2678_v11 = vadd.f32 %v2677_v44, %v2676_v10  ;;  %v2690_v25 = vadd.f32 %v2276_v45, %v2274_v58  ;;  %v1379_v29 = vpop.f32.mrb[8].mxu0  ;;  %v3216_v58 = vld [vmem:[%s6566_s7 + $0x170] sm:$0xff]  ;;  %v3017_v34 = vrot.slane %v5683_v62, 2 }
 0x1cd   : > { %v2687_v39 = vadd.f32 %v2686_v51, %v2685_v24  ;;  %v2699_v21 = vadd.f32 %v2277_v57, %v2275_v5  ;;  %v2146_v13 = vmul.f32 %v1379_v29, %v5417_v27  ;;  %v1775_v19 = vpop.f32.mrb[24].mxu1  ;;  %v1381_v8 = vpop.f32.mrb[9].mxu0  ;;  %3828 = vmatmul.mubr.msk.f32.gmra.mrb[114].mxu0 %vm928_vm0, %v853_v48  ;;  %v854_v24 = vld [vmem:[%s6565_s6 + $0x1b0] sm:$0xff]  ;;  %4059 = vmatprep.subr.bf16.mxu0 %v4058_v30  ;;  %v3219_v48 = vld [vmem:[%s6566_s7 + $0x188] sm:$0xff]  ;;  %v3221_v51 = vld [vmem:[%s6566_s7 + $0x198] sm:$0xff] }
 0x1ce   : > { %v2278_v10 = vmul.f32 %v1775_v19, %v5451_v37  ;;  %v2147_v17 = vmul.f32 %v1381_v8, %v5420_v28  ;;  %v1777_v5 = vpop.f32.mrb[25].mxu1  ;;  %3894 = vmatmul.mubr.msk.f32.gmra.mrb[130].mxu1 %vm928_vm0, %v919_v61  ;;  %1701 = vmatprep.mubr.f32.mxu0 %v4376_v0  ;;  %v2679_v38 = vrot.slane %v2678_v11, 1  ;;  %v920_v8 = vld [vmem:[%s6565_s6 + $0x3c0] sm:$0xff]  ;;  %v4064_v29 = vpack.c.bf16 %v3216_v58, %v3214_v3 }
 0x1cf   : > { %v2279_v44 = vmul.f32 %v1777_v5, %v5460_v42  ;;  %2097 = vmatprep.mubr.f32.mxu1 %v4376_v0  ;;  %v2688_v57 = vrot.slane %v2687_v39, 1  ;;  %4061 = vmatpush1.bf16.msra.mxu0 %v4060_v53  ;;  %v4066_v45 = vpack.c.bf16 %v3221_v51, %v3219_v48  ;;  %v3220_v53 = vld [vmem:[%s6566_s7 + $0x190] sm:$0xff]  ;;  %v3223_v51 = vld [vmem:[%s6566_s7 + $0x1a8] sm:$0xff] }
 0x1d0   : > { %v2691_v61 = vadd.f32 %v2690_v25, %v2278_v10  ;;  %v1385_v4 = vpop.f32.mrb[10].mxu0  ;;  %4063 = vmatprep.subr.bf16.mxu0 %v4062_v9  ;;  %v3218_v25 = vld [vmem:[%s6566_s7 + $0x180] sm:$0xff]  ;;  %v855_v9 = vld [vmem:[%s6565_s6 + $0x1b8] sm:$0xff] }
 0x1d1   : > { %v2700_v5 = vadd.f32 %v2699_v21, %v2279_v44  ;;  %v2148_v55 = vmul.f32 %v1385_v4, %v5431_v31  ;;  %v1781_v52 = vpop.f32.mrb[26].mxu1  ;;  %v1387_v30 = vpop.f32.mrb[11].mxu0  ;;  %3829 = vmatmul.mubr.msk.f32.gmra.mrb[116].mxu0 %vm928_vm0, %v854_v24  ;;  %v5788_v44 = vadd.f32 %v2679_v38, %v2678_v11  ;;  %v3225_v4 = vld [vmem:[%s6566_s7 + $0x1b8] sm:$0xff]  ;;  %v5802_v38 = vadd.f32 %v2688_v57, %v2687_v39  ;;  %v3222_v11 = vld [vmem:[%s6566_s7 + $0x1a0] sm:$0xff]  ;;  %v3224_v39 = vld [vmem:[%s6566_s7 + $0x1b0] sm:$0xff] }
 0x1d2   : > { %v2280_v3 = vmul.f32 %v1781_v52, %v5471_v46  ;;  %v2149_v21 = vmul.f32 %v1387_v30, %v5434_v32  ;;  %v1783_v58 = vpop.f32.mrb[27].mxu1  ;;  %3895 = vmatmul.mubr.msk.f32.gmra.mrb[132].mxu1 %vm928_vm0, %v920_v8  ;;  %1707 = vmatprep.mubr.f32.mxu0 %v4376_v0  ;;  %v921_v8 = vld [vmem:[%s6565_s6 + $0x3c8] sm:$0xff]  ;;  %v4070_v40 = vpack.c.bf16 %v3225_v4, %v3223_v51  ;;  %v3226_v4 = vld [vmem:[%s6566_s7 + $0x1c0] sm:$0xff] }
 0x1d3   : > { %v2402_v48 = vadd.f32 %v2148_v55, %v2146_v13  ;;  %v2281_v52 = vmul.f32 %v1783_v58, %v5474_v41  ;;  %2103 = vmatprep.mubr.f32.mxu1 %v4376_v0  ;;  %4065 = vmatpush1.bf16.msra.mxu0 %v4064_v29  ;;  %v4068_v58 = vpack.c.bf16 %v3220_v53, %v3218_v25 }
 0x1d4   : > { %v2692_v55 = vadd.f32 %v2691_v61, %v2280_v3  ;;  %v2411_v13 = vadd.f32 %v2149_v21, %v2147_v17  ;;  %v1391_v30 = vpop.f32.mrb[12].mxu0  ;;  %4067 = vmatprep.subr.bf16.mxu0 %v4066_v45  ;;  %v856_v45 = vld [vmem:[%s6565_s6 + $0x1c0] sm:$0xff]  ;;  %v4072_v51 = vpack.c.bf16 %v3224_v39, %v3222_v11 }
 0x1d5   : > { %v2701_v24 = vadd.f32 %v2700_v5, %v2281_v52  ;;  %v2150_v10 = vmul.f32 %v1391_v30, %v5451_v37  ;;  %v1787_v43 = vpop.f32.mrb[28].mxu1  ;;  %v1393_v7 = vpop.f32.mrb[13].mxu0  ;;  %3830 = vmatmul.mubr.msk.f32.gmra.mrb[118].mxu0 %vm928_vm0, %v855_v9  ;;  %v3229_v9 = vld [vmem:[%s6566_s7 + $0x1d8] sm:$0xff]  ;;  %v3228_v30 = vld [vmem:[%s6566_s7 + $0x1d0] sm:$0xff] }
 0x1d6   : > { %v2693_v57 = vrot.slane %v2692_v55, 4  ;;  %v2282_v61 = vmul.f32 %v1787_v43, %v5417_v27  ;;  %v2151_v29 = vmul.f32 %v1393_v7, %v5460_v42  ;;  %v1789_v5 = vpop.f32.mrb[29].mxu1  ;;  %3896 = vmatmul.mubr.msk.f32.gmra.mrb[134].mxu1 %vm928_vm0, %v921_v8  ;;  %1713 = vmatprep.mubr.f32.mxu0 %v4376_v0  ;;  %v922_v43 = vld [vmem:[%s6565_s6 + $0x3d0] sm:$0xff]  ;;  %v3227_v7 = vld [vmem:[%s6566_s7 + $0x1c8] sm:$0xff] }
 0x1d7   : > { %v2702_v53 = vrot.slane %v2701_v24, 4  ;;  %v2403_v3 = vadd.f32 %v2402_v48, %v2150_v10  ;;  %v2283_v21 = vmul.f32 %v1789_v5, %v5420_v28  ;;  %2109 = vmatprep.mubr.f32.mxu1 %v4376_v0  ;;  %4069 = vmatpush1.bf16.msra.mxu0 %v4068_v58 }
 0x1d8   : > { %v2694_v8 = vadd.f32 %v2693_v57, %v2692_v55  ;;  %v2412_v10 = vadd.f32 %v2411_v13, %v2151_v29  ;;  %v1397_v48 = vpop.f32.mrb[14].mxu0  ;;  %4071 = vmatprep.subr.bf16.mxu0 %v4070_v40  ;;  %v4074_v55 = vpack.c.bf16 %v3229_v9, %v3227_v7  ;;  %v4076_v7 = vpack.c.bf16 %v3228_v30, %v3226_v4  ;;  %v3233_v9 = vld [vmem:[%s6566_s7 + $0x1f8] sm:$0xff] }
 0x1d9   : > { %v2703_v25 = vadd.f32 %v2702_v53, %v2701_v24  ;;  %v2152_v17 = vmul.f32 %v1397_v48, %v5471_v46  ;;  %v1793_v23 = vpop.f32.mrb[30].mxu1  ;;  %v1399_v52 = vpop.f32.mrb[15].mxu0  ;;  %3831 = vmatmul.mubr.msk.f32.gmra.mrb[120].mxu0 %vm928_vm0, %v856_v45  ;;  %v857_v24 = vld [vmem:[%s6565_s6 + $0x1c8] sm:$0xff] }
 0x1da   : > { %v2695_v13 = vrot.slane %v2694_v8, 2  ;;  %v2284_v58 = vmul.f32 %v1793_v23, %v5431_v31  ;;  %v2153_v39 = vmul.f32 %v1399_v52, %v5474_v41  ;;  %v1795_v57 = vpop.f32.mrb[31].mxu1  ;;  %3897 = vmatmul.mubr.msk.f32.gmra.mrb[136].mxu1 %vm928_vm0, %v922_v43  ;;  %1719 = vmatprep.mubr.f32.mxu0 %v4376_v0  ;;  %v923_v23 = vld [vmem:[%s6565_s6 + $0x3d8] sm:$0xff]  ;;  %v3231_v43 = vld [vmem:[%s6566_s7 + $0x1e8] sm:$0xff] }
 0x1db   : > { %v2704_v40 = vrot.slane %v2703_v25, 2  ;;  %v2404_v45 = vadd.f32 %v2403_v3, %v2152_v17  ;;  %v2285_v53 = vmul.f32 %v1795_v57, %v5434_v32  ;;  %2115 = vmatprep.mubr.f32.mxu1 %v4376_v0  ;;  %4073 = vmatpush1.bf16.msra.mxu0 %v4072_v51  ;;  %v4078_v57 = vpack.c.bf16 %v3233_v9, %v3231_v43 }
 0x1dc   : > { %v2696_v52 = vadd.f32 %v2695_v13, %v2694_v8  ;;  %v2708_v48 = vadd.f32 %v2284_v58, %v2282_v61  ;;  %v2413_v17 = vadd.f32 %v2412_v10, %v2153_v39  ;;  %v1403_v3 = vpop.f32.mrb[16].mxu0  ;;  %4075 = vmatprep.subr.bf16.mxu0 %v4074_v55  ;;  %v3232_v61 = vld [vmem:[%s6566_s7 + $0x1f0] sm:$0xff]  ;;  %v924_v39 = vld [vmem:[%s6565_s6 + $0x3e0] sm:$0xff] }
 0x1dd   : > { %v2705_v29 = vadd.f32 %v2704_v40, %v2703_v25  ;;  %v2405_v11 = vrot.slane %v2404_v45, 4  ;;  %v2717_v5 = vadd.f32 %v2285_v53, %v2283_v21  ;;  %v2154_v19 = vmul.f32 %v1403_v3, %v5417_v27  ;;  %v1799_v4 = vpop.f32.mrb[32].mxu1  ;;  %v1405_v30 = vpop.f32.mrb[17].mxu0  ;;  %3832 = vmatmul.mubr.msk.f32.gmra.mrb[122].mxu0 %vm928_vm0, %v857_v24 }
 0x1de   : > { %v2697_v8 = vrot.slane %v2696_v52, 1  ;;  %v2414_v10 = vrot.slane %v2413_v17, 4  ;;  %v2286_v25 = vmul.f32 %v1799_v4, %v5451_v37  ;;  %v2155_v21 = vmul.f32 %v1405_v30, %v5420_v28  ;;  %v1801_v51 = vpop.f32.mrb[33].mxu1  ;;  %3898 = vmatmul.mubr.msk.f32.gmra.mrb[138].mxu1 %vm928_vm0, %v923_v23 }
 0x1df   : > { %v2706_v13 = vrot.slane %v2705_v29, 1  ;;  %v2406_v58 = vadd.f32 %v2405_v11, %v2404_v45  ;;  %v2287_v55 = vmul.f32 %v1801_v51, %v5460_v42  ;;  %2121 = vmatprep.mubr.f32.mxu1 %v4376_v0  ;;  %4077 = vmatpush1.bf16.msra.mxu0 %v4076_v7  ;;  %v4080_v3 = vpack.c.bf16 %v3232_v61, %v3230_v35 }
 0x1e0   : > { %v2698_v40 = vadd.f32 %v2697_v8, %v2696_v52  ;;  %v2415_v53 = vadd.f32 %v2414_v10, %v2413_v17  ;;  %v2709_v43 = vadd.f32 %v2708_v48, %v2286_v25  ;;  %v1409_v9 = vpop.f32.mrb[18].mxu0  ;;  %4079 = vmatprep.subr.bf16.mxu0 %v4078_v57  ;;  %v925_v17 = vld [vmem:[%s6565_s6 + $0x3e8] sm:$0xff] }
 0x1e1   : > { %v2707_v4 = vadd.f32 %v2706_v13, %v2705_v29  ;;  %v2407_v23 = vrot.slane %v2406_v58, 2  ;;  %v2718_v30 = vadd.f32 %v2717_v5, %v2287_v55  ;;  %v2156_v11 = vmul.f32 %v1409_v9, %v5431_v31  ;;  %v1805_v45 = vpop.f32.mrb[34].mxu1  ;;  %v1411_v51 = vpop.f32.mrb[19].mxu0 }
 0x1e2   : > { %v5881_v33 = vmul.f32 %v2698_v40, %v5676_v50  ;;  %v2416_v16 = vrot.slane %v2415_v53, 2  ;;  %v2288_v24 = vmul.f32 %v1805_v45, %v5471_v46  ;;  %v2157_v52 = vmul.f32 %v1411_v51, %v5434_v32  ;;  %v1807_v48 = vpop.f32.mrb[35].mxu1  ;;  %3899 = vmatmul.mubr.msk.f32.gmra.mrb[140].mxu1 %vm928_vm0, %v924_v39 }
 0x1e3   : > { %v5887_v35 = vmul.f32 %v2707_v4, %v5683_v62  ;;  %v2408_v5 = vadd.f32 %v2407_v23, %v2406_v58  ;;  %v2420_v29 = vadd.f32 %v2156_v11, %v2154_v19  ;;  %v2289_v7 = vmul.f32 %v1807_v48, %v5474_v41  ;;  %2127 = vmatprep.mubr.f32.mxu1 %v4376_v0 }
 0x1e4   : > { %v2417_v57 = vadd.f32 %v2416_v16, %v2415_v53  ;;  %v2710_v61 = vadd.f32 %v2709_v43, %v2288_v24  ;;  %v2429_v8 = vadd.f32 %v2157_v52, %v2155_v21  ;;  %v1415_v10 = vpop.f32.mrb[20].mxu0  ;;  %4081 = vmatpush1.bf16.msra.mxu0 %v4080_v3 }
 0x1e5   : > { %v2409_v13 = vrot.slane %v2408_v5, 1  ;;  %v2719_v55 = vadd.f32 %v2718_v30, %v2289_v7  ;;  %v2158_v58 = vmul.f32 %v1415_v10, %v5451_v37  ;;  %v1811_v19 = vpop.f32.mrb[36].mxu1  ;;  %v1417_v39 = vpop.f32.mrb[21].mxu0  ;;  %v926_v30 = vld [vmem:[%s6565_s6 + $0x3f0] sm:$0xff] }
 0x1e6   : > { %v2418_v9 = vrot.slane %v2417_v57, 1  ;;  %v2711_v4 = vrot.slane %v2710_v61, 4  ;;  %v2290_v23 = vmul.f32 %v1811_v19, %v5417_v27  ;;  %v2159_v16 = vmul.f32 %v1417_v39, %v5460_v42  ;;  %v1813_v24 = vpop.f32.mrb[37].mxu1  ;;  %3900 = vmatmul.mubr.msk.f32.gmra.mrb[142].mxu1 %vm928_vm0, %v925_v17 }
 0x1e7   : > { %v2410_v21 = vadd.f32 %v2409_v13, %v2408_v5  ;;  %v2720_v53 = vrot.slane %v2719_v55, 4  ;;  %v2421_v43 = vadd.f32 %v2420_v29, %v2158_v58  ;;  %v2291_v3 = vmul.f32 %v1813_v24, %v5420_v28  ;;  %2133 = vmatprep.mubr.f32.mxu1 %v4376_v0 }
 0x1e8   : > { %v2419_v11 = vadd.f32 %v2418_v9, %v2417_v57  ;;  %v2712_v45 = vadd.f32 %v2711_v4, %v2710_v61  ;;  %v2430_v51 = vadd.f32 %v2429_v8, %v2159_v16  ;;  %v1421_v52 = vpop.f32.mrb[22].mxu0  ;;  %v927_v4 = vld [vmem:[%s6565_s6 + $0x3f8] sm:$0xff] }
 0x1e9   : > { %v5907_v7 = vmul.f32 %v2410_v21, %v5609_v54  ;;  %v2721_v5 = vadd.f32 %v2720_v53, %v2719_v55  ;;  %v2160_v29 = vmul.f32 %v1421_v52, %v5471_v46  ;;  %v1817_v17 = vpop.f32.mrb[38].mxu1  ;;  %v1423_v10 = vpop.f32.mrb[23].mxu0 }
 0x1ea   : > { %v5912_v58 = vmul.f32 %v2419_v11, %v5614_v59  ;;  %v2713_v19 = vrot.slane %v2712_v45, 2  ;;  %v2292_v57 = vmul.f32 %v1817_v17, %v5431_v31  ;;  %v2161_v61 = vmul.f32 %v1423_v10, %v5474_v41  ;;  %v1819_v8 = vpop.f32.mrb[39].mxu1  ;;  %3901 = vmatmul.mubr.msk.f32.gmra.mrb[144].mxu1 %vm928_vm0, %v926_v30 }
 0x1eb   : > { %v2722_v39 = vrot.slane %v2721_v5, 2  ;;  %v2422_v9 = vadd.f32 %v2421_v43, %v2160_v29  ;;  %v2293_v55 = vmul.f32 %v1819_v8, %v5434_v32  ;;  %2139 = vmatprep.mubr.f32.mxu1 %v4376_v0 }
 0x1ec   : > { %v2714_v24 = vadd.f32 %v2713_v19, %v2712_v45  ;;  %v2726_v21 = vadd.f32 %v2292_v57, %v2290_v23  ;;  %v2431_v53 = vadd.f32 %v2430_v51, %v2161_v61  ;;  %v1427_v11 = vpop.f32.mrb[24].mxu0 }
 0x1ed   : > { %v2723_v17 = vadd.f32 %v2722_v39, %v2721_v5  ;;  %v2423_v30 = vrot.slane %v2422_v9, 4  ;;  %v2735_v10 = vadd.f32 %v2293_v55, %v2291_v3  ;;  %v2162_v43 = vmul.f32 %v1427_v11, %v5417_v27  ;;  %v1823_v29 = vpop.f32.mrb[40].mxu1  ;;  %v1429_v8 = vpop.f32.mrb[25].mxu0 }
 0x1ee   : > { %v2715_v0 = vrot.slane %v2714_v24, 1  ;;  %v2432_v13 = vrot.slane %v2431_v53, 4  ;;  %v2294_v48 = vmul.f32 %v1823_v29, %v5451_v37  ;;  %v2163_v40 = vmul.f32 %v1429_v8, %v5420_v28  ;;  %v1825_v16 = vpop.f32.mrb[41].mxu1  ;;  %3902 = vmatmul.mubr.msk.f32.gmra.mrb[146].mxu1 %vm928_vm0, %v927_v4 }
 0x1ef   : > { %v2724_v23 = vrot.slane %v2723_v17, 1  ;;  %v2424_v45 = vadd.f32 %v2423_v30, %v2422_v9  ;;  %v2295_v51 = vmul.f32 %v1825_v16, %v5460_v42 }
 0x1f0   : > { %v2716_v3 = vadd.f32 %v2715_v0, %v2714_v24  ;;  %v2433_v19 = vadd.f32 %v2432_v13, %v2431_v53  ;;  %v2727_v57 = vadd.f32 %v2726_v21, %v2294_v48  ;;  %v1433_v61 = vpop.f32.mrb[26].mxu0 }
 0x1f1   : > { %v2725_v55 = vadd.f32 %v2724_v23, %v2723_v17  ;;  %v2425_v11 = vrot.slane %v2424_v45, 2  ;;  %v2736_v29 = vadd.f32 %v2735_v10, %v2295_v51  ;;  %v2164_v8 = vmul.f32 %v1433_v61, %v5431_v31  ;;  %v1829_v52 = vpop.f32.mrb[42].mxu1  ;;  %v1435_v25 = vpop.f32.mrb[27].mxu0 }
 0x1f2   : > { %v5934_v9 = vmul.f32 %v3014_v49, %v2716_v3  ;;  %v2434_v4 = vrot.slane %v2433_v19, 2  ;;  %v2296_v16 = vmul.f32 %v1829_v52, %v5471_v46  ;;  %v2165_v13 = vmul.f32 %v1435_v25, %v5434_v32  ;;  %v1831_v48 = vpop.f32.mrb[43].mxu1 }
 0x1f3   : > { %v5940_v24 = vmul.f32 %v3015_v36, %v2725_v55  ;;  %v2426_v21 = vadd.f32 %v2425_v11, %v2424_v45  ;;  %v2438_v53 = vadd.f32 %v2164_v8, %v2162_v43  ;;  %v2297_v17 = vmul.f32 %v1831_v48, %v5474_v41 }
 0x1f4   : > { %v2435_v30 = vadd.f32 %v2434_v4, %v2433_v19  ;;  %v2728_v10 = vadd.f32 %v2727_v57, %v2296_v16  ;;  %v2447_v0 = vadd.f32 %v2165_v13, %v2163_v40  ;;  %v1439_v49 = vpop.f32.mrb[28].mxu0  ;;  %v3013_v36 = vrot.slane %v5646_v20, 7 }
 0x1f5   : > { %v2427_v51 = vrot.slane %v2426_v21, 1  ;;  %v2737_v52 = vadd.f32 %v2736_v29, %v2297_v17  ;;  %v2166_v25 = vmul.f32 %v1439_v49, %v5451_v37  ;;  %v1835_v3 = vpop.f32.mrb[44].mxu1  ;;  %v1441_v61 = vpop.f32.mrb[29].mxu0 }
 0x1f6   : > { %v2436_v55 = vrot.slane %v2435_v30, 1  ;;  %v2729_v45 = vrot.slane %v2728_v10, 4  ;;  %v2298_v43 = vmul.f32 %v1835_v3, %v5417_v27  ;;  %v2167_v11 = vmul.f32 %v1441_v61, %v5460_v42  ;;  %v1837_v19 = vpop.f32.mrb[45].mxu1 }
 0x1f7   : > { %v2428_v57 = vadd.f32 %v2427_v51, %v2426_v21  ;;  %v2738_v40 = vrot.slane %v2737_v52, 4  ;;  %v2439_v8 = vadd.f32 %v2438_v53, %v2166_v25  ;;  %v2299_v4 = vmul.f32 %v1837_v19, %v5420_v28 }
 0x1f8   : > { %v2437_v16 = vadd.f32 %v2436_v55, %v2435_v30  ;;  %v2730_v29 = vadd.f32 %v2729_v45, %v2728_v10  ;;  %v2448_v13 = vadd.f32 %v2447_v0, %v2167_v11  ;;  %v1445_v48 = vpop.f32.mrb[30].mxu0  ;;  %v5950_v17 = vmul.f32 %v3013_v36, %v5802_v38 }
 0x1f9   : > { %v3108_v3 = vmul.f32 %v2986_v15, %v2428_v57  ;;  %v2739_v23 = vadd.f32 %v2738_v40, %v2737_v52  ;;  %v2168_v61 = vmul.f32 %v1445_v48, %v5471_v46  ;;  %v1841_v21 = vpop.f32.mrb[46].mxu1  ;;  %v1447_v51 = vpop.f32.mrb[31].mxu0 }
 0x1fa   : > { %v3109_v53 = vmul.f32 %v2987_v22, %v2437_v16  ;;  %v2731_v30 = vrot.slane %v2730_v29, 2  ;;  %v2300_v10 = vmul.f32 %v1841_v21, %v5431_v31  ;;  %v2169_v0 = vmul.f32 %v1447_v51, %v5474_v41  ;;  %v1843_v38 = vpop.f32.mrb[47].mxu1 }
 0x1fb   : > { %v3298_v25 = vrot.slane %v3108_v3, 7  ;;  %v2740_v36 = vrot.slane %v2739_v23, 2  ;;  %v2440_v55 = vadd.f32 %v2439_v8, %v2168_v61  ;;  %v2301_v45 = vmul.f32 %v1843_v38, %v5434_v32 }
 0x1fc   : > { %v3319_v15 = vrot.slane %v3109_v53, 7  ;;  %v2732_v52 = vadd.f32 %v2731_v30, %v2730_v29  ;;  %v2744_v11 = vadd.f32 %v2300_v10, %v2298_v43  ;;  %v2449_v19 = vadd.f32 %v2448_v13, %v2169_v0  ;;  %v1451_v57 = vpop.f32.mrb[32].mxu0 }
 0x1fd   : > { %v5963_v40 = vsel %vm3299_vm1, %v3298_v25, %v5907_v7  ;;  %v2741_v22 = vadd.f32 %v2740_v36, %v2739_v23  ;;  %v2441_v16 = vrot.slane %v2440_v55, 4  ;;  %v2753_v48 = vadd.f32 %v2301_v45, %v2299_v4  ;;  %v1847_v21 = vpop.f32.mrb[48].mxu1  ;;  %v1453_v51 = vpop.f32.mrb[33].mxu0 }
 0x1fe   : > { %v2733_v39 = vrot.slane %v2732_v52, 1  ;;  %v2450_v3 = vrot.slane %v2449_v19, 4  ;;  %v2170_v8 = vmul.f32 %v1451_v57, %v5417_v27  ;;  %v2302_v61 = vmul.f32 %v1847_v21, %v5451_v37  ;;  %v1849_v53 = vpop.f32.mrb[49].mxu1 }
 0x1ff   : > { %v2742_v29 = vrot.slane %v2741_v22, 1  ;;  %v2442_v43 = vadd.f32 %v2441_v16, %v2440_v55  ;;  %v2171_v13 = vmul.f32 %v1453_v51, %v5420_v28  ;;  %v2303_v30 = vmul.f32 %v1849_v53, %v5460_v42 }
 0x200   : > { %v2734_v7 = vadd.f32 %v2733_v39, %v2732_v52  ;;  %v2451_v10 = vadd.f32 %v2450_v3, %v2449_v19  ;;  %v2745_v23 = vadd.f32 %v2744_v11, %v2302_v61  ;;  %v1457_v0 = vpop.f32.mrb[34].mxu0  ;;  %v5971_v4 = vsel %vm3299_vm1, %v3319_v15, %v5912_v58 }
 0x201   : > { %v2743_v38 = vadd.f32 %v2742_v29, %v2741_v22  ;;  %v2443_v25 = vrot.slane %v2442_v43, 2  ;;  %v2754_v36 = vadd.f32 %v2753_v48, %v2303_v30  ;;  %v2172_v45 = vmul.f32 %v1457_v0, %v5431_v31  ;;  %v1853_v57 = vpop.f32.mrb[50].mxu1  ;;  %v1459_v21 = vpop.f32.mrb[35].mxu0 }
 0x202   : > { %v5976_v55 = vmul.f32 %v3016_v2, %v2734_v7  ;;  %v2452_v16 = vrot.slane %v2451_v10, 2  ;;  %v2304_v39 = vmul.f32 %v1853_v57, %v5471_v46  ;;  %v2173_v52 = vmul.f32 %v1459_v21, %v5434_v32  ;;  %v1855_v11 = vpop.f32.mrb[51].mxu1 }
 0x203   : > { %v5982_v58 = vmul.f32 %v3017_v34, %v2743_v38  ;;  %v2444_v15 = vadd.f32 %v2443_v25, %v2442_v43  ;;  %v2456_v19 = vadd.f32 %v2172_v45, %v2170_v8  ;;  %v2305_v22 = vmul.f32 %v1855_v11, %v5474_v41 }
 0x204   : > { %v2453_v51 = vadd.f32 %v2452_v16, %v2451_v10  ;;  %v2746_v2 = vadd.f32 %v2745_v23, %v2304_v39  ;;  %v2465_v3 = vadd.f32 %v2173_v52, %v2171_v13  ;;  %v1463_v61 = vpop.f32.mrb[36].mxu0  ;;  %v3012_v34 = vrot.slane %v5639_v12, 7 }
 0x205   : > { %v2445_v53 = vrot.slane %v2444_v15, 1  ;;  %v2755_v29 = vadd.f32 %v2754_v36, %v2305_v22  ;;  %v2174_v30 = vmul.f32 %v1463_v61, %v5451_v37  ;;  %v1859_v7 = vpop.f32.mrb[52].mxu1  ;;  %v1465_v0 = vpop.f32.mrb[37].mxu0  ;;  %v6619_v11 = vrot.slane %v5609_v54, 2 }
 0x206   : > { %v2454_v38 = vrot.slane %v2453_v51, 1  ;;  %v2747_v43 = vrot.slane %v2746_v2, 4  ;;  %v2306_v8 = vmul.f32 %v1859_v7, %v5417_v27  ;;  %v2175_v25 = vmul.f32 %v1465_v0, %v5460_v42  ;;  %v1861_v45 = vpop.f32.mrb[53].mxu1 }
 0x207   : > { %v2446_v57 = vadd.f32 %v2445_v53, %v2444_v15  ;;  %v2756_v10 = vrot.slane %v2755_v29, 4  ;;  %v2457_v23 = vadd.f32 %v2456_v19, %v2174_v30  ;;  %v2307_v13 = vmul.f32 %v1861_v45, %v5420_v28 }
 0x208   : > { %v2455_v21 = vadd.f32 %v2454_v38, %v2453_v51  ;;  %v2748_v16 = vadd.f32 %v2747_v43, %v2746_v2  ;;  %v2466_v39 = vadd.f32 %v2465_v3, %v2175_v25  ;;  %v1469_v52 = vpop.f32.mrb[38].mxu0  ;;  %v5996_v15 = vmul.f32 %v3012_v34, %v5788_v44 }
 0x209   : > { %v3110_v22 = vmul.f32 %v6619_v11, %v2446_v57  ;;  %v2757_v61 = vadd.f32 %v2756_v10, %v2755_v29  ;;  %v2176_v7 = vmul.f32 %v1469_v52, %v5471_v46  ;;  %v1865_v5 = vpop.f32.mrb[54].mxu1  ;;  %v1471_v0 = vpop.f32.mrb[39].mxu0  ;;  %v6620_v19 = vrot.slane %v5614_v59, 2 }
 0x20a   : > { %v2749_v30 = vrot.slane %v2748_v16, 2  ;;  %v2308_v51 = vmul.f32 %v1865_v5, %v5431_v31  ;;  %v2177_v2 = vmul.f32 %v1471_v0, %v5474_v41  ;;  %v1867_v3 = vpop.f32.mrb[55].mxu1 }
 0x20b   : > { %v3111_v53 = vmul.f32 %v6620_v19, %v2455_v21  ;;  %v3301_v38 = vrot.slane %v3110_v22, 6  ;;  %v2758_v43 = vrot.slane %v2757_v61, 2  ;;  %v2458_v25 = vadd.f32 %v2457_v23, %v2176_v7 }
 0x20c   : > { %v2309_v29 = vmul.f32 %v1867_v3, %v5434_v32  ;;  %v2750_v57 = vadd.f32 %v2749_v30, %v2748_v16  ;;  %v2762_v10 = vadd.f32 %v2308_v51, %v2306_v8  ;;  %v2467_v52 = vadd.f32 %v2466_v39, %v2177_v2  ;;  %v1475_v44 = vpop.f32.mrb[40].mxu0 }
 0x20d   : > { %v3321_v45 = vrot.slane %v3111_v53, 6  ;;  %v6005_v34 = vsel %vm3302_vm2, %v3301_v38, %v5963_v40  ;;  %v2759_v21 = vadd.f32 %v2758_v43, %v2757_v61  ;;  %v2459_v11 = vrot.slane %v2458_v25, 4  ;;  %v1871_v19 = vpop.f32.mrb[56].mxu1  ;;  %v1477_v0 = vpop.f32.mrb[41].mxu0 }
 0x20e   : > { %v2771_v5 = vadd.f32 %v2309_v29, %v2307_v13  ;;  %v2751_v36 = vrot.slane %v2750_v57, 1  ;;  %v2468_v22 = vrot.slane %v2467_v52, 4  ;;  %v2178_v23 = vmul.f32 %v1475_v44, %v5417_v27  ;;  %v1873_v53 = vpop.f32.mrb[57].mxu1 }
 0x20f   : > { %v2310_v7 = vmul.f32 %v1871_v19, %v5451_v37  ;;  %v2760_v16 = vrot.slane %v2759_v21, 1  ;;  %v2460_v8 = vadd.f32 %v2459_v11, %v2458_v25  ;;  %v2179_v39 = vmul.f32 %v1477_v0, %v5420_v28 }
 0x210   : > { %v2311_v30 = vmul.f32 %v1873_v53, %v5460_v42  ;;  %v2752_v40 = vadd.f32 %v2751_v36, %v2750_v57  ;;  %v2469_v51 = vadd.f32 %v2468_v22, %v2467_v52  ;;  %v1481_v2 = vpop.f32.mrb[42].mxu0  ;;  %v6013_v13 = vsel %vm3302_vm2, %v3321_v45, %v5971_v4 }
 0x211   : > { %v2763_v61 = vadd.f32 %v2762_v10, %v2310_v7  ;;  %v2761_v3 = vadd.f32 %v2760_v16, %v2759_v21  ;;  %v2461_v38 = vrot.slane %v2460_v8, 2  ;;  %v2180_v29 = vmul.f32 %v1481_v2, %v5431_v31  ;;  %v1877_v44 = vpop.f32.mrb[58].mxu1  ;;  %v1483_v19 = vpop.f32.mrb[43].mxu0 }
 0x212   : > { %v2772_v43 = vadd.f32 %v2771_v5, %v2311_v30  ;;  %v6621_v25 = vrot.slane %v5676_v50, 3  ;;  %v2470_v0 = vrot.slane %v2469_v51, 2  ;;  %v2312_v36 = vmul.f32 %v1877_v44, %v5471_v46  ;;  %v1879_v10 = vpop.f32.mrb[59].mxu1 }
 0x213   : > { %v2181_v57 = vmul.f32 %v1483_v19, %v5434_v32  ;;  %v6622_v4 = vrot.slane %v5683_v62, 3  ;;  %v2462_v52 = vadd.f32 %v2461_v38, %v2460_v8  ;;  %v2474_v21 = vadd.f32 %v2180_v29, %v2178_v23 }
 0x214   : > { %v6018_v11 = vmul.f32 %v6621_v25, %v2752_v40  ;;  %v2313_v5 = vmul.f32 %v1879_v10, %v5474_v41  ;;  %v2471_v7 = vadd.f32 %v2470_v0, %v2469_v51  ;;  %v2764_v53 = vadd.f32 %v2763_v61, %v2312_v36  ;;  %v1487_v30 = vpop.f32.mrb[44].mxu0 }
 0x215   : > { %v6024_v45 = vmul.f32 %v6622_v4, %v2761_v3  ;;  %v2483_v16 = vadd.f32 %v2181_v57, %v2179_v39  ;;  %v2463_v2 = vrot.slane %v2462_v52, 1  ;;  %v2182_v19 = vmul.f32 %v1487_v30, %v5451_v37  ;;  %v1883_v25 = vpop.f32.mrb[60].mxu1  ;;  %v1489_v49 = vpop.f32.mrb[45].mxu0 }
 0x216   : > { %v2773_v44 = vadd.f32 %v2772_v43, %v2313_v5  ;;  %v2472_v3 = vrot.slane %v2471_v7, 1  ;;  %v2765_v4 = vrot.slane %v2764_v53, 4  ;;  %v2314_v23 = vmul.f32 %v1883_v25, %v5417_v27  ;;  %v1885_v38 = vpop.f32.mrb[61].mxu1 }
 0x217   : > { %v2183_v8 = vmul.f32 %v1489_v49, %v5460_v42  ;;  %v2464_v51 = vadd.f32 %v2463_v2, %v2462_v52  ;;  %v2475_v39 = vadd.f32 %v2474_v21, %v2182_v19  ;;  %v2315_v29 = vmul.f32 %v1885_v38, %v5420_v28 }
 0x218   : > { %v2774_v61 = vrot.slane %v2773_v44, 4  ;;  %v2473_v43 = vadd.f32 %v2472_v3, %v2471_v7  ;;  %v2766_v36 = vadd.f32 %v2765_v4, %v2764_v53  ;;  %v1493_v10 = vpop.f32.mrb[46].mxu0  ;;  %v6623_v5 = vrot.slane %v5609_v54, 3 }
 0x219   : > { %v2484_v57 = vadd.f32 %v2483_v16, %v2183_v8  ;;  %v2184_v25 = vmul.f32 %v1493_v10, %v5471_v46  ;;  %v1889_v49 = vpop.f32.mrb[62].mxu1  ;;  %v1495_v22 = vpop.f32.mrb[47].mxu0  ;;  %v6624_v21 = vrot.slane %v5614_v59, 3 }
 0x21a   : > { %v3112_v30 = vmul.f32 %v6623_v5, %v2464_v51  ;;  %v2775_v40 = vadd.f32 %v2774_v61, %v2773_v44  ;;  %v2767_v19 = vrot.slane %v2766_v36, 2  ;;  %v2316_v38 = vmul.f32 %v1889_v49, %v5431_v31  ;;  %v1891_v53 = vpop.f32.mrb[63].mxu1 }
 0x21b   : > { %v3113_v2 = vmul.f32 %v6624_v21, %v2473_v43  ;;  %v2185_v7 = vmul.f32 %v1495_v22, %v5474_v41  ;;  %v2476_v4 = vadd.f32 %v2475_v39, %v2184_v25  ;;  %v2317_v44 = vmul.f32 %v1891_v53, %v5434_v32 }
 0x21c   : > { %v3304_v16 = vrot.slane %v3112_v30, 5  ;;  %v2776_v3 = vrot.slane %v2775_v40, 2  ;;  %v2768_v51 = vadd.f32 %v2767_v19, %v2766_v36  ;;  %v2780_v61 = vadd.f32 %v2316_v38, %v2314_v23  ;;  %v1499_v5 = vpop.f32.mrb[48].mxu0 }
 0x21d   : > { %v3323_v8 = vrot.slane %v3113_v2, 5  ;;  %v2485_v10 = vadd.f32 %v2484_v57, %v2185_v7  ;;  %v2477_v0 = vrot.slane %v2476_v4, 4  ;;  %v2789_v48 = vadd.f32 %v2317_v44, %v2315_v29  ;;  %v1895_v21 = vpop.f32.mrb[64].mxu1  ;;  %v1501_v49 = vpop.f32.mrb[49].mxu0 }
 0x21e   : > { %v2777_v52 = vadd.f32 %v2776_v3, %v2775_v40  ;;  %v2186_v43 = vmul.f32 %v1499_v5, %v5417_v27  ;;  %v2769_v63 = vrot.slane %v2768_v51, 1  ;;  %v2318_v30 = vmul.f32 %v1895_v21, %v5451_v37  ;;  %v1897_v25 = vpop.f32.mrb[65].mxu1 }
 0x21f   : > { %v2486_v22 = vrot.slane %v2485_v10, 4  ;;  %v2187_v39 = vmul.f32 %v1501_v49, %v5420_v28  ;;  %v2478_v2 = vadd.f32 %v2477_v0, %v2476_v4  ;;  %v2319_v23 = vmul.f32 %v1897_v25, %v5460_v42 }
 0x220   : > { %v2778_v53 = vrot.slane %v2777_v52, 1  ;;  %v6049_v40 = vsel %vm3305_vm3, %v3323_v8, %v6013_v13  ;;  %v2770_v29 = vadd.f32 %v2769_v63, %v2768_v51  ;;  %v2781_v57 = vadd.f32 %v2780_v61, %v2318_v30  ;;  %v1505_v19 = vpop.f32.mrb[50].mxu0 }
 0x221   : > { %v2487_v36 = vadd.f32 %v2486_v22, %v2485_v10  ;;  %v6053_v38 = vsel %vm3305_vm3, %v3304_v16, %v6005_v34  ;;  %v2479_v3 = vrot.slane %v2478_v2, 2  ;;  %v2790_v44 = vadd.f32 %v2789_v48, %v2319_v23  ;;  %v1901_v0 = vpop.f32.mrb[66].mxu1  ;;  %v1507_v4 = vpop.f32.mrb[51].mxu0 }
 0x222   : > { %v2779_v7 = vadd.f32 %v2778_v53, %v2777_v52  ;;  %v2188_v5 = vmul.f32 %v1505_v19, %v5431_v31  ;;  %v6625_v21 = vrot.slane %v5676_v50, 4  ;;  %v2320_v63 = vmul.f32 %v1901_v0, %v5471_v46  ;;  %v1903_v51 = vpop.f32.mrb[67].mxu1 }
 0x223   : > { %v2488_v13 = vrot.slane %v2487_v36, 2  ;;  %v2189_v8 = vmul.f32 %v1507_v4, %v5434_v32  ;;  %v6626_v34 = vrot.slane %v5683_v62, 4  ;;  %v2480_v52 = vadd.f32 %v2479_v3, %v2478_v2 }
 0x224   : > { %v6058_v49 = vmul.f32 %v6625_v21, %v2770_v29  ;;  %v2492_v48 = vadd.f32 %v2188_v5, %v2186_v43  ;;  %v2321_v61 = vmul.f32 %v1903_v51, %v5474_v41  ;;  %v2782_v30 = vadd.f32 %v2781_v57, %v2320_v63  ;;  %v1511_v53 = vpop.f32.mrb[52].mxu0 }
 0x225   : > { %v6064_v16 = vmul.f32 %v6626_v34, %v2779_v7  ;;  %v2489_v22 = vadd.f32 %v2488_v13, %v2487_v36  ;;  %v2501_v25 = vadd.f32 %v2189_v8, %v2187_v39  ;;  %v2481_v29 = vrot.slane %v2480_v52, 1  ;;  %v1907_v4 = vpop.f32.mrb[68].mxu1  ;;  %v1513_v21 = vpop.f32.mrb[53].mxu0 }
 0x226   : > { %v2791_v19 = vadd.f32 %v2790_v44, %v2321_v61  ;;  %v2190_v0 = vmul.f32 %v1511_v53, %v5451_v37  ;;  %v2783_v34 = vrot.slane %v2782_v30, 4  ;;  %v2322_v43 = vmul.f32 %v1907_v4, %v5417_v27  ;;  %v1909_v3 = vpop.f32.mrb[69].mxu1 }
 0x227   : > { %v2490_v7 = vrot.slane %v2489_v22, 1  ;;  %v2191_v2 = vmul.f32 %v1513_v21, %v5460_v42  ;;  %v2482_v36 = vadd.f32 %v2481_v29, %v2480_v52  ;;  %v2323_v5 = vmul.f32 %v1909_v3, %v5420_v28 }
 0x228   : > { %v2792_v57 = vrot.slane %v2791_v19, 4  ;;  %v2493_v39 = vadd.f32 %v2492_v48, %v2190_v0  ;;  %v2784_v63 = vadd.f32 %v2783_v34, %v2782_v30  ;;  %v1517_v8 = vpop.f32.mrb[54].mxu0  ;;  %v6627_v61 = vrot.slane %v5609_v54, 4 }
 0x229   : > { %v2491_v13 = vadd.f32 %v2490_v7, %v2489_v22  ;;  %v2502_v44 = vadd.f32 %v2501_v25, %v2191_v2  ;;  %v2192_v4 = vmul.f32 %v1517_v8, %v5471_v46  ;;  %v1913_v21 = vpop.f32.mrb[70].mxu1  ;;  %v1519_v23 = vpop.f32.mrb[55].mxu0  ;;  %v6628_v52 = vrot.slane %v5940_v24, 7 }
 0x22a   : > { %v3114_v53 = vmul.f32 %v6627_v61, %v2482_v36  ;;  %v2793_v10 = vadd.f32 %v2792_v57, %v2791_v19  ;;  %v6629_v22 = vrot.slane %v5614_v59, 4  ;;  %v2785_v25 = vrot.slane %v2784_v63, 2  ;;  %v1915_v7 = vpop.f32.mrb[71].mxu1 }
 0x22b   : > { %v3376_v48 = vsel %vm3299_vm1, %v6628_v52, %v5887_v35  ;;  %v2324_v29 = vmul.f32 %v1913_v21, %v5431_v31  ;;  %v2193_v0 = vmul.f32 %v1519_v23, %v5474_v41  ;;  %v2494_v2 = vadd.f32 %v2493_v39, %v2192_v4 }
 0x22c   : > { %v3115_v30 = vmul.f32 %v6629_v22, %v2491_v13  ;;  %v3307_v34 = vrot.slane %v3114_v53, 4  ;;  %v2794_v19 = vrot.slane %v2793_v10, 2  ;;  %v2325_v3 = vmul.f32 %v1915_v7, %v5434_v32  ;;  %v1523_v61 = vpop.f32.mrb[56].mxu0 }
 0x22d   : > { %v2786_v57 = vadd.f32 %v2785_v25, %v2784_v63  ;;  %v2798_v8 = vadd.f32 %v2324_v29, %v2322_v43  ;;  %v2503_v24 = vadd.f32 %v2502_v44, %v2193_v0  ;;  %v2495_v52 = vrot.slane %v2494_v2, 4  ;;  %v1919_v22 = vpop.f32.mrb[72].mxu1  ;;  %v1525_v21 = vpop.f32.mrb[57].mxu0 }
 0x22e   : > { %v3325_v36 = vrot.slane %v3115_v30, 4  ;;  %v2795_v35 = vadd.f32 %v2794_v19, %v2793_v10  ;;  %v2807_v51 = vadd.f32 %v2325_v3, %v2323_v5  ;;  %v2194_v13 = vmul.f32 %v1523_v61, %v5417_v27  ;;  %v1921_v4 = vpop.f32.mrb[73].mxu1 }
 0x22f   : > { %v2787_v18 = vrot.slane %v2786_v57, 1  ;;  %v2504_v23 = vrot.slane %v2503_v24, 4  ;;  %v2326_v53 = vmul.f32 %v1919_v22, %v5451_v37  ;;  %v2195_v39 = vmul.f32 %v1525_v21, %v5420_v28 }
 0x230   : > { %v2796_v7 = vrot.slane %v2795_v35, 1  ;;  %v2496_v30 = vadd.f32 %v2495_v52, %v2494_v2  ;;  %v2327_v43 = vmul.f32 %v1921_v4, %v5460_v42  ;;  %v6092_v10 = vsel %vm3308_vm4, %v3325_v36, %v6049_v40  ;;  %v1529_v25 = vpop.f32.mrb[58].mxu0 }
 0x231   : > { %v2788_v5 = vadd.f32 %v2787_v18, %v2786_v57  ;;  %v2505_v63 = vadd.f32 %v2504_v23, %v2503_v24  ;;  %v2799_v44 = vadd.f32 %v2798_v8, %v2326_v53  ;;  %v6096_v29 = vsel %vm3308_vm4, %v3307_v34, %v6053_v38  ;;  %v1925_v2 = vpop.f32.mrb[74].mxu1  ;;  %v1531_v52 = vpop.f32.mrb[59].mxu0 }
 0x232   : > { %v2797_v0 = vadd.f32 %v2796_v7, %v2795_v35  ;;  %v2497_v19 = vrot.slane %v2496_v30, 2  ;;  %v2808_v3 = vadd.f32 %v2807_v51, %v2327_v43  ;;  %v2196_v61 = vmul.f32 %v1529_v25, %v5431_v31  ;;  %v1927_v57 = vpop.f32.mrb[75].mxu1 }
 0x233   : > { %v6630_v22 = vrot.slane %v5676_v50, 5  ;;  %v2506_v40 = vrot.slane %v2505_v63, 2  ;;  %v2328_v18 = vmul.f32 %v1925_v2, %v5471_v46  ;;  %v2197_v36 = vmul.f32 %v1531_v52, %v5434_v32 }
 0x234   : > { %v6631_v38 = vrot.slane %v5683_v62, 5  ;;  %v2498_v8 = vadd.f32 %v2497_v19, %v2496_v30  ;;  %v2510_v51 = vadd.f32 %v2196_v61, %v2194_v13  ;;  %v2329_v24 = vmul.f32 %v1927_v57, %v5474_v41  ;;  %v1535_v4 = vpop.f32.mrb[60].mxu0 }
 0x235   : > { %v6101_v21 = vmul.f32 %v6630_v22, %v2788_v5  ;;  %v2507_v35 = vadd.f32 %v2506_v40, %v2505_v63  ;;  %v2800_v23 = vadd.f32 %v2799_v44, %v2328_v18  ;;  %v2519_v53 = vadd.f32 %v2197_v36, %v2195_v39  ;;  %v1931_v52 = vpop.f32.mrb[76].mxu1  ;;  %v1537_v22 = vpop.f32.mrb[61].mxu0 }
 0x236   : > { %v6107_v34 = vmul.f32 %v6631_v38, %v2797_v0  ;;  %v6632_v7 = vrot.slane %v5982_v58, 6  ;;  %v2499_v5 = vrot.slane %v2498_v8, 1  ;;  %v2809_v25 = vadd.f32 %v2808_v3, %v2329_v24  ;;  %v1933_v44 = vpop.f32.mrb[77].mxu1 }
 0x237   : > { %v2198_v2 = vmul.f32 %v1535_v4, %v5451_v37  ;;  %v6633_v0 = vrot.slane %v6024_v45, 5  ;;  %v2508_v30 = vrot.slane %v2507_v35, 1  ;;  %v2801_v19 = vrot.slane %v2800_v23, 4 }
 0x238   : > { %v3378_v43 = vsel %vm3302_vm2, %v6632_v7, %v3376_v48  ;;  %v2330_v63 = vmul.f32 %v1931_v52, %v5417_v27  ;;  %v2199_v39 = vmul.f32 %v1537_v22, %v5460_v42  ;;  %v2500_v58 = vadd.f32 %v2499_v5, %v2498_v8  ;;  %v1541_v57 = vpop.f32.mrb[62].mxu0 }
 0x239   : > { %v3380_v13 = vsel %vm3305_vm3, %v6633_v0, %v3378_v43  ;;  %v2810_v48 = vrot.slane %v2809_v25, 4  ;;  %v2511_v61 = vadd.f32 %v2510_v51, %v2198_v2  ;;  %v2331_v3 = vmul.f32 %v1933_v44, %v5420_v28  ;;  %v1937_v52 = vpop.f32.mrb[78].mxu1  ;;  %v1543_v8 = vpop.f32.mrb[63].mxu0 }
 0x23a   : > { %v2509_v40 = vadd.f32 %v2508_v30, %v2507_v35  ;;  %v2802_v18 = vadd.f32 %v2801_v19, %v2800_v23  ;;  %v2520_v36 = vadd.f32 %v2519_v53, %v2199_v39  ;;  %v6634_v45 = vrot.slane %v6064_v16, 4  ;;  %v1939_v2 = vpop.f32.mrb[79].mxu1 }
 0x23b   : > { %v6635_v24 = vrot.slane %v5609_v54, 5  ;;  %v2811_v7 = vadd.f32 %v2810_v48, %v2809_v25  ;;  %v2200_v43 = vmul.f32 %v1541_v57, %v5471_v46  ;;  %v3383_v51 = vrot.slane %v6107_v34, 3 }
 0x23c   : > { %v3382_v38 = vsel %vm3308_vm4, %v6634_v45, %v3380_v13  ;;  %v6636_v5 = vrot.slane %v5614_v59, 5  ;;  %v2803_v23 = vrot.slane %v2802_v18, 2  ;;  %v2332_v53 = vmul.f32 %v1937_v52, %v5431_v31  ;;  %v1547_v44 = vpop.f32.mrb[64].mxu0 }
 0x23d   : > { %v3116_v4 = vmul.f32 %v6635_v24, %v2500_v58  ;;  %v2201_v16 = vmul.f32 %v1543_v8, %v5474_v41  ;;  %v2812_v0 = vrot.slane %v2811_v7, 2  ;;  %v2512_v13 = vadd.f32 %v2511_v61, %v2200_v43  ;;  %v1943_v45 = vpop.f32.mrb[80].mxu1  ;;  %v1549_v24 = vpop.f32.mrb[65].mxu0 }
 0x23e   : > { %v3117_v35 = vmul.f32 %v6636_v5, %v2509_v40  ;;  %v2333_v25 = vmul.f32 %v1939_v2, %v5434_v32  ;;  %v2804_v30 = vadd.f32 %v2803_v23, %v2802_v18  ;;  %v2816_v19 = vadd.f32 %v2332_v53, %v2330_v63  ;;  %v1945_v43 = vpop.f32.mrb[81].mxu1 }
 0x23f   : > { %v3310_v22 = vrot.slane %v3116_v4, 3  ;;  %v2521_v39 = vadd.f32 %v2520_v36, %v2201_v16  ;;  %v2813_v34 = vadd.f32 %v2812_v0, %v2811_v7  ;;  %v2513_v48 = vrot.slane %v2512_v13, 4 }
 0x240   : > { %v3327_v58 = vrot.slane %v3117_v35, 3  ;;  %v2825_v57 = vadd.f32 %v2333_v25, %v2331_v3  ;;  %v2202_v40 = vmul.f32 %v1547_v44, %v5417_v27  ;;  %v2805_v52 = vrot.slane %v2804_v30, 1  ;;  %v1553_v23 = vpop.f32.mrb[66].mxu0 }
 0x241   : > { %v2522_v8 = vrot.slane %v2521_v39, 4  ;;  %v2334_v4 = vmul.f32 %v1943_v45, %v5451_v37  ;;  %v2203_v61 = vmul.f32 %v1549_v24, %v5420_v28  ;;  %v2814_v18 = vrot.slane %v2813_v34, 1  ;;  %v1949_v25 = vpop.f32.mrb[82].mxu1  ;;  %v1555_v44 = vpop.f32.mrb[67].mxu0 }
 0x242   : > { %v2514_v63 = vadd.f32 %v2513_v48, %v2512_v13  ;;  %v2335_v36 = vmul.f32 %v1945_v43, %v5460_v42  ;;  %v6138_v7 = vsel %vm3311_vm5, %v3327_v58, %v6092_v10  ;;  %v6140_v3 = vadd.f32 %v2805_v52, %v2804_v30  ;;  %v1951_v58 = vpop.f32.mrb[83].mxu1 }
 0x243   : > { %v2523_v5 = vadd.f32 %v2522_v8, %v2521_v39  ;;  %v2817_v35 = vadd.f32 %v2816_v19, %v2334_v4  ;;  %v6144_v53 = vsel %vm3311_vm5, %v3310_v22, %v6096_v29  ;;  %v2815_v16 = vadd.f32 %v2814_v18, %v2813_v34 }
 0x244   : > { %v2515_v2 = vrot.slane %v2514_v63, 2  ;;  %v2826_v0 = vadd.f32 %v2825_v57, %v2335_v36  ;;  %v2204_v13 = vmul.f32 %v1553_v23, %v5431_v31  ;;  %v2336_v10 = vmul.f32 %v1949_v25, %v5471_v46  ;;  %v1559_v8 = vpop.f32.mrb[68].mxu0 }
 0x245   : > { %v2524_v48 = vrot.slane %v2523_v5, 2  ;;  %v2205_v30 = vmul.f32 %v1555_v44, %v5434_v32  ;;  %v3384_v19 = vsel %vm3311_vm5, %v3383_v51, %v3382_v38  ;;  %v2337_v29 = vmul.f32 %v1951_v58, %v5474_v41  ;;  %v1955_v23 = vpop.f32.mrb[84].mxu1  ;;  %v1561_v25 = vpop.f32.mrb[69].mxu0 }
 0x246   : > { %v2516_v39 = vadd.f32 %v2515_v2, %v2514_v63  ;;  %v2528_v45 = vadd.f32 %v2204_v13, %v2202_v40  ;;  %v6637_v22 = vrot.slane %v5683_v62, 6  ;;  %v2818_v24 = vadd.f32 %v2817_v35, %v2336_v10 }
 0x247   : > { %v2525_v57 = vadd.f32 %v2524_v48, %v2523_v5  ;;  %v2537_v52 = vadd.f32 %v2205_v30, %v2203_v61  ;;  %v2827_v18 = vadd.f32 %v2826_v0, %v2337_v29  ;;  %v2206_v36 = vmul.f32 %v1559_v8, %v5451_v37 }
 0x248   : > { %v3151_v34 = vmul.f32 %v6637_v22, %v2815_v16  ;;  %v2517_v43 = vrot.slane %v2516_v39, 1  ;;  %v2819_v40 = vrot.slane %v2818_v24, 4  ;;  %v2338_v63 = vmul.f32 %v1955_v23, %v5417_v27  ;;  %v1957_v16 = vpop.f32.mrb[85].mxu1  ;;  %v1565_v10 = vpop.f32.mrb[70].mxu0 }
 0x249   : > { %v2526_v51 = vrot.slane %v2525_v57, 1  ;;  %v2207_v2 = vmul.f32 %v1561_v25, %v5460_v42  ;;  %v2828_v35 = vrot.slane %v2827_v18, 4  ;;  %v2529_v61 = vadd.f32 %v2528_v45, %v2206_v36  ;;  %v1961_v8 = vpop.f32.mrb[86].mxu1  ;;  %v1567_v23 = vpop.f32.mrb[71].mxu0 }
 0x24a   : > { %v3385_v38 = vrot.slane %v3151_v34, 2  ;;  %v2518_v5 = vadd.f32 %v2517_v43, %v2516_v39  ;;  %v2339_v13 = vmul.f32 %v1957_v16, %v5420_v28  ;;  %v2820_v48 = vadd.f32 %v2819_v40, %v2818_v24  ;;  %v1963_v24 = vpop.f32.mrb[87].mxu1 }
 0x24b   : > { %v2527_v44 = vadd.f32 %v2526_v51, %v2525_v57  ;;  %v2538_v0 = vadd.f32 %v2537_v52, %v2207_v2  ;;  %v6638_v58 = vrot.slane %v5609_v54, 6  ;;  %v2829_v22 = vadd.f32 %v2828_v35, %v2827_v18 }
 0x24c   : > { %v6159_v30 = vsel %vm3314_vm6, %v3385_v38, %v3384_v19  ;;  %v2208_v34 = vmul.f32 %v1565_v10, %v5471_v46  ;;  %v3026_v39 = vrot.slane %v5676_v50, 7  ;;  %v2821_v45 = vrot.slane %v2820_v48, 2  ;;  %v1571_v16 = vpop.f32.mrb[72].mxu0 }
 0x24d   : > { %v3118_v29 = vmul.f32 %v6638_v58, %v2518_v5  ;;  %v2340_v43 = vmul.f32 %v1961_v8, %v5431_v31  ;;  %v2209_v57 = vmul.f32 %v1567_v23, %v5474_v41  ;;  %v6639_v52 = vrot.slane %v5614_v59, 6  ;;  %v1967_v23 = vpop.f32.mrb[88].mxu1  ;;  %v1573_v4 = vpop.f32.mrb[73].mxu0 }
 0x24e   : > { %v2830_v25 = vrot.slane %v2829_v22, 2  ;;  %v2530_v38 = vadd.f32 %v2529_v61, %v2208_v34  ;;  %v2341_v18 = vmul.f32 %v1963_v24, %v5434_v32  ;;  %v2822_v51 = vadd.f32 %v2821_v45, %v2820_v48  ;;  %v1969_v34 = vpop.f32.mrb[89].mxu1 }
 0x24f   : > { %v3119_v19 = vmul.f32 %v6639_v52, %v2527_v44  ;;  %v3313_v36 = vrot.slane %v3118_v29, 2  ;;  %v2834_v40 = vadd.f32 %v2340_v43, %v2338_v63  ;;  %v2539_v2 = vadd.f32 %v2538_v0, %v2209_v57 }
 0x250   : > { %v2831_v35 = vadd.f32 %v2830_v25, %v2829_v22  ;;  %v2531_v10 = vrot.slane %v2530_v38, 4  ;;  %v2843_v58 = vadd.f32 %v2341_v18, %v2339_v13  ;;  %v2210_v8 = vmul.f32 %v1571_v16, %v5417_v27  ;;  %v1577_v57 = vpop.f32.mrb[74].mxu0 }
 0x251   : > { %v3329_v5 = vrot.slane %v3119_v19, 2  ;;  %v2823_v14 = vrot.slane %v2822_v51, 1  ;;  %v2540_v44 = vrot.slane %v2539_v2, 4  ;;  %v2342_v29 = vmul.f32 %v1967_v23, %v5451_v37  ;;  %v1579_v18 = vpop.f32.mrb[75].mxu0 }
 0x252   : > { %v2211_v61 = vmul.f32 %v1573_v4, %v5420_v28  ;;  %v2832_v48 = vrot.slane %v2831_v35, 1  ;;  %v2532_v63 = vadd.f32 %v2531_v10, %v2530_v38  ;;  %v2343_v0 = vmul.f32 %v1969_v34, %v5460_v42  ;;  %v1973_v38 = vpop.f32.mrb[90].mxu1 }
 0x253   : > { %v6176_v22 = vsel %vm3314_vm6, %v3329_v5, %v6138_v7  ;;  %v2824_v13 = vadd.f32 %v2823_v14, %v2822_v51  ;;  %v2541_v45 = vadd.f32 %v2540_v44, %v2539_v2  ;;  %v2835_v43 = vadd.f32 %v2834_v40, %v2342_v29  ;;  %v1975_v14 = vpop.f32.mrb[91].mxu1 }
 0x254   : > { %v6180_v24 = vsel %vm3314_vm6, %v3313_v36, %v6144_v53  ;;  %v2833_v52 = vadd.f32 %v2832_v48, %v2831_v35  ;;  %v2533_v19 = vrot.slane %v2532_v63, 2  ;;  %v2844_v4 = vadd.f32 %v2843_v58, %v2343_v0  ;;  %v1583_v29 = vpop.f32.mrb[76].mxu0 }
 0x255   : > { %v2212_v25 = vmul.f32 %v1577_v57, %v5431_v31  ;;  %v2542_v16 = vrot.slane %v2541_v45, 2  ;;  %v2344_v10 = vmul.f32 %v1973_v38, %v5471_v46  ;;  %v2213_v7 = vmul.f32 %v1579_v18, %v5434_v32 }
 0x256   : > { %v6640_v51 = vrot.slane %v5676_v50, 6  ;;  %v2534_v53 = vadd.f32 %v2533_v19, %v2532_v63  ;;  %v2345_v2 = vmul.f32 %v1975_v14, %v5474_v41  ;;  %v6641_v5 = vrot.slane %v5683_v62, 7  ;;  %v1979_v50 = vpop.f32.mrb[92].mxu1 }
 0x257   : > { %v2546_v36 = vadd.f32 %v2212_v25, %v2210_v8  ;;  %v2543_v58 = vadd.f32 %v2542_v16, %v2541_v45  ;;  %v2836_v23 = vadd.f32 %v2835_v43, %v2344_v10  ;;  %v2555_v44 = vadd.f32 %v2213_v7, %v2211_v61 }
 0x258   : > { %v6188_v40 = vmul.f32 %v6640_v51, %v6140_v3  ;;  %v3153_v35 = vmul.f32 %v6641_v5, %v2833_v52  ;;  %v6193_v34 = vmul.f32 %v3026_v39, %v2824_v13  ;;  %v2535_v48 = vrot.slane %v2534_v53, 1  ;;  %v1585_v3 = vpop.f32.mrb[77].mxu0  ;;  %v1981_v52 = vpop.f32.mrb[93].mxu1 }
 0x259   : > { %v2845_v0 = vadd.f32 %v2844_v4, %v2345_v2  ;;  %v2214_v57 = vmul.f32 %v1583_v29, %v5451_v37  ;;  %v2544_v63 = vrot.slane %v2543_v58, 1  ;;  %v2837_v8 = vrot.slane %v2836_v23, 4  ;;  %v1589_v18 = vpop.f32.mrb[78].mxu0  ;;  %v1985_v2 = vpop.f32.mrb[94].mxu1 }
 0x25a   : > { %v3387_v38 = vrot.slane %v3153_v35, 1  ;;  %v2346_v19 = vmul.f32 %v1979_v50, %v5417_v27  ;;  %v2215_v62 = vmul.f32 %v1585_v3, %v5460_v42  ;;  %v2536_v45 = vadd.f32 %v2535_v48, %v2534_v53  ;;  %v1591_v53 = vpop.f32.mrb[79].mxu0 }
 0x25b   : > { %v2846_v43 = vrot.slane %v2845_v0, 4  ;;  %v2547_v61 = vadd.f32 %v2546_v36, %v2214_v57  ;;  %v2347_v39 = vmul.f32 %v1981_v52, %v5420_v28  ;;  %v2545_v13 = vadd.f32 %v2544_v63, %v2543_v58 }
 0x25c   : > { %v2838_v25 = vadd.f32 %v2837_v8, %v2836_v23  ;;  %v2556_v4 = vadd.f32 %v2555_v44, %v2215_v62  ;;  %v6201_v16 = vsel %vm3317_vm7, %v3387_v38, %v6159_v30  ;;  %v6642_v10 = vrot.slane %v5609_v54, 7  ;;  %v1987_v30 = vpop.f32.mrb[95].mxu1 }
 0x25d   : > { %v2847_v14 = vadd.f32 %v2846_v43, %v2845_v0  ;;  %v2216_v51 = vmul.f32 %v1589_v18, %v5471_v46  ;;  %v6643_v36 = vrot.slane %v5934_v9, 7  ;;  %v2348_v58 = vmul.f32 %v1985_v2, %v5431_v31  ;;  %v1595_v9 = vpop.f32.mrb[80].mxu0 }
 0x25e   : > { %v3120_v7 = vmul.f32 %v6642_v10, %v2536_v45  ;;  %v2839_v35 = vrot.slane %v2838_v25, 2  ;;  %v2217_v23 = vmul.f32 %v1591_v53, %v5474_v41  ;;  %v6644_v44 = vrot.slane %v5614_v59, 7  ;;  %v1991_v45 = vpop.f32.mrb[96].mxu1  ;;  %v1597_v43 = vpop.f32.mrb[81].mxu0 }
 0x25f   : > { %v3362_v5 = vsel %vm3299_vm1, %v6643_v36, %v5881_v33  ;;  %v2848_v29 = vrot.slane %v2847_v14, 2  ;;  %v2548_v48 = vadd.f32 %v2547_v61, %v2216_v51  ;;  %v2349_v0 = vmul.f32 %v1987_v30, %v5434_v32  ;;  %v1993_v10 = vpop.f32.mrb[97].mxu1 }
 0x260   : > { %v3121_v54 = vmul.f32 %v6644_v44, %v2545_v13  ;;  %v3316_v57 = vrot.slane %v3120_v7, 1  ;;  %v2840_v50 = vadd.f32 %v2839_v35, %v2838_v25  ;;  %v2852_v3 = vadd.f32 %v2348_v58, %v2346_v19  ;;  %v1601_v2 = vpop.f32.mrb[82].mxu0 }
 0x261   : > { %v2557_v38 = vadd.f32 %v2556_v4, %v2217_v23  ;;  %v2849_v33 = vadd.f32 %v2848_v29, %v2847_v14  ;;  %v2549_v8 = vrot.slane %v2548_v48, 4  ;;  %v2861_v62 = vadd.f32 %v2349_v0, %v2347_v39  ;;  %v1997_v30 = vpop.f32.mrb[98].mxu1  ;;  %v1603_v44 = vpop.f32.mrb[83].mxu0 }
 0x262   : > { %v3331_v63 = vrot.slane %v3121_v54, 1  ;;  %v2218_v52 = vmul.f32 %v1595_v9, %v5417_v27  ;;  %v2841_v18 = vrot.slane %v2840_v50, 1  ;;  %v2350_v13 = vmul.f32 %v1991_v45, %v5451_v37  ;;  %v1999_v0 = vpop.f32.mrb[99].mxu1 }
 0x263   : > { %v2558_v59 = vrot.slane %v2557_v38, 4  ;;  %v2219_v61 = vmul.f32 %v1597_v43, %v5420_v28  ;;  %v2850_v7 = vrot.slane %v2849_v33, 1  ;;  %v2550_v25 = vadd.f32 %v2549_v8, %v2548_v48 }
 0x264   : > { %v2351_v19 = vmul.f32 %v1993_v10, %v5460_v42  ;;  %v3332_v4 = vsel %vm3317_vm7, %v3331_v63, %v6176_v22  ;;  %v2842_v14 = vadd.f32 %v2841_v18, %v2840_v50  ;;  %v2853_v51 = vadd.f32 %v2852_v3, %v2350_v13 }
 0x265   : > { %v2559_v39 = vadd.f32 %v2558_v59, %v2557_v38  ;;  %3489 = vmatprep.mubr.f32.mxu0 %v3332_v4  ;;  %v3318_v53 = vsel %vm3317_vm7, %v3316_v57, %v6180_v24  ;;  %v2851_v36 = vadd.f32 %v2850_v7, %v2849_v33  ;;  %v2551_v35 = vrot.slane %v2550_v25, 2  ;;  %v1607_v33 = vpop.f32.mrb[84].mxu0  ;;  %v2003_v59 = vpop.f32.mrb[100].mxu1 }
 0x266   : > { %v2862_v58 = vadd.f32 %v2861_v62, %v2351_v19  ;;  %v2220_v23 = vmul.f32 %v1601_v2, %v5431_v31  ;;  %3490 = vmatmul.mubr.f32.vlgmr.msra.gmra.mrb[124].mxu0 %v3318_v53  ;;  %v6225_v54 = vmul.f32 %v2842_v14, %v5704_v26  ;;  %v2352_v29 = vmul.f32 %v1997_v30, %v5471_v46  ;;  %v1609_v13 = vpop.f32.mrb[85].mxu0  ;;  %v2005_v4 = vpop.f32.mrb[101].mxu1 }
 0x267   : > { %v2560_v22 = vrot.slane %v2559_v39, 2  ;;  %v2221_v48 = vmul.f32 %v1603_v44, %v5434_v32  ;;  %v6230_v50 = vmul.f32 %v2851_v36, %v5719_v47  ;;  %v2552_v24 = vadd.f32 %v2551_v35, %v2550_v25 }
 0x268   : > { %v2564_v57 = vadd.f32 %v2220_v23, %v2218_v52  ;;  %v2353_v3 = vmul.f32 %v1999_v0, %v5474_v41  ;;  %v2854_v9 = vadd.f32 %v2853_v51, %v2352_v29  ;;  %v6645_v8 = vrot.slane %v5976_v55, 6  ;;  %v1613_v36 = vpop.f32.mrb[86].mxu0 }
 0x269   : > { %v2561_v38 = vadd.f32 %v2560_v22, %v2559_v39  ;;  %v2573_v63 = vadd.f32 %v2221_v48, %v2219_v61  ;;  %v2553_v45 = vrot.slane %v2552_v24, 1  ;;  %v2222_v18 = vmul.f32 %v1607_v33, %v5451_v37  ;;  %v2009_v44 = vpop.f32.mrb[102].mxu1  ;;  %v1615_v22 = vpop.f32.mrb[87].mxu0 }
 0x26a   : > { %v3364_v62 = vsel %vm3302_vm2, %v6645_v8, %v3362_v5  ;;  %v2863_v43 = vadd.f32 %v2862_v58, %v2353_v3  ;;  %v6646_v10 = vrot.slane %v6018_v11, 5  ;;  %v2855_v25 = vrot.slane %v2854_v9, 4 }
 0x26b   : > { %v2562_v7 = vrot.slane %v2561_v38, 1  ;;  %v2354_v19 = vmul.f32 %v2003_v59, %v5417_v27  ;;  %v2223_v61 = vmul.f32 %v1609_v13, %v5460_v42  ;;  %v2554_v55 = vadd.f32 %v2553_v45, %v2552_v24 }
 0x26c   : > { %v3366_v52 = vsel %vm3305_vm3, %v6646_v10, %v3364_v62  ;;  %v2864_v14 = vrot.slane %v2863_v43, 4  ;;  %v2565_v5 = vadd.f32 %v2564_v57, %v2222_v18  ;;  %v2355_v39 = vmul.f32 %v2005_v4, %v5420_v28  ;;  %v2011_v57 = vpop.f32.mrb[103].mxu1  ;;  %v1619_v45 = vpop.f32.mrb[88].mxu0 }
 0x26d   : > { %v2563_v51 = vadd.f32 %v2562_v7, %v2561_v38  ;;  %v2856_v2 = vadd.f32 %v2855_v25, %v2854_v9  ;;  %v2574_v53 = vadd.f32 %v2573_v63, %v2223_v61  ;;  %v6647_v11 = vrot.slane %v6058_v49, 4  ;;  %v2015_v10 = vpop.f32.mrb[104].mxu1 }
 0x26e   : > { %v6247_v58 = vmul.f32 %v2554_v55, %v5639_v12  ;;  %v2865_v23 = vadd.f32 %v2864_v14, %v2863_v43  ;;  %v2224_v30 = vmul.f32 %v1613_v36, %v5471_v46  ;;  %v3369_v29 = vrot.slane %v6101_v21, 3  ;;  %v2017_v55 = vpop.f32.mrb[105].mxu1 }
 0x26f   : > { %v3368_v35 = vsel %vm3308_vm4, %v6647_v11, %v3366_v52  ;;  %v6252_v48 = vmul.f32 %v2563_v51, %v5646_v20  ;;  %v2857_v0 = vrot.slane %v2856_v2, 2  ;;  %v2356_v24 = vmul.f32 %v2009_v44, %v5431_v31  ;;  %v1621_v52 = vpop.f32.mrb[89].mxu0 }
 0x270   : > { %v2225_v49 = vmul.f32 %v1615_v22, %v5474_v41  ;;  %v2866_v3 = vrot.slane %v2865_v23, 2  ;;  %v2566_v38 = vadd.f32 %v2565_v5, %v2224_v30  ;;  %v2357_v9 = vmul.f32 %v2011_v57, %v5434_v32 }
 0x271   : > { %v3370_v63 = vsel %vm3311_vm5, %v3369_v29, %v3368_v35  ;;  %v2858_v33 = vadd.f32 %v2857_v0, %v2856_v2  ;;  %v2870_v8 = vadd.f32 %v2356_v24, %v2354_v19  ;;  %v3371_v21 = vrot.slane %v6188_v40, 2  ;;  %v2021_v44 = vpop.f32.mrb[106].mxu1 }
 0x272   : > { %v2575_v62 = vadd.f32 %v2574_v53, %v2225_v49  ;;  %v2867_v43 = vadd.f32 %v2866_v3, %v2865_v23  ;;  %v2567_v18 = vrot.slane %v2566_v38, 4  ;;  %v2879_v59 = vadd.f32 %v2357_v9, %v2355_v39  ;;  %v1625_v53 = vpop.f32.mrb[90].mxu0  ;;  %v2023_v3 = vpop.f32.mrb[107].mxu1 }
 0x273   : > { %v2226_v13 = vmul.f32 %v1619_v45, %v5417_v27  ;;  %v2859_v7 = vrot.slane %v2858_v33, 1  ;;  %v2358_v61 = vmul.f32 %v2015_v10, %v5451_v37  ;;  %v2227_v4 = vmul.f32 %v1621_v52, %v5420_v28  ;;  %v1627_v22 = vpop.f32.mrb[91].mxu0 }
 0x274   : > { %v2576_v25 = vrot.slane %v2575_v62, 4  ;;  %v2868_v14 = vrot.slane %v2867_v43, 1  ;;  %v2568_v19 = vadd.f32 %v2567_v18, %v2566_v38  ;;  %v2359_v5 = vmul.f32 %v2017_v55, %v5460_v42 }
 0x275   : > { %v3372_v40 = vsel %vm3314_vm6, %v3371_v21, %v3370_v63  ;;  %v2860_v51 = vadd.f32 %v2859_v7, %v2858_v33  ;;  %v2871_v39 = vadd.f32 %v2870_v8, %v2358_v61  ;;  %v3009_v36 = vrot.slane %v5646_v20, 5  ;;  %v2027_v7 = vpop.f32.mrb[108].mxu1 }
 0x276   : > { %v2577_v2 = vadd.f32 %v2576_v25, %v2575_v62  ;;  %v2869_v11 = vadd.f32 %v2868_v14, %v2867_v43  ;;  %v2569_v35 = vrot.slane %v2568_v19, 2  ;;  %v2880_v23 = vadd.f32 %v2879_v59, %v2359_v5  ;;  %v1631_v43 = vpop.f32.mrb[92].mxu0  ;;  %v2029_v5 = vpop.f32.mrb[109].mxu1 }
 0x277   : > { %v2228_v30 = vmul.f32 %v1625_v53, %v5431_v31  ;;  %v6648_v29 = vrot.slane %v5704_v26, 1  ;;  %v2360_v49 = vmul.f32 %v2021_v44, %v5471_v46  ;;  %v2229_v57 = vmul.f32 %v1627_v22, %v5434_v32  ;;  %v1633_v25 = vpop.f32.mrb[93].mxu0 }
 0x278   : > { %v2578_v24 = vrot.slane %v2577_v2, 2  ;;  %v6649_v38 = vrot.slane %v5719_v47, 1  ;;  %v2570_v63 = vadd.f32 %v2569_v35, %v2568_v19  ;;  %v2361_v8 = vmul.f32 %v2023_v3, %v5474_v41  ;;  %v1637_v35 = vpop.f32.mrb[94].mxu0 }
 0x279   : > { %v6268_v0 = vmul.f32 %v6648_v29, %v2860_v51  ;;  %v2582_v33 = vadd.f32 %v2228_v30, %v2226_v13  ;;  %v2872_v45 = vadd.f32 %v2871_v39, %v2360_v49  ;;  %v2591_v21 = vadd.f32 %v2229_v57, %v2227_v4  ;;  %v2033_v49 = vpop.f32.mrb[110].mxu1  ;;  %v1639_v57 = vpop.f32.mrb[95].mxu0 }
 0x27a   : > { %v6274_v9 = vmul.f32 %v6649_v38, %v2869_v11  ;;  %v2579_v62 = vadd.f32 %v2578_v24, %v2577_v2  ;;  %v3373_v18 = vrot.slane %v6193_v34, 1  ;;  %v2571_v59 = vrot.slane %v2570_v63, 1 }
 0x27b   : > { %v2881_v10 = vadd.f32 %v2880_v23, %v2361_v8  ;;  %v2230_v52 = vmul.f32 %v1631_v43, %v5451_v37  ;;  %v2873_v14 = vrot.slane %v2872_v45, 4  ;;  %v2362_v13 = vmul.f32 %v2027_v7, %v5417_v27 }
 0x27c   : > { %v2580_v55 = vrot.slane %v2579_v62, 1  ;;  %v2231_v19 = vmul.f32 %v1633_v25, %v5460_v42  ;;  %v2572_v51 = vadd.f32 %v2571_v59, %v2570_v63  ;;  %v2363_v34 = vmul.f32 %v2029_v5, %v5420_v28  ;;  %v1643_v7 = vpop.f32.mrb[96].mxu0 }
 0x27d   : > { %v2882_v4 = vrot.slane %v2881_v10, 4  ;;  %v2583_v2 = vadd.f32 %v2582_v33, %v2230_v52  ;;  %v2874_v53 = vadd.f32 %v2873_v14, %v2872_v45  ;;  %v6284_v23 = vsel %vm3317_vm7, %v3373_v18, %v3372_v40  ;;  %v2035_v40 = vpop.f32.mrb[111].mxu1 }
 0x27e   : > { %v2581_v39 = vadd.f32 %v2580_v55, %v2579_v62  ;;  %v2592_v11 = vadd.f32 %v2591_v21, %v2231_v19  ;;  %v3389_v30 = vrot.slane %v6268_v0, 7  ;;  %v6650_v44 = vrot.slane %v5639_v12, 1  ;;  %v2039_v5 = vpop.f32.mrb[112].mxu1 }
 0x27f   : > { %v2883_v29 = vadd.f32 %v2882_v4, %v2881_v10  ;;  %v2232_v24 = vmul.f32 %v1637_v35, %v5471_v46  ;;  %v6651_v3 = vrot.slane %v5646_v20, 1  ;;  %v2875_v63 = vrot.slane %v2874_v53, 2 }
 0x280   : > { %v3124_v22 = vmul.f32 %v6650_v44, %v2572_v51  ;;  %v2364_v33 = vmul.f32 %v2033_v49, %v5431_v31  ;;  %v2233_v8 = vmul.f32 %v1639_v57, %v5474_v41  ;;  %v2365_v43 = vmul.f32 %v2035_v40, %v5434_v32  ;;  %v1645_v51 = vpop.f32.mrb[97].mxu0  ;;  %v2041_v44 = vpop.f32.mrb[113].mxu1 }
 0x281   : > { %v3125_v38 = vmul.f32 %v6651_v3, %v2581_v39  ;;  %v2884_v45 = vrot.slane %v2883_v29, 2  ;;  %v2584_v21 = vadd.f32 %v2583_v2, %v2232_v24  ;;  %v2876_v59 = vadd.f32 %v2875_v63, %v2874_v53  ;;  %v1649_v49 = vpop.f32.mrb[98].mxu0 }
 0x282   : > { %v3333_v62 = vrot.slane %v3124_v22, 7  ;;  %v2888_v10 = vadd.f32 %v2364_v33, %v2362_v13  ;;  %v2593_v52 = vadd.f32 %v2592_v11, %v2233_v8  ;;  %v2897_v14 = vadd.f32 %v2365_v43, %v2363_v34  ;;  %v2045_v8 = vpop.f32.mrb[114].mxu1  ;;  %v1651_v40 = vpop.f32.mrb[99].mxu0 }
 0x283   : > { %v3347_v18 = vrot.slane %v3125_v38, 7  ;;  %v2885_v25 = vadd.f32 %v2884_v45, %v2883_v29  ;;  %v2585_v55 = vrot.slane %v2584_v21, 4  ;;  %v2234_v19 = vmul.f32 %v1643_v7, %v5417_v27 }
 0x284   : > { %v2877_v4 = vrot.slane %v2876_v59, 1  ;;  %v2594_v39 = vrot.slane %v2593_v52, 4  ;;  %v2366_v35 = vmul.f32 %v2039_v5, %v5451_v37  ;;  %v2235_v2 = vmul.f32 %v1645_v51, %v5420_v28  ;;  %v1655_v51 = vpop.f32.mrb[100].mxu0 }
 0x285   : > { %v2886_v22 = vrot.slane %v2885_v25, 1  ;;  %v2586_v24 = vadd.f32 %v2585_v55, %v2584_v21  ;;  %v2367_v13 = vmul.f32 %v2041_v44, %v5460_v42  ;;  %v6301_v53 = vsel %vm3299_vm1, %v3347_v18, %v6252_v48 }
 0x286   : > { %v2878_v34 = vadd.f32 %v2877_v4, %v2876_v59  ;;  %v2595_v11 = vadd.f32 %v2594_v39, %v2593_v52  ;;  %v2889_v29 = vadd.f32 %v2888_v10, %v2366_v35  ;;  %v6305_v57 = vsel %vm3299_vm1, %v3333_v62, %v6247_v58  ;;  %v2047_v59 = vpop.f32.mrb[115].mxu1 }
 0x287   : > { %v2887_v3 = vadd.f32 %v2886_v22, %v2885_v25  ;;  %v2587_v38 = vrot.slane %v2586_v24, 2  ;;  %v2898_v63 = vadd.f32 %v2897_v14, %v2367_v13  ;;  %v2236_v33 = vmul.f32 %v1649_v49, %v5431_v31  ;;  %v2051_v44 = vpop.f32.mrb[116].mxu1  ;;  %v1657_v22 = vpop.f32.mrb[101].mxu0 }
 0x288   : > { %v6652_v45 = vrot.slane %v5704_v26, 2  ;;  %v2596_v48 = vrot.slane %v2595_v11, 2  ;;  %v2368_v43 = vmul.f32 %v2045_v8, %v5471_v46  ;;  %v2237_v18 = vmul.f32 %v1651_v40, %v5434_v32  ;;  %v1661_v40 = vpop.f32.mrb[102].mxu0 }
 0x289   : > { %v6653_v58 = vrot.slane %v5719_v47, 2  ;;  %v2588_v10 = vadd.f32 %v2587_v38, %v2586_v24  ;;  %v2600_v52 = vadd.f32 %v2236_v33, %v2234_v19  ;;  %v2369_v7 = vmul.f32 %v2047_v59, %v5474_v41 }
 0x28a   : > { %v6310_v21 = vmul.f32 %v6652_v45, %v2878_v34  ;;  %v3403_v25 = vrot.slane %v6274_v9, 7  ;;  %v2597_v55 = vadd.f32 %v2596_v48, %v2595_v11  ;;  %v2890_v14 = vadd.f32 %v2889_v29, %v2368_v43 }
 0x28b   : > { %v6316_v62 = vmul.f32 %v6653_v58, %v2887_v3  ;;  %v2609_v5 = vadd.f32 %v2237_v18, %v2235_v2  ;;  %v2589_v4 = vrot.slane %v2588_v10, 1  ;;  %v2899_v39 = vadd.f32 %v2898_v63, %v2369_v7  ;;  %v2053_v3 = vpop.f32.mrb[117].mxu1  ;;  %v1663_v58 = vpop.f32.mrb[103].mxu0 }
 0x28c   : > { %v2238_v35 = vmul.f32 %v1655_v51, %v5451_v37  ;;  %v2598_v34 = vrot.slane %v2597_v55, 1  ;;  %v2891_v49 = vrot.slane %v2890_v14, 4  ;;  %v2370_v19 = vmul.f32 %v2051_v44, %v5417_v27  ;;  %v2057_v59 = vpop.f32.mrb[118].mxu1 }
 0x28d   : > { %v2239_v24 = vmul.f32 %v1657_v22, %v5460_v42  ;;  %v2590_v9 = vadd.f32 %v2589_v4, %v2588_v10  ;;  %v2900_v11 = vrot.slane %v2899_v39, 4  ;;  %v2371_v2 = vmul.f32 %v2053_v3, %v5420_v28 }
 0x28e   : > { %v2601_v29 = vadd.f32 %v2600_v52, %v2238_v35  ;;  %v3391_v38 = vrot.slane %v6310_v21, 6  ;;  %v2599_v63 = vadd.f32 %v2598_v34, %v2597_v55  ;;  %v2892_v33 = vadd.f32 %v2891_v49, %v2890_v14 }
 0x28f   : > { %v2610_v8 = vadd.f32 %v2609_v5, %v2239_v24  ;;  %v6654_v45 = vrot.slane %v5639_v12, 2  ;;  %v2901_v43 = vadd.f32 %v2900_v11, %v2899_v39  ;;  %v2240_v18 = vmul.f32 %v1661_v40, %v5471_v46  ;;  %v2059_v5 = vpop.f32.mrb[119].mxu1 }
 0x290   : > { %v6331_v10 = vsel %vm3299_vm1, %v3403_v25, %v6230_v50  ;;  %v6655_v52 = vrot.slane %v5646_v20, 2  ;;  %v2893_v51 = vrot.slane %v2892_v33, 2  ;;  %v2372_v55 = vmul.f32 %v2057_v59, %v5431_v31  ;;  %v1667_v50 = vpop.f32.mrb[104].mxu0 }
 0x291   : > { %v3126_v48 = vmul.f32 %v6654_v45, %v2590_v9  ;;  %v2241_v14 = vmul.f32 %v1663_v58, %v5474_v41  ;;  %v2902_v35 = vrot.slane %v2901_v43, 2  ;;  %v2602_v39 = vadd.f32 %v2601_v29, %v2240_v18  ;;  %v1669_v40 = vpop.f32.mrb[105].mxu0 }
 0x292   : > { %v3127_v7 = vmul.f32 %v6655_v52, %v2599_v63  ;;  %v2373_v44 = vmul.f32 %v2059_v5, %v5434_v32  ;;  %v2894_v34 = vadd.f32 %v2893_v51, %v2892_v33  ;;  %v2906_v49 = vadd.f32 %v2372_v55, %v2370_v19  ;;  %v2063_v63 = vpop.f32.mrb[120].mxu1 }
 0x293   : > { %v3335_v4 = vrot.slane %v3126_v48, 6  ;;  %v2611_v24 = vadd.f32 %v2610_v8, %v2241_v14  ;;  %v2903_v25 = vadd.f32 %v2902_v35, %v2901_v43  ;;  %v2603_v3 = vrot.slane %v2602_v39, 4  ;;  %v2065_v18 = vpop.f32.mrb[121].mxu1 }
 0x294   : > { %v3349_v22 = vrot.slane %v3127_v7, 6  ;;  %v2915_v9 = vadd.f32 %v2373_v44, %v2371_v2  ;;  %v2242_v11 = vmul.f32 %v1667_v50, %v5417_v27  ;;  %v2895_v45 = vrot.slane %v2894_v34, 1  ;;  %v1673_v7 = vpop.f32.mrb[106].mxu0 }
 0x295   : > { %v2612_v59 = vrot.slane %v2611_v24, 4  ;;  %v2374_v48 = vmul.f32 %v2063_v63, %v5451_v37  ;;  %v2243_v29 = vmul.f32 %v1669_v40, %v5420_v28  ;;  %v2904_v58 = vrot.slane %v2903_v25, 1  ;;  %v1675_v44 = vpop.f32.mrb[107].mxu0 }
 0x296   : > { %v2604_v52 = vadd.f32 %v2603_v3, %v2602_v39  ;;  %v2375_v19 = vmul.f32 %v2065_v18, %v5460_v42  ;;  %v6344_v33 = vsel %vm3302_vm2, %v3349_v22, %v6301_v53  ;;  %v2896_v2 = vadd.f32 %v2895_v45, %v2894_v34  ;;  %v2069_v39 = vpop.f32.mrb[122].mxu1 }
 0x297   : > { %v2613_v8 = vadd.f32 %v2612_v59, %v2611_v24  ;;  %v2907_v43 = vadd.f32 %v2906_v49, %v2374_v48  ;;  %v6348_v51 = vsel %vm3302_vm2, %v3335_v4, %v6305_v57  ;;  %v2905_v55 = vadd.f32 %v2904_v58, %v2903_v25  ;;  %v2071_v49 = vpop.f32.mrb[123].mxu1  ;;  %v1679_v48 = vpop.f32.mrb[108].mxu0 }
 0x298   : > { %v2605_v14 = vrot.slane %v2604_v52, 2  ;;  %v2916_v5 = vadd.f32 %v2915_v9, %v2375_v19  ;;  %v2244_v35 = vmul.f32 %v1673_v7, %v5431_v31  ;;  %v6656_v50 = vrot.slane %v5704_v26, 3  ;;  %v2075_v7 = vpop.f32.mrb[124].mxu1 }
 0x299   : > { %v2614_v53 = vrot.slane %v2613_v8, 2  ;;  %v2376_v22 = vmul.f32 %v2069_v39, %v5471_v46  ;;  %v2245_v34 = vmul.f32 %v1675_v44, %v5434_v32  ;;  %v6657_v57 = vrot.slane %v5719_v47, 3  ;;  %v1681_v39 = vpop.f32.mrb[109].mxu0 }
 0x29a   : > { %v6353_v3 = vmul.f32 %v6656_v50, %v2896_v2  ;;  %v2606_v24 = vadd.f32 %v2605_v14, %v2604_v52  ;;  %v2618_v25 = vadd.f32 %v2244_v35, %v2242_v11  ;;  %v2377_v9 = vmul.f32 %v2071_v49, %v5474_v41 }
 0x29b   : > { %v3161_v4 = vmul.f32 %v6657_v57, %v2905_v55  ;;  %v3405_v63 = vrot.slane %v6316_v62, 6  ;;  %v2615_v40 = vadd.f32 %v2614_v53, %v2613_v8  ;;  %v2908_v45 = vadd.f32 %v2907_v43, %v2376_v22  ;;  %v2077_v55 = vpop.f32.mrb[125].mxu1 }
 0x29c   : > { %v2627_v59 = vadd.f32 %v2245_v34, %v2243_v29  ;;  %v2607_v58 = vrot.slane %v2606_v24, 1  ;;  %v2917_v19 = vadd.f32 %v2916_v5, %v2377_v9  ;;  %v2246_v2 = vmul.f32 %v1679_v48, %v5451_v37  ;;  %v1685_v5 = vpop.f32.mrb[110].mxu0  ;;  %v2081_v9 = vpop.f32.mrb[126].mxu1 }
 0x29d   : > { %v3407_v18 = vrot.slane %v3161_v4, 5  ;;  %v2616_v44 = vrot.slane %v2615_v40, 1  ;;  %v2909_v50 = vrot.slane %v2908_v45, 4  ;;  %v2378_v52 = vmul.f32 %v2075_v7, %v5417_v27  ;;  %v1687_v48 = vpop.f32.mrb[111].mxu0 }
 0x29e   : > { %v2247_v11 = vmul.f32 %v1681_v39, %v5460_v42  ;;  %v2608_v14 = vadd.f32 %v2607_v58, %v2606_v24  ;;  %v2918_v62 = vrot.slane %v2917_v19, 4  ;;  %v2619_v8 = vadd.f32 %v2618_v25, %v2246_v2 }
 0x29f   : > { %v2379_v29 = vmul.f32 %v2077_v55, %v5420_v28  ;;  %v2617_v43 = vadd.f32 %v2616_v44, %v2615_v40  ;;  %v2910_v35 = vadd.f32 %v2909_v50, %v2908_v45  ;;  %v3406_v22 = vsel %vm3302_vm2, %v3405_v63, %v6331_v10  ;;  %v2083_v10 = vpop.f32.mrb[127].mxu1 }
 0x2a0   : > { %v2628_v53 = vadd.f32 %v2627_v59, %v2247_v11  ;;  %v6658_v34 = vrot.slane %v5639_v12, 3  ;;  %v2919_v57 = vadd.f32 %v2918_v62, %v2917_v19  ;;  %v2248_v4 = vmul.f32 %v1685_v5, %v5471_v46  ;;  %v2087_v5 = vpop.f32.mrb[128].mxu1 }
 0x2a1   : > { %v6371_v24 = vsel %vm3305_vm3, %v3407_v18, %v3406_v22  ;;  %v6659_v25 = vrot.slane %v5646_v20, 3  ;;  %v2911_v45 = vrot.slane %v2910_v35, 2  ;;  %v2380_v59 = vmul.f32 %v2081_v9, %v5431_v31  ;;  %v1691_v18 = vpop.f32.mrb[112].mxu0 }
 0x2a2   : > { %v3128_v49 = vmul.f32 %v6658_v34, %v2608_v14  ;;  %v2249_v58 = vmul.f32 %v1687_v48, %v5474_v41  ;;  %v2920_v2 = vrot.slane %v2919_v57, 2  ;;  %v2620_v7 = vadd.f32 %v2619_v8, %v2248_v4  ;;  %v1693_v22 = vpop.f32.mrb[113].mxu0  ;;  %v2089_v4 = vpop.f32.mrb[129].mxu1 }
 0x2a3   : > { %v3129_v40 = vmul.f32 %v6659_v25, %v2617_v43  ;;  %v2381_v19 = vmul.f32 %v2083_v10, %v5434_v32  ;;  %v2912_v44 = vadd.f32 %v2911_v45, %v2910_v35  ;;  %v2924_v50 = vadd.f32 %v2380_v59, %v2378_v52 }
 0x2a4   : > { %v3337_v63 = vrot.slane %v3128_v49, 5  ;;  %v2629_v11 = vadd.f32 %v2628_v53, %v2249_v58  ;;  %v2921_v55 = vadd.f32 %v2920_v2, %v2919_v57  ;;  %v2621_v14 = vrot.slane %v2620_v7, 4 }
 0x2a5   : > { %v3351_v39 = vrot.slane %v3129_v40, 5  ;;  %v2933_v62 = vadd.f32 %v2381_v19, %v2379_v29  ;;  %v2250_v43 = vmul.f32 %v1691_v18, %v5417_v27  ;;  %v2913_v34 = vrot.slane %v2912_v44, 1  ;;  %v1697_v40 = vpop.f32.mrb[114].mxu0 }
 0x2a6   : > { %v2630_v9 = vrot.slane %v2629_v11, 4  ;;  %v2382_v49 = vmul.f32 %v2087_v5, %v5451_v37  ;;  %v2251_v8 = vmul.f32 %v1693_v22, %v5420_v28  ;;  %v2922_v48 = vrot.slane %v2921_v55, 1  ;;  %v1699_v19 = vpop.f32.mrb[115].mxu0 }
 0x2a7   : > { %v2622_v25 = vadd.f32 %v2621_v14, %v2620_v7  ;;  %v2383_v52 = vmul.f32 %v2089_v4, %v5460_v42  ;;  %v6384_v35 = vsel %vm3305_vm3, %v3351_v39, %v6344_v33  ;;  %v2914_v29 = vadd.f32 %v2913_v34, %v2912_v44  ;;  %v2093_v7 = vpop.f32.mrb[130].mxu1 }
 0x2a8   : > { %v2631_v53 = vadd.f32 %v2630_v9, %v2629_v11  ;;  %v2925_v57 = vadd.f32 %v2924_v50, %v2382_v49  ;;  %v6388_v45 = vsel %vm3305_vm3, %v3337_v63, %v6348_v51  ;;  %v2923_v59 = vadd.f32 %v2922_v48, %v2921_v55  ;;  %v2095_v50 = vpop.f32.mrb[131].mxu1  ;;  %v1703_v49 = vpop.f32.mrb[116].mxu0 }
 0x2a9   : > { %v2623_v58 = vrot.slane %v2622_v25, 2  ;;  %v2934_v10 = vadd.f32 %v2933_v62, %v2383_v52  ;;  %v2252_v2 = vmul.f32 %v1697_v40, %v5431_v31  ;;  %v6660_v18 = vrot.slane %v5704_v26, 4  ;;  %v2099_v40 = vpop.f32.mrb[132].mxu1 }
 0x2aa   : > { %v2632_v33 = vrot.slane %v2631_v53, 2  ;;  %v2384_v39 = vmul.f32 %v2093_v7, %v5471_v46  ;;  %v2253_v44 = vmul.f32 %v1699_v19, %v5434_v32  ;;  %v6661_v51 = vrot.slane %v5719_v47, 4  ;;  %v1705_v7 = vpop.f32.mrb[117].mxu0 }
 0x2ab   : > { %v6393_v14 = vmul.f32 %v6660_v18, %v2914_v29  ;;  %v2624_v11 = vadd.f32 %v2623_v58, %v2622_v25  ;;  %v2636_v55 = vadd.f32 %v2252_v2, %v2250_v43  ;;  %v2385_v62 = vmul.f32 %v2095_v50, %v5474_v41 }
 0x2ac   : > { %v3163_v63 = vmul.f32 %v6661_v51, %v2923_v59  ;;  %v3393_v5 = vrot.slane %v6353_v3, 5  ;;  %v2633_v22 = vadd.f32 %v2632_v33, %v2631_v53  ;;  %v2926_v34 = vadd.f32 %v2925_v57, %v2384_v39  ;;  %v2101_v59 = vpop.f32.mrb[133].mxu1 }
 0x2ad   : > { %v2645_v9 = vadd.f32 %v2253_v44, %v2251_v8  ;;  %v2625_v48 = vrot.slane %v2624_v11, 1  ;;  %v2935_v52 = vadd.f32 %v2934_v10, %v2385_v62  ;;  %v2254_v29 = vmul.f32 %v1703_v49, %v5451_v37  ;;  %v1709_v10 = vpop.f32.mrb[118].mxu0  ;;  %v2105_v49 = vpop.f32.mrb[134].mxu1 }
 0x2ae   : > { %v3409_v4 = vrot.slane %v3163_v63, 4  ;;  %v2634_v19 = vrot.slane %v2633_v22, 1  ;;  %v2927_v18 = vrot.slane %v2926_v34, 4  ;;  %v2386_v25 = vmul.f32 %v2099_v40, %v5417_v27 }
 0x2af   : > { %v2255_v43 = vmul.f32 %v1705_v7, %v5460_v42  ;;  %v2626_v58 = vadd.f32 %v2625_v48, %v2624_v11  ;;  %v2936_v2 = vrot.slane %v2935_v52, 4  ;;  %v2637_v53 = vadd.f32 %v2636_v55, %v2254_v29  ;;  %v1711_v55 = vpop.f32.mrb[119].mxu0 }
 0x2b0   : > { %v2387_v8 = vmul.f32 %v2101_v59, %v5420_v28  ;;  %v2635_v57 = vadd.f32 %v2634_v19, %v2633_v22  ;;  %v2928_v33 = vadd.f32 %v2927_v18, %v2926_v34  ;;  %v6407_v44 = vsel %vm3308_vm4, %v3409_v4, %v6371_v24  ;;  %v2107_v24 = vpop.f32.mrb[135].mxu1 }
 0x2b1   : > { %v2646_v39 = vadd.f32 %v2645_v9, %v2255_v43  ;;  %v3395_v50 = vrot.slane %v6393_v14, 4  ;;  %v6662_v51 = vrot.slane %v5639_v12, 4  ;;  %v2937_v62 = vadd.f32 %v2936_v2, %v2935_v52 }
 0x2b2   : > { %v2256_v11 = vmul.f32 %v1709_v10, %v5471_v46  ;;  %v6663_v48 = vrot.slane %v5646_v20, 4  ;;  %v2929_v34 = vrot.slane %v2928_v33, 2  ;;  %v2388_v9 = vmul.f32 %v2105_v49, %v5431_v31 }
 0x2b3   : > { %v3130_v63 = vmul.f32 %v6662_v51, %v2626_v58  ;;  %v2257_v29 = vmul.f32 %v1711_v55, %v5474_v41  ;;  %v2938_v40 = vrot.slane %v2937_v62, 2  ;;  %v2389_v19 = vmul.f32 %v2107_v24, %v5434_v32  ;;  %v1715_v58 = vpop.f32.mrb[120].mxu0 }
 0x2b4   : > { %v3131_v22 = vmul.f32 %v6663_v48, %v2635_v57  ;;  %v2638_v7 = vadd.f32 %v2637_v53, %v2256_v11  ;;  %v2930_v52 = vadd.f32 %v2929_v34, %v2928_v33  ;;  %v2942_v43 = vadd.f32 %v2388_v9, %v2386_v25  ;;  %v2111_v48 = vpop.f32.mrb[136].mxu1  ;;  %v1717_v49 = vpop.f32.mrb[121].mxu0 }
 0x2b5   : > { %v3339_v4 = vrot.slane %v3130_v63, 4  ;;  %v2647_v59 = vadd.f32 %v2646_v39, %v2257_v29  ;;  %v2939_v2 = vadd.f32 %v2938_v40, %v2937_v62  ;;  %v2951_v51 = vadd.f32 %v2389_v19, %v2387_v8  ;;  %v2113_v11 = vpop.f32.mrb[137].mxu1  ;;  %v1721_v34 = vpop.f32.mrb[122].mxu0 }
 0x2b6   : > { %v3353_v18 = vrot.slane %v3131_v22, 4  ;;  %v2639_v10 = vrot.slane %v2638_v7, 4  ;;  %v2258_v57 = vmul.f32 %v1715_v58, %v5417_v27  ;;  %v2931_v61 = vrot.slane %v2930_v52, 1 }
 0x2b7   : > { %v2648_v55 = vrot.slane %v2647_v59, 4  ;;  %v2390_v63 = vmul.f32 %v2111_v48, %v5451_v37  ;;  %v2259_v53 = vmul.f32 %v1717_v49, %v5420_v28  ;;  %v2940_v24 = vrot.slane %v2939_v2, 1  ;;  %v2117_v48 = vpop.f32.mrb[138].mxu1 }
 0x2b8   : > { %v2640_v22 = vadd.f32 %v2639_v10, %v2638_v7  ;;  %v2391_v25 = vmul.f32 %v2113_v11, %v5460_v42  ;;  %v6424_v33 = vsel %vm3308_vm4, %v3353_v18, %v6384_v35  ;;  %v2932_v8 = vadd.f32 %v2931_v61, %v2930_v52  ;;  %v1723_v7 = vpop.f32.mrb[123].mxu0  ;;  %v2119_v52 = vpop.f32.mrb[139].mxu1 }
 0x2b9   : > { %v2649_v39 = vadd.f32 %v2648_v55, %v2647_v59  ;;  %v2943_v62 = vadd.f32 %v2942_v43, %v2390_v63  ;;  %v3340_v9 = vsel %vm3308_vm4, %v3339_v4, %v6388_v45  ;;  %v2941_v29 = vadd.f32 %v2940_v24, %v2939_v2 }
 0x2ba   : > { %v2641_v40 = vrot.slane %v2640_v22, 2  ;;  %v2952_v19 = vadd.f32 %v2951_v51, %v2391_v25  ;;  %v2260_v58 = vmul.f32 %v1721_v34, %v5431_v31  ;;  %v6664_v10 = vrot.slane %v5704_v26, 5  ;;  %v2123_v34 = vpop.f32.mrb[140].mxu1 }
 0x2bb   : > { %v2650_v35 = vrot.slane %v2649_v39, 2  ;;  %v2392_v61 = vmul.f32 %v2117_v48, %v5471_v46  ;;  %v2261_v18 = vmul.f32 %v1723_v7, %v5434_v32  ;;  %v6665_v43 = vrot.slane %v5719_v47, 5 }
 0x2bc   : > { %v6431_v49 = vmul.f32 %v6664_v10, %v2932_v8  ;;  %v2642_v4 = vadd.f32 %v2641_v40, %v2640_v22  ;;  %v2654_v59 = vadd.f32 %v2260_v58, %v2258_v57  ;;  %v2393_v2 = vmul.f32 %v2119_v52, %v5474_v41  ;;  %v2125_v57 = vpop.f32.mrb[141].mxu1 }
 0x2bd   : > { %v3165_v45 = vmul.f32 %v6665_v43, %v2941_v29  ;;  %v2651_v51 = vadd.f32 %v2650_v35, %v2649_v39  ;;  %v2944_v55 = vadd.f32 %v2943_v62, %v2392_v61  ;;  %v2663_v63 = vadd.f32 %v2261_v18, %v2259_v53  ;;  %v2129_v18 = vpop.f32.mrb[142].mxu1 }
 0x2be   : > { %v3038_v11 = vrot.slane %v5704_v26, 6  ;;  %v2643_v24 = vrot.slane %v2642_v4, 1  ;;  %v2655_v25 = vadd.f32 %v2654_v59, %v5499_v56  ;;  %v2953_v8 = vadd.f32 %v2952_v19, %v2393_v2 }
 0x2bf   : > { %v3411_v48 = vrot.slane %v3165_v45, 3  ;;  %v2652_v7 = vrot.slane %v2651_v51, 1  ;;  %v2945_v10 = vrot.slane %v2944_v55, 4  ;;  %v2664_v13 = vadd.f32 %v2663_v63, %v5507_v60 }
 0x2c0   : > { %v2394_v22 = vmul.f32 %v2123_v34, %v5417_v27  ;;  %v2644_v29 = vadd.f32 %v2643_v24, %v2642_v4  ;;  %v2656_v39 = vadd.f32 %v2655_v25, %v5518_v1  ;;  %v2954_v62 = vrot.slane %v2953_v8, 4 }
 0x2c1   : > { %v2395_v53 = vmul.f32 %v2125_v57, %v5420_v28  ;;  %v2653_v40 = vadd.f32 %v2652_v7, %v2651_v51  ;;  %v2946_v58 = vadd.f32 %v2945_v10, %v2944_v55  ;;  %v2665_v56 = vadd.f32 %v2664_v13, %v5532_v6 }
 0x2c2   : > { %v6447_v19 = vsel %vm3311_vm5, %v3411_v48, %v6407_v44  ;;  %v6666_v35 = vrot.slane %v5639_v12, 5  ;;  %v2657_v61 = vrot.slane %v2656_v39, 4  ;;  %v2955_v27 = vadd.f32 %v2954_v62, %v2953_v8  ;;  %v2131_v44 = vpop.f32.mrb[143].mxu1 }
 0x2c3   : > { %v3390_v1 = vsel %vm3299_vm1, %v3389_v30, %v6225_v54  ;;  %v3133_v28 = vmul.f32 %v3009_v36, %v2653_v40  ;;  %v2947_v52 = vrot.slane %v2946_v58, 2  ;;  %v2666_v6 = vrot.slane %v2665_v56, 4  ;;  %v2135_v30 = vpop.f32.mrb[144].mxu1 }
 0x2c4   : > { %v3132_v60 = vmul.f32 %v6666_v35, %v2644_v29  ;;  %v2396_v13 = vmul.f32 %v2129_v18, %v5431_v31  ;;  %v2658_v43 = vadd.f32 %v2657_v61, %v2656_v39  ;;  %v2956_v45 = vrot.slane %v2955_v27, 2  ;;  %v2137_v34 = vpop.f32.mrb[145].mxu1 }
 0x2c5   : > { %v2397_v4 = vmul.f32 %v2131_v44, %v5434_v32  ;;  %v2948_v2 = vadd.f32 %v2947_v52, %v2946_v58  ;;  %v2667_v51 = vadd.f32 %v2666_v6, %v2665_v56  ;;  %v3355_v63 = vrot.slane %v3133_v28, 3  ;;  %v2141_v40 = vpop.f32.mrb[146].mxu1 }
 0x2c6   : > { %v3341_v59 = vrot.slane %v3132_v60, 3  ;;  %v2960_v55 = vadd.f32 %v2396_v13, %v2394_v22  ;;  %v2659_v0 = vrot.slane %v2658_v43, 2  ;;  %v2957_v24 = vadd.f32 %v2956_v45, %v2955_v27  ;;  %v2143_v58 = vpop.f32.mrb[147].mxu1 }
 0x2c7   : > { %v2969_v54 = vadd.f32 %v2397_v4, %v2395_v53  ;;  %v2949_v25 = vrot.slane %v2948_v2, 1  ;;  %v2668_v8 = vrot.slane %v2667_v51, 2  ;;  %v2398_v31 = vmul.f32 %v2135_v30, %v5451_v37 }
 0x2c8   : > { %v3342_v36 = vsel %vm3311_vm5, %v3341_v59, %v3340_v9  ;;  %v3356_v48 = vsel %vm3311_vm5, %v3355_v63, %v6424_v33  ;;  %v2660_v32 = vadd.f32 %v2659_v0, %v2658_v43  ;;  %v2958_v7 = vrot.slane %v2957_v24, 1 }
 0x2c9   : > { %v2399_v10 = vmul.f32 %v2137_v34, %v5460_v42  ;;  %v3392_v22 = vsel %vm3302_vm2, %v3391_v38, %v3390_v1  ;;  %v2950_v57 = vadd.f32 %v2949_v25, %v2948_v2  ;;  %v2669_v29 = vadd.f32 %v2668_v8, %v2667_v51 }
 0x2ca   : > { %v2961_v39 = vadd.f32 %v2960_v55, %v2398_v31  ;;  %v3394_v9 = vsel %vm3305_vm3, %v3393_v5, %v3392_v22  ;;  %v2661_v37 = vrot.slane %v2660_v32, 1  ;;  %v2959_v62 = vadd.f32 %v2958_v7, %v2957_v24  ;;  %v3514_v22 = vld [vmem:[#allocation8] sm:$0xff] }
 0x2cb   : > { %v2970_v53 = vadd.f32 %v2969_v54, %v2399_v10  ;;  %v3396_v33 = vsel %vm3308_vm4, %v3395_v50, %v3394_v9  ;;  %v2670_v42 = vrot.slane %v2669_v29, 1  ;;  %v2400_v21 = vmul.f32 %v2141_v40, %v5471_v46 }
 0x2cc   : > { %v3166_v38 = vmul.f32 %v3038_v11, %v2950_v57  ;;  %v3397_v56 = vrot.slane %v6431_v49, 3  ;;  %v2401_v3 = vmul.f32 %v2143_v58, %v5474_v41  ;;  %v2662_v5 = vadd.f32 %v2661_v37, %v2660_v32  ;;  %v3516_v57 = vld [vmem:[#allocation8 + $0x10] sm:$0xff] }
 0x2cd   : > { %v3010_v35 = vrot.slane %v5639_v12, 6  ;;  %v6667_v60 = vrot.slane %v5719_v47, 6  ;;  %v2962_v14 = vadd.f32 %v2961_v39, %v2400_v21  ;;  %v2671_v27 = vadd.f32 %v2670_v42, %v2669_v29  ;;  %v3517_v29 = vld [vmem:[#allocation8 + $0x18] sm:$0xff] }
 0x2ce   : > { %v3398_v50 = vsel %vm3311_vm5, %v3397_v56, %v3396_v33  ;;  %v3399_v18 = vrot.slane %v3166_v38, 2  ;;  %v2971_v46 = vadd.f32 %v2970_v53, %v2401_v3  ;;  %v6668_v11 = vrot.slane %v5646_v20, 6  ;;  %v3518_v53 = vld [vmem:[#allocation8 + $0x20] sm:$0xff]  ;;  %v3519_v33 = vld [vmem:[#allocation8 + $0x28] sm:$0xff] }
 0x2cf   : > { %v3167_v61 = vmul.f32 %v6667_v60, %v2959_v62  ;;  %v3134_v1 = vmul.f32 %v3010_v35, %v2662_v5  ;;  %v2963_v52 = vrot.slane %v2962_v14, 4  ;;  %v3345_v45 = vrot.slane %v5996_v15, 1  ;;  %v3520_v35 = vld [vmem:[#allocation8 + $0x30] sm:$0xff]  ;;  %v3521_v60 = vld [vmem:[#allocation8 + $0x38] sm:$0xff] }
 0x2d0   : > { %v3135_v49 = vmul.f32 %v6668_v11, %v2671_v27  ;;  %v3400_v41 = vsel %vm3314_vm6, %v3399_v18, %v3398_v50  ;;  %v2972_v6 = vrot.slane %v2971_v46, 4  ;;  %v3359_v59 = vrot.slane %v5950_v17, 1 }
 0x2d1   : > { %v3413_v28 = vrot.slane %v3167_v61, 2  ;;  %v3343_v13 = vrot.slane %v3134_v1, 2  ;;  %v2964_v44 = vadd.f32 %v2963_v52, %v2962_v14  ;;  %v3040_v17 = vrot.slane %v5704_v26, 7  ;;  %v3515_v26 = vld [vmem:[#allocation8 + $0x8] sm:$0xff] }
 0x2d2   : > { %v3357_v43 = vrot.slane %v3135_v49, 2  ;;  %v2973_v4 = vadd.f32 %v2972_v6, %v2971_v46  ;;  %v3041_v25 = vrot.slane %v5719_v47, 7 }
 0x2d3   : > { %v3414_v12 = vsel %vm3314_vm6, %v3413_v28, %v6447_v19  ;;  %v3344_v2 = vsel %vm3314_vm6, %v3343_v13, %v3342_v36  ;;  %v2965_v51 = vrot.slane %v2964_v44, 2 }
 0x2d4   : > { %v3358_v20 = vsel %vm3314_vm6, %v3357_v43, %v3356_v48  ;;  %v3346_v55 = vsel %vm3317_vm7, %v3345_v45, %v3344_v2  ;;  %v2974_v63 = vrot.slane %v2973_v4, 2  ;;  %v3568_v45 = vld [vmem:[%s6569_s10] sm:$0x3] }
 0x2d5   : > { %v3360_v0 = vsel %vm3317_vm7, %v3359_v59, %v3358_v20  ;;  %v2966_v24 = vadd.f32 %v2965_v51, %v2964_v44  ;;  %v3554_v44 = vld [vmem:[%s6568_s9] sm:$0x3]  ;;  %v6669_v59 = vld [vmem:[#allocation22_spill] sm:$0xff] }
 0x2d6   : > { %3495 = vmatprep.mubr.f32.mxu0 %v3360_v0  ;;  %v2975_v19 = vadd.f32 %v2974_v63, %v2973_v4  ;;  %v3559_v2 = vrot.slane %v3554_v44, %v6669_v59  ;;  %v3573_v0 = vrot.slane %v3568_v45, %v6669_v59 }
 0x2d7   : > { %3496 = vmatmul.mubr.f32.gmra.mrb[126].mxu0 %v3346_v55  ;;  %v2967_v54 = vrot.slane %v2966_v24, 1  ;;  %v6670_v55 = vld [vmem:[#allocation23_spill] sm:$0xff] }
 0x2d8   : > { %3501 = vmatprep.mubr.f32.mxu0 %v6201_v16  ;;  %v2976_v15 = vrot.slane %v2975_v19, 1  ;;  %v3563_v63 = vrot.slane %v3554_v44, %v6670_v55 }
 0x2d9   : > { %v2968_v30 = vadd.f32 %v2967_v54, %v2966_v24 }
 0x2da   : > { %v2977_v36 = vadd.f32 %v2976_v15, %v2975_v19  ;;  %v3577_v19 = vrot.slane %v3568_v45, %v6670_v55 }
 0x2db   : > { %3502 = vmatmul.mubr.f32.gmra.mrb[128].mxu0 %v6284_v23  ;;  %v3168_v8 = vmul.f32 %v3040_v17, %v2968_v30 }
 0x2dc   : > { %v3169_v31 = vmul.f32 %v3041_v25, %v2977_v36 }
 0x2dd   : > { %v3401_v34 = vrot.slane %v3168_v8, 1 }
 0x2de   : > { %v3415_v48 = vrot.slane %v3169_v31, 1 }
 0x2df   : > { %v3402_v32 = vsel %vm3317_vm7, %v3401_v34, %v3400_v41 }
 0x2e0   : > { %v3416_v7 = vsel %vm3317_vm7, %v3415_v48, %v3414_v12 }
 0x2e1   : > { %3507 = vmatprep.mubr.f32.mxu0 %v3416_v7 }
 0x2e2   : > { %3508 = vmatmul.mubr.f32.gmra.mrb[130].mxu0 %v3402_v32 }
 0x339   : > { %v3491_v16 = vpop.f32.mrb[124].mxu0 }
 0x33a   : > { %v3493_v10 = vpop.f32.mrb[125].mxu0  ;;  %v3522_v23 = vmul.f32 %v3514_v22, %v3491_v16  ;;  %v4377_v16 = vmov 1966171168  }
 0x33b   : > { %v3523_v37 = vmul.f32 %v3515_v26, %v3493_v10  ;;  %v3598_v10 = vunpack.c.l.s4 %v4377_v16  ;;  %v6671_v26 = vld [vmem:[#allocation21_spill] sm:$0xff] }
 0x33d   : > { %v3599_v22 = vunpack.c.0.s8 %v3598_v10 }
 0x3aa   : > { %v3497_v39 = vpop.f32.mrb[126].mxu0 }
 0x3ab   : > { %v3524_v9 = vmul.f32 %v3516_v57, %v3497_v39  ;;  %v3499_v47 = vpop.f32.mrb[127].mxu0 }
 0x3ac   : > { %v3525_v62 = vmul.f32 %v3517_v29, %v3499_v47  ;;  %v3602_v29 = vsub.s32 %v3599_v22, %v6671_v26  ;;  %v6672_v47 = vlaneseq }
 0x3ad   : > { %v3530_v40 = vadd.f32 %v3524_v9, %v3522_v23 }
 0x3ae   : > { %v3539_v42 = vadd.f32 %v3525_v62, %v3523_v37  ;;  %v3503_v21 = vpop.f32.mrb[128].mxu0  ;;  %vm3614_vm10 = vcmp.lt.s32.totalorder %v6672_v47, 256 }
 0x3af   : > { %v3526_v58 = vmul.f32 %v3518_v53, %v3503_v21  ;;  %v3505_v38 = vpop.f32.mrb[129].mxu0 }
 0x3b0   : > { %v3527_v56 = vmul.f32 %v3519_v33, %v3505_v38 }
 0x3b1   : > { %v3531_v3 = vadd.f32 %v3530_v40, %v3526_v58 }
 0x3b2   : > { %v3540_v5 = vadd.f32 %v3539_v42, %v3527_v56 }
 0x3b5   : > { %v3509_v61 = vpop.f32.mrb[130].mxu0 }
 0x3b6   : > { %v3528_v14 = vmul.f32 %v3520_v35, %v3509_v61  ;;  %v3511_v27 = vpop.f32.mrb[131].mxu0 }
 0x3b7   : > { %v3529_v50 = vmul.f32 %v3521_v60, %v3511_v27 }
 0x3b8   : > { %v3532_v18 = vadd.f32 %v3531_v3, %v3528_v14 }
 0x3b9   : > { %v3541_v46 = vadd.f32 %v3540_v5, %v3529_v50 }
 0x3ba   : > { %v3533_v1 = vrot.slane %v3532_v18, 4 }
 0x3bb   : > { %v3542_v28 = vrot.slane %v3541_v46, 4 }
 0x3bc   : > { %v3534_v52 = vadd.f32 %v3533_v1, %v3532_v18 }
 0x3bd   : > { %v3543_v11 = vadd.f32 %v3542_v28, %v3541_v46 }
 0x3be   : > { %v3535_v49 = vrot.slane %v3534_v52, 2 }
 0x3bf   : > { %v3544_v41 = vrot.slane %v3543_v11, 2 }
 0x3c0   : > { %v3536_v6 = vadd.f32 %v3535_v49, %v3534_v52 }
 0x3c1   : > { %v3545_v13 = vadd.f32 %v3544_v41, %v3543_v11 }
 0x3c2   : > { %v3537_v12 = vrot.slane %v3536_v6, 1 }
 0x3c3   : > { %v3546_v43 = vrot.slane %v3545_v13, 1 }
 0x3c4   : > { %v3538_v4 = vadd.f32 %v3537_v12, %v3536_v6 }
 0x3c5   : > { %v3547_v51 = vadd.f32 %v3546_v43, %v3545_v13 }
 0x3c6   : > { %vm3548_vm8 = vcmp.ge.f32.partialorder %v3538_v4, 0.0  ;;  %v3550_v20 = vmul.f32 0.2, %v3538_v4 }
 0x3c7   : > { %vm3549_vm9 = vcmp.ge.f32.partialorder %v3547_v51, 0.0  ;;  %v3551_v24 = vmul.f32 0.2, %v3547_v51 }
 0x3c8   : > { %v3552_v54 = vsel %vm3548_vm8, %v3538_v4, %v3550_v20 }
 0x3c9   : > { %v3566_v15 = vmul.f32 %v3559_v2, %v3552_v54  ;;  %v3553_v30 = vsel %vm3549_vm9, %v3547_v51, %v3551_v24 }
 0x3ca   : > { %v3567_v17 = vmul.f32 %v3563_v63, %v3553_v30 }
 0x3cb   : > { %v3580_v36 = vadd.f32 %v3573_v0, %v3566_v15 }
 0x3cc   : > { %v3581_v25 = vadd.f32 %v3577_v19, %v3567_v17 }
 0x3cd   : > { %v3903_v8 = vmul.f32 -1.442695, %v3580_v36 }
 0x3ce   : > { %v3904_v31 = vmul.f32 -1.442695, %v3581_v25 }
 0x3cf   : > { %4164 = vpow2.f32 %v3903_v8 }
 0x3d0   : > { %4166 = vpow2.f32 %v3904_v31 }
 0x3d9   : > { %v4165_v34 = vpop.eup %4164 }
 0x3da   : > { %v4167_v48 = vpop.eup %4166  ;;  %v3588_v32 = vadd.f32 1.0, %v4165_v34 }
 0x3db   : > { %v3589_v7 = vadd.f32 1.0, %v4167_v48 }
 0x3dc   : > { %4168 = vrcp.f32 %v3588_v32 }
 0x3dd   : > { %4170 = vrcp.f32 %v3589_v7 }
 0x3e6   : > { %v4169_v57 = vpop.eup %4168 }
 0x3e7   : > { %v4171_v39 = vpop.eup %4170 }
 0x3e8   : > { %v3596_v23 = vcombine.low %v4169_v57, %v4171_v39 }
 0x3ea   : > { %v3603_v9 = vrot.slane %v3596_v23, %v3602_v29 }
 0x3ec   : > { %v3610_v37 = vrot.slane %v3603_v9, %v3602_v29 }
 0x3ee   : > { %3616 = vst.msk [vmem:[%s488_s22] sm:$0x3] %vm3614_vm10, %v3610_v37 }
 0x3ef   : > { %4301 = shalt.err (!%p4298_p0)
}
 0x3f0   : > { %s4302_s26 = scalar_lea.hbm %s6516_s4, 32  ;;  %s4306_s12 = scalar_lea.hbm %s6673_s14, 128 }
 0x3f1   : > { %p4303_p2 = scmp.ne.s32.totalorder %s6516_s4, %s4302_s26  ;;  %p4307_p3 = scmp.lt.u32.totalorder %s6516_s4, %s6673_s14 }
 0x3f2   : > { %p4308_p7 = scmp.lt.u32.totalorder %s4306_s12, %s4302_s26  ;;  %p4310_p12 = scmp.lt.u32.totalorder %s4302_s26, %s6516_s4 }
 0x3f3   : > { %p4304_p10 = pnand %p4303_p2, %p4557_p6 }
 0x3f4   : > { %p4309_p9 = por %p4308_p7, %p4307_p3 }
 0x3f5   : > { %p4305_p13 = pneg %p4304_p10 }
 0x3f6   : > { %p4311_p5 = por %p4310_p12, %p4309_p9 }
 0x3f8   : > { %p4312_p1 = pnand %p4311_p5, %p4305_p13 }
 0x3fa   : > { %4315 = shalt.err (!%p4312_p1)
}
 0x3fb   : > { %4098 = dma.vmem_to_hbm [thread:$0]  (%p4557_p6), %s6518_s27, 32, %s6516_s4, %s3618_s17  }
 0x3fc PF: > { %s6674_s8 = sld [smem:[#allocation16_spill]]  ;;  %s6675_s19 = sld [smem:[#allocation18_spill]] }
 0x3fd   : > { %p4123_p4 = scmp.ge.s32.totalorder %s4366_s20, 2 }
 0x402   : > { %s3644_s25 = sand.u32 1, %s6674_s8   ;;  %p6676_p8 = scmp.ne.s32.totalorder %s6675_s19, 0 }
 0x403   : > { %s3645_s22 = scalar_lea.sflag [#allocation4], %s3644_s25 }
 0x404   : > { %p4115_p11 = pnand %p4123_p4, %p6676_p8 }
 0x406   : > { %4349 = dma.done.wait (!%p4115_p11), %s3645_s22, 32  }
 0x407   : > { %4351 = vsyncadd (!%p4115_p11), %s3645_s22, 4294967264  ;;  %s6677_s20 = sld [smem:[#allocation19_spill]]  ;;  %s6678_s11 = sld [smem:[#allocation17_spill]] }
 0x408   : > { %s6679_s19 = sld [smem:[#allocation20_spill]]  ;;  %s6680_s17 = smov %s4358_s18 }
 0x40d   : > { %p28_p0 = scmp.ge.s32.totalorder %s6677_s20, 6   ;;  %s6681_s18 = smov %s6678_s11 }
 0x40f   :  { %30 = sbr.rel (!%p28_p0) target bundleno = 13 (0xd), region = 133 }
 0x416   :  { %3650 = vsyncpa [#allocation3], 1 }
 0x417   :  { %3652 = vsyncpa [#allocation3 + $0x1], 1 }
 0x418   :  { %3653 = vsyncpa [#allocation6], 1 }
 0x419   :  { %3655 = vsyncpa [#allocation6 + $0x1], 1 }
 0x41a   :  { %3656 = vsyncpa [#allocation9], 1 }
 0x41b   :  { %3657 = vsyncpa [#allocation4], 1 }
 0x41c   :  { %3659 = vsyncpa [#allocation4 + $0x1], 1 }

</bundles_post_ra>
